<compile_context>
chip_gen: v7x
topology: tpu7x:2x2x1
jax: 0.10.0
libtpu: 0.0.40
codegen_flags: <defaults>
</compile_context>

<pallas_src>
import functools
import math

import jax
import jax.numpy as jnp
from jax.experimental import pallas as pl
from jax.experimental.pallas import tpu as pltpu


_SQRT2_INV = 0.7071067811865475
_LANE = 128
_MAX_TILE = 2048          # cap for N-direction tiles (VMEM-safe on v5e/v6e/v7x)


def _erf(x):
    # Abramowitz & Stegun 7.1.26 (max abs err ~1.5e-7); exp/mul/add only.
    a1, a2, a3, a4, a5 = 0.254829592, -0.284496736, 1.421413741, -1.453152027, 1.061405429
    p = 0.3275911
    ax = jnp.abs(x)
    t = 1.0 / (1.0 + p * ax)
    poly = ((((a5 * t + a4) * t + a3) * t + a2) * t + a1) * t
    y = 1.0 - poly * jnp.exp(-ax * ax)
    return jnp.where(x >= 0, y, -y)


def _gelu(x):
    # exact (erf-based) GELU like torch.nn.functional.gelu default
    return x * 0.5 * (1.0 + _erf(x * _SQRT2_INV))


def _round_up(n, mult):
    return ((n + mult - 1) // mult) * mult


def _pick_tile(npad, cap=_MAX_TILE):
    """Largest multiple-of-128 divisor of npad that does not exceed cap."""
    best = _LANE
    t = _LANE
    while t <= min(npad, cap):
        if npad % t == 0:
            best = t
        t += _LANE
    return best


# ----------------------------------------------------------------------------
# fc0: 3 broadcast FMAs producing h directly in the transposed [B, C, N] layout
# ----------------------------------------------------------------------------

def _fc0_kernel(x_ref, w_ref, b_ref, o_ref):
    xt = x_ref[0]                                            # [3, TN]
    w = w_ref[...]                                           # [C, 3]
    o_ref[0] = (w[:, 0:1] * xt[0:1, :] + w[:, 1:2] * xt[1:2, :]
                + w[:, 2:3] * xt[2:3, :] + b_ref[...])


def fc0_transposed(xT, w_ct, b_c1):
    B, _, npad = xT.shape
    C = w_ct.shape[0]
    TN = _pick_tile(npad)
    return pl.pallas_call(
        _fc0_kernel,
        grid=(B, npad // TN),
        in_specs=[pl.BlockSpec((1, 3, TN), lambda b, n: (b, 0, n)),
                  pl.BlockSpec((C, 3), lambda b, n: (0, 0)),
                  pl.BlockSpec((C, 1), lambda b, n: (0, 0))],
        out_specs=pl.BlockSpec((1, C, TN), lambda b, n: (b, 0, n)),
        out_shape=jax.ShapeDtypeStruct((B, C, npad), jnp.float32),
        compiler_params=pltpu.CompilerParams(
            dimension_semantics=("parallel", "parallel")),
    )(xT, w_ct, b_c1)


# ----------------------------------------------------------------------------
# Forward VFT on used modes only (bf16 matrix, deferred BN/GELU applied on load)
# ----------------------------------------------------------------------------

def _fwd_vft_kernel(vu_ref, h_ref, sc_ref, sh_ref, xs_ref, *, apply_act):
    k = pl.program_id(1)
    h = h_ref[0]                                             # [C, TK] f32
    if apply_act:
        h = _gelu(h * sc_ref[...] + sh_ref[...])
    contrib = jnp.dot(h.astype(jnp.bfloat16), vu_ref[0],
                      preferred_element_type=jnp.float32)    # [C, 2G]

    @pl.when(k == 0)
    def _():
        xs_ref[0] = contrib

    @pl.when(k > 0)
    def _():
        xs_ref[0] = xs_ref[0] + contrib


def vft_forward(vuT, h, scale, shift, apply_act):
    B, npad, M2 = vuT.shape                                  # M2 = 4*m^2 (Re cols | Im cols)
    C = h.shape[1]
    TK = _pick_tile(npad)
    kern = functools.partial(_fwd_vft_kernel, apply_act=apply_act)
    ce = pl.CostEstimate(flops=2 * B * npad * C * M2,
                         transcendentals=(B * npad * C if apply_act else 0),
                         bytes_accessed=int(vuT.size * 2 + h.size * 4 + B * C * M2 * 4))
    return pl.pallas_call(
        kern,
        grid=(B, npad // TK),
        in_specs=[pl.BlockSpec((1, TK, M2), lambda b, k: (b, k, 0)),
                  pl.BlockSpec((1, C, TK), lambda b, k: (b, 0, k)),
                  pl.BlockSpec((C, 1), lambda b, k: (0, 0)),
                  pl.BlockSpec((C, 1), lambda b, k: (0, 0))],
        out_specs=pl.BlockSpec((1, C, M2), lambda b, k: (b, 0, 0)),
        out_shape=jax.ShapeDtypeStruct((B, C, M2), jnp.float32),
        compiler_params=pltpu.CompilerParams(
            dimension_semantics=("parallel", "arbitrary")),
        cost_estimate=ce,
    )(vuT, h, scale, shift)


# ----------------------------------------------------------------------------
# Per-mode complex channel mixing, with the conjugate-symmetric extension
# (incl. torch's channel flip) folded into the packed weights -> one small call
# producing all Mtot spectral rows.  N-independent work.
# ----------------------------------------------------------------------------

def _mix_kernel(xc_ref, wc_ref, o_ref):
    o_ref[...] = jnp.einsum('gbk,gkn->gbn', xc_ref[...], wc_ref[...],
                            preferred_element_type=jnp.float32)


def spectral_mix(xc_full, wc_full):
    Mtot, B, K2 = xc_full.shape
    return pl.pallas_call(
        _mix_kernel,
        grid=(1,),
        in_specs=[pl.BlockSpec((Mtot, B, K2), lambda i: (0, 0, 0)),
                  pl.BlockSpec((Mtot, K2, K2), lambda i: (0, 0, 0))],
        out_specs=pl.BlockSpec((Mtot, B, K2), lambda i: (0, 0, 0)),
        out_shape=jax.ShapeDtypeStruct((Mtot, B, K2), jnp.float32),
        compiler_params=pltpu.CompilerParams(dimension_semantics=("arbitrary",)),
    )(xc_full, wc_full)


# ----------------------------------------------------------------------------
# Inverse VFT (real part only) fused with the 1x1 Conv1d residual and either the
# BN batch-statistics reduction or nothing (GELU deferred to consumers).
# Transposed lane-dense layout: s stored as [B, C, N].
# ----------------------------------------------------------------------------

def _inv_core(xf_ref, vs_ref, h_ref, wt_ref, b_ref, sc_ref, sh_ref, apply_act):
    h = h_ref[0]                                             # [C, TN]
    if apply_act:
        h = _gelu(h * sc_ref[...] + sh_ref[...])
    s = jnp.dot(xf_ref[0], vs_ref[0], preferred_element_type=jnp.float32)   # bf16 MXU
    return s + jnp.dot(wt_ref[...], h, preferred_element_type=jnp.float32) + b_ref[...]


def _inv_stats_kernel(xf_ref, vs_ref, h_ref, wt_ref, b_ref, sc_ref, sh_ref,
                      s_ref, st_ref, *, apply_act, n_real, tn, need_mask):
    n = pl.program_id(1)
    s = _inv_core(xf_ref, vs_ref, h_ref, wt_ref, b_ref, sc_ref, sh_ref, apply_act)
    s_ref[0] = s
    if need_mask:                                            # only compiled when Npad != N
        col = n * tn + jax.lax.broadcasted_iota(jnp.int32, s.shape, 1)
        sm = jnp.where(col < n_real, s, 0.0)
    else:
        sm = s
    part = jnp.concatenate([jnp.sum(sm, axis=1, keepdims=True),
                            jnp.sum(sm * sm, axis=1, keepdims=True)], axis=1)  # [C, 2]

    @pl.when(n == 0)
    def _():
        st_ref[0] = part

    @pl.when(n > 0)
    def _():
        st_ref[0] = st_ref[0] + part


def _inv_plain_kernel(xf_ref, vs_ref, h_ref, wt_ref, b_ref, sc_ref, sh_ref,
                      s_ref, *, apply_act):
    s_ref[0] = _inv_core(xf_ref, vs_ref, h_ref, wt_ref, b_ref, sc_ref, sh_ref, apply_act)


def inverse_conv(XF, VS, h, conv_wt, conv_b, scale, shift, apply_act, with_stats, n_real):
    B, C, K2 = XF.shape
    npad = h.shape[2]
    TN = _pick_tile(npad)
    NT = npad // TN
    in_specs = [pl.BlockSpec((1, C, K2), lambda b, n: (b, 0, 0)),
                pl.BlockSpec((1, K2, TN), lambda b, n: (b, 0, n)),
                pl.BlockSpec((1, C, TN), lambda b, n: (b, 0, n)),
                pl.BlockSpec((C, C), lambda b, n: (0, 0)),
                pl.BlockSpec((C, 1), lambda b, n: (0, 0)),
                pl.BlockSpec((C, 1), lambda b, n: (0, 0)),
                pl.BlockSpec((C, 1), lambda b, n: (0, 0))]
    s_spec = pl.BlockSpec((1, C, TN), lambda b, n: (b, 0, n))
    ce = pl.CostEstimate(flops=2 * B * npad * C * (K2 + C),
                         transcendentals=(B * npad * C if apply_act else 0),
                         bytes_accessed=int(VS.size * 2 + 2 * h.size * 4 + XF.size * 2))
    if with_stats:
        kern = functools.partial(_inv_stats_kernel, apply_act=apply_act,
                                 n_real=n_real, tn=TN, need_mask=(npad != n_real))
        return pl.pallas_call(
            kern,
            grid=(B, NT),
            in_specs=in_specs,
            out_specs=(s_spec, pl.BlockSpec((1, C, 2), lambda b, n: (b, 0, 0))),
            out_shape=(jax.ShapeDtypeStruct((B, C, npad), jnp.float32),
                       jax.ShapeDtypeStruct((B, C, 2), jnp.float32)),
            compiler_params=pltpu.CompilerParams(
                dimension_semantics=("parallel", "arbitrary")),
            cost_estimate=ce,
        )(XF, VS, h, conv_wt, conv_b, scale, shift)
    kern = functools.partial(_inv_plain_kernel, apply_act=apply_act)
    return pl.pallas_call(
        kern,
        grid=(B, NT),
        in_specs=in_specs,
        out_specs=s_spec,
        out_shape=jax.ShapeDtypeStruct((B, C, npad), jnp.float32),
        compiler_params=pltpu.CompilerParams(
            dimension_semantics=("parallel", "parallel")),
        cost_estimate=ce,
    )(XF, VS, h, conv_wt, conv_b, scale, shift)


# ----------------------------------------------------------------------------
# Head: deferred BN/GELU + fc1 + ReLU + fc2 fused; fc2 is a VPU mul + sublane
# reduction with a lane-dense [1, TN] output.
# ----------------------------------------------------------------------------

def _head_kernel(h_ref, x_ref, w1a_ref, w1b_ref, b1_ref, w2_ref, b2_ref,
                 sc_ref, sh_ref, o_ref, *, apply_act):
    h = h_ref[0]                                             # [C, TN]
    if apply_act:
        h = _gelu(h * sc_ref[...] + sh_ref[...])
    xt = x_ref[0]                                            # [3, TN]
    w1b = w1b_ref[...]
    t = (jnp.dot(w1a_ref[...], h, preferred_element_type=jnp.float32)
         + w1b[:, 0:1] * xt[0:1, :] + w1b[:, 1:2] * xt[1:2, :] + w1b[:, 2:3] * xt[2:3, :]
         + b1_ref[...])                                      # [128, TN]
    t = jnp.maximum(t, 0.0)
    o_ref[0] = jnp.sum(t * w2_ref[...], axis=0, keepdims=True) + b2_ref[...]


def head_transposed(h, xT, w1aT, w1bT, b1, w2, b2, scale, shift, apply_act):
    B, C, npad = h.shape
    H = w1aT.shape[0]
    TN = _pick_tile(npad)
    kern = functools.partial(_head_kernel, apply_act=apply_act)
    return pl.pallas_call(
        kern,
        grid=(B, npad // TN),
        in_specs=[pl.BlockSpec((1, C, TN), lambda b, n: (b, 0, n)),
                  pl.BlockSpec((1, 3, TN), lambda b, n: (b, 0, n)),
                  pl.BlockSpec((H, C), lambda b, n: (0, 0)),
                  pl.BlockSpec((H, 3), lambda b, n: (0, 0)),
                  pl.BlockSpec((H, 1), lambda b, n: (0, 0)),
                  pl.BlockSpec((H, 1), lambda b, n: (0, 0)),
                  pl.BlockSpec((1, 1), lambda b, n: (0, 0)),
                  pl.BlockSpec((C, 1), lambda b, n: (0, 0)),
                  pl.BlockSpec((C, 1), lambda b, n: (0, 0))],
        out_specs=pl.BlockSpec((1, 1, TN), lambda b, n: (b, 0, n)),
        out_shape=jax.ShapeDtypeStruct((B, 1, npad), jnp.float32),
        compiler_params=pltpu.CompilerParams(
            dimension_semantics=("parallel", "parallel")),
    )(h, xT, w1aT, w1bT, b1, w2, b2, scale, shift)


# ----------------------------------------------------------------------------
# VFT matrices (plain-JAX setup; built once per forward call), bf16, zero padded
# ----------------------------------------------------------------------------

def build_vft(xpos, ypos, m, n_real, npad):
    """vuT: [B, Npad, 4m^2]  columns [Re(used modes) | Im(used modes)], bf16, pad rows = 0
       VS : [B, 2*Mtot, Npad] rows [Re | Im] of the forward matrix in the row order that
            pairs with the emitted spectral rows, times 2/N, bf16, pad columns = 0."""
    xpos = xpos - jnp.min(xpos)
    xpos = xpos * 6.28 / jnp.max(xpos)
    ypos = ypos - jnp.min(ypos)
    ypos = ypos * 6.28 / jnp.max(ypos)
    B, N = xpos.shape
    G = 2 * m * m
    Mtot = 2 * m * (2 * m - 1)
    kx = jnp.concatenate([jnp.arange(m), jnp.arange(-m, 0)]).astype(jnp.float32)        # [2m]
    ky = jnp.concatenate([jnp.arange(m), jnp.arange(-(m - 1), 0)]).astype(jnp.float32)  # [2m-1]

    # forward: torch consumes flat forward-matrix rows r = a*(2m-1)+b (a<2m, b<m); row r
    # carries frequencies (kx[r % 2m], ky[r // 2m]).
    a = jnp.arange(2 * m)
    b = jnp.arange(m)
    r_used = (a[:, None] * (2 * m - 1) + b[None, :]).reshape(-1)        # [G], mode-major
    kx_u = kx[r_used % (2 * m)]
    ky_u = ky[r_used // (2 * m)]
    ph_u = xpos[:, :, None] * kx_u[None, None, :] + ypos[:, :, None] * ky_u[None, None, :]
    vuT = jnp.concatenate([jnp.cos(ph_u), -jnp.sin(ph_u)], axis=-1)      # [B, N, 2G]
    vuT = jnp.pad(vuT, ((0, 0), (0, npad - N), (0, 0))).astype(jnp.bfloat16)

    # inverse: spectral row j pairs with forward-matrix row r_inv[j].  Rows [0,G) keep the
    # flat order; rows [G,Mtot) hold the conjugate extension emitted in ascending
    # source-mode order, which pairs with forward rows Mtot-1 ... G (descending).
    r_inv = jnp.concatenate([jnp.arange(G), jnp.arange(Mtot - 1, G - 1, -1)])
    kx_i = kx[r_inv % (2 * m)]
    ky_i = ky[r_inv // (2 * m)]
    ph_i = kx_i[None, :, None] * xpos[:, None, :] + ky_i[None, :, None] * ypos[:, None, :]
    vs = jnp.concatenate([jnp.cos(ph_i), -jnp.sin(ph_i)], axis=1) * (2.0 / n_real)
    vs = jnp.pad(vs, ((0, 0), (0, 0), (0, npad - N))).astype(jnp.bfloat16)  # [B, 2Mtot, Npad]
    return vuT, vs


# ----------------------------------------------------------------------------
# One FNO block: spectral conv + 1x1 conv + (BN stats); BN affine + GELU deferred
# ----------------------------------------------------------------------------

def fno_block(h, vuT, vs, blk, m, use_bn, act, n_real):
    B, C, _ = h.shape
    G = 2 * m * m
    apply_act = act is not None
    if apply_act:
        scale, shift = act
    else:
        scale = jnp.ones((C, 1), jnp.float32)
        shift = jnp.zeros((C, 1), jnp.float32)

    xsT = vft_forward(vuT, h, scale, shift, apply_act)                   # [B, C, 2G]
    # tiny, N-independent glue: mode-major packed complex vectors [G, B, 2C]
    xc = jnp.concatenate([xsT[:, :, :G], xsT[:, :, G:]], axis=1).transpose(2, 0, 1)
    xc_full = jnp.concatenate([xc, xc[2 * m:]], axis=0)                  # [Mtot, B, 2C]
    out = spectral_mix(xc_full, blk["wc_full"])                          # [Mtot, B, 2C]
    XF = jnp.concatenate([out[:, :, :C], out[:, :, C:]],
                         axis=0).transpose(1, 2, 0).astype(jnp.bfloat16)  # [B, C, 2Mtot]

    if use_bn:
        s, stats = inverse_conv(XF, vs, h, blk["conv_wt"], blk["conv_b"],
                                scale, shift, apply_act, True, n_real)
        cnt = float(s.shape[0] * n_real)
        tot = jnp.sum(stats, axis=0)                                     # [C, 2]
        mean = tot[:, 0] / cnt
        var = jnp.maximum(tot[:, 1] / cnt - mean * mean, 0.0)
        rstd = jax.lax.rsqrt(var + 1e-5)
        new_scale = (blk["bn_g"] * rstd).reshape(C, 1)
        new_shift = (blk["bn_b"] - mean * blk["bn_g"] * rstd).reshape(C, 1)
        # TODO(synk): BatchNorm1d running_mean/running_var buffers are not updated
        # (training-mode batch-statistic forward only).
        return s, (new_scale, new_shift)
    s = inverse_conv(XF, vs, h, blk["conv_wt"], blk["conv_b"],
                     scale, shift, apply_act, False, n_real)
    return s, (jnp.ones((C, 1), jnp.float32), jnp.zeros((C, 1), jnp.float32))


# ----------------------------------------------------------------------------
# Full FNO_dse forward
# ----------------------------------------------------------------------------

def fno_dse_forward(params, x, modes, num_blocks, use_batch_norm=True):
    # x: [B, N, 3]  (cols 0,1 = positions, col 2 = value)
    B, N, _ = x.shape
    C = params["fc0_wt"].shape[0]
    npad = _round_up(max(N, _LANE), _LANE)
    vuT, vs = build_vft(x[:, :, 0], x[:, :, 1], modes, N, npad)
    xT = jnp.pad(x.transpose(0, 2, 1), ((0, 0), (0, 0), (0, npad - N)))   # [B, 3, Npad]

    h = fc0_transposed(xT, params["fc0_wt"], params["fc0_b"])             # [B, C, Npad]
    act = None
    for blk in params["blocks"][:num_blocks]:
        h, act = fno_block(h, vuT, vs, blk, modes, use_batch_norm, act, N)

    apply_act = act is not None
    if apply_act:
        scale, shift = act
    else:
        scale = jnp.ones((C, 1), jnp.float32)
        shift = jnp.zeros((C, 1), jnp.float32)
    yT = head_transposed(h, xT, params["fc1_waT"], params["fc1_wbT"], params["fc1_b"],
                         params["fc2_w"], params["fc2_b"], scale, shift, apply_act)
    return yT[:, 0, :N][:, :, None]


# ----------------------------------------------------------------------------
# Parameter init (shapes follow the module __init__) + static packing
# ----------------------------------------------------------------------------

def init_params(key, modes, width, num_blocks):
    W, m = width, modes
    ks = jax.random.split(key, 4 + num_blocks)

    def unif(k, shape, bound):
        return jax.random.uniform(k, shape, jnp.float32, -bound, bound)

    p = {}
    p["fc0_w"] = unif(jax.random.fold_in(ks[0], 0), (3, W), 1.0 / math.sqrt(3))
    p["fc0_b"] = unif(jax.random.fold_in(ks[0], 1), (W,), 1.0 / math.sqrt(3))
    p["fc1_w"] = unif(jax.random.fold_in(ks[1], 0), (W + 3, 128), 1.0 / math.sqrt(W + 3))
    p["fc1_b"] = unif(jax.random.fold_in(ks[1], 1), (128,), 1.0 / math.sqrt(W + 3))
    p["fc2_w"] = jnp.zeros((128, 1), jnp.float32)              # fc2.weight.data.fill_(0.0)
    p["fc2_b"] = jnp.full((1,), 1.31, jnp.float32)             # fc2.bias.data.fill_(1.31)

    scale = 1.0 / (W * W)
    blocks = []
    for i in range(num_blocks):
        kk = jax.random.split(ks[4 + i], 8)
        blocks.append({
            "w1_re": scale * jax.random.uniform(kk[0], (W, W, m, m), jnp.float32),
            "w1_im": scale * jax.random.uniform(kk[1], (W, W, m, m), jnp.float32),
            "w2_re": scale * jax.random.uniform(kk[2], (W, W, m, m), jnp.float32),
            "w2_im": scale * jax.random.uniform(kk[3], (W, W, m, m), jnp.float32),
            "conv_w": unif(kk[4], (W, W), 1.0 / math.sqrt(W)),   # [Cout, Cin]
            "conv_b": unif(kk[5], (W,), 1.0 / math.sqrt(W)),
            "bn_g": jnp.ones((W,), jnp.float32),
            "bn_b": jnp.zeros((W,), jnp.float32),
        })
    p["blocks"] = blocks
    return p


def _pack_mode_weights(w1_re, w1_im, w2_re, w2_im, m):
    C = w1_re.shape[0]

    def modes_first(w):                    # [Cin, Cout, m, m] -> [m*m, Cin, Cout]
        return w.transpose(2, 3, 0, 1).reshape(m * m, C, C)

    wr = jnp.concatenate([modes_first(w1_re), modes_first(w2_re)], axis=0)   # [2m^2, C, C]
    wi = jnp.concatenate([modes_first(w1_im), modes_first(w2_im)], axis=0)
    top = jnp.concatenate([wr, wi], axis=2)
    bot = jnp.concatenate([-wi, wr], axis=2)
    wc = jnp.concatenate([top, bot], axis=1)        # [2m^2, 2C, 2C] = [[Wr, Wi], [-Wi, Wr]]
    # conjugate-symmetric extension folded in: output channels flipped, imaginary half
    # negated; rows for source modes 2m .. 2m^2-1 in ascending order.
    wc_ext = jnp.concatenate([wc[:, :, :C][:, :, ::-1], -wc[:, :, C:][:, :, ::-1]], axis=2)
    return jnp.concatenate([wc, wc_ext[2 * m:]], axis=0)   # [Mtot, 2C, 2C]


def pack_params(raw, modes):
    """Static, once-per-model packing into the transposed, lane-dense kernel layouts."""
    W = raw["fc0_w"].shape[1]
    p = {
        "fc0_wt": raw["fc0_w"].T,                         # [W, 3]
        "fc0_b": raw["fc0_b"].reshape(W, 1),
        "fc1_waT": raw["fc1_w"][:W, :].T,                 # [128, W]
        "fc1_wbT": raw["fc1_w"][W:, :].T,                 # [128, 3]
        "fc1_b": raw["fc1_b"].reshape(-1, 1),             # [128, 1]
        "fc2_w": raw["fc2_w"].reshape(-1, 1),             # [128, 1]
        "fc2_b": raw["fc2_b"].reshape(1, 1),
        "blocks": [],
    }
    for blk in raw["blocks"]:
        p["blocks"].append({
            "wc_full": _pack_mode_weights(blk["w1_re"], blk["w1_im"],
                                          blk["w2_re"], blk["w2_im"], modes),
            "conv_wt": blk["conv_w"],                     # [Cout, Cin]
            "conv_b": blk["conv_b"].reshape(W, 1),
            "bn_g": blk["bn_g"],
            "bn_b": blk["bn_b"],
        })
    return p


if __name__ == "__main__":
    modes, width, num_blocks = 4, 32, 2
    B, N = 2, 64

    key = jax.random.PRNGKey(0)
    kx_, kp = jax.random.split(key)
    x = jax.random.uniform(kx_, (B, N, 3), jnp.float32)   # cols 0,1 = positions, col 2 = value
    params = pack_params(init_params(kp, modes, width, num_blocks), modes)

    fwd = jax.jit(functools.partial(fno_dse_forward, modes=modes,
                                    num_blocks=num_blocks, use_batch_norm=True))
    out = jax.block_until_ready(fwd(params, x))
    assert out.shape == (B, N, 1)
    assert bool(jnp.all(jnp.isfinite(out)))
    print("KERNEL_OK")
</pallas_src>

<mosaic_0001>
module attributes {stable_mosaic.version = 11 : i64} {
  func.func @_fc0_kernel(%arg0: i32, %arg1: i32, %arg2: memref<1x3x128xf32, #tpu.memory_space<vmem>>, %arg3: memref<32x3xf32, #tpu.memory_space<vmem>>, %arg4: memref<32x1xf32, #tpu.memory_space<vmem>>, %arg5: memref<1x32x128xf32, #tpu.memory_space<vmem>>) attributes {dimension_semantics = [#tpu.dimension_semantics<parallel>, #tpu.dimension_semantics<parallel>], iteration_bounds = array<i64: 2, 1>, scalar_prefetch = 0 : i64, scratch_operands = 0 : i64, tpu.core_type = #tpu.core_type<tc>, window_params = [{transform_indices = @transform_0, window_bounds = array<i64: 1, 3, 128>}, {pipeline_mode = #tpu.pipeline_mode<synchronous>, transform_indices = @transform_1, window_bounds = array<i64: 32, 3>}, {pipeline_mode = #tpu.pipeline_mode<synchronous>, transform_indices = @transform_2, window_bounds = array<i64: 32, 1>}, {transform_indices = @transform_3, window_bounds = array<i64: 1, 32, 128>}]} {
    %c0 = arith.constant 0 : index
    %c0_0 = arith.constant 0 : index
    %c0_1 = arith.constant 0 : index
    %0 = vector.load %arg2[%c0, %c0_0, %c0_1] : memref<1x3x128xf32, #tpu.memory_space<vmem>>, vector<1x3x128xf32>
    %1 = vector.shape_cast %0 : vector<1x3x128xf32> to vector<3x128xf32>
    %c0_2 = arith.constant 0 : index
    %c0_3 = arith.constant 0 : index
    %2 = vector.load %arg3[%c0_2, %c0_3] : memref<32x3xf32, #tpu.memory_space<vmem>>, vector<32x3xf32>
    %3 = vector.extract_strided_slice %2 {offsets = [0, 0], sizes = [32, 1], strides = [1, 1]} : vector<32x3xf32> to vector<32x1xf32>
    %4 = vector.extract_strided_slice %1 {offsets = [0, 0], sizes = [1, 128], strides = [1, 1]} : vector<3x128xf32> to vector<1x128xf32>
    %5 = vector.broadcast %3 : vector<32x1xf32> to vector<32x128xf32>
    %6 = vector.broadcast %4 : vector<1x128xf32> to vector<32x128xf32>
    %7 = arith.mulf %5, %6 : vector<32x128xf32>
    %8 = vector.extract_strided_slice %2 {offsets = [0, 1], sizes = [32, 1], strides = [1, 1]} : vector<32x3xf32> to vector<32x1xf32>
    %9 = vector.extract_strided_slice %1 {offsets = [1, 0], sizes = [1, 128], strides = [1, 1]} : vector<3x128xf32> to vector<1x128xf32>
    %10 = vector.broadcast %8 : vector<32x1xf32> to vector<32x128xf32>
    %11 = vector.broadcast %9 : vector<1x128xf32> to vector<32x128xf32>
    %12 = arith.mulf %10, %11 : vector<32x128xf32>
    %13 = arith.addf %7, %12 : vector<32x128xf32>
    %14 = vector.extract_strided_slice %2 {offsets = [0, 2], sizes = [32, 1], strides = [1, 1]} : vector<32x3xf32> to vector<32x1xf32>
    %15 = vector.extract_strided_slice %1 {offsets = [2, 0], sizes = [1, 128], strides = [1, 1]} : vector<3x128xf32> to vector<1x128xf32>
    %16 = vector.broadcast %14 : vector<32x1xf32> to vector<32x128xf32>
    %17 = vector.broadcast %15 : vector<1x128xf32> to vector<32x128xf32>
    %18 = arith.mulf %16, %17 : vector<32x128xf32>
    %19 = arith.addf %13, %18 : vector<32x128xf32>
    %c0_4 = arith.constant 0 : index
    %c0_5 = arith.constant 0 : index
    %20 = vector.load %arg4[%c0_4, %c0_5] : memref<32x1xf32, #tpu.memory_space<vmem>>, vector<32x1xf32>
    %21 = vector.broadcast %20 : vector<32x1xf32> to vector<32x128xf32>
    %22 = arith.addf %19, %21 : vector<32x128xf32>
    %c0_6 = arith.constant 0 : index
    %c0_7 = arith.constant 0 : index
    %c0_8 = arith.constant 0 : index
    %23 = vector.load %arg5[%c0_6, %c0_7, %c0_8] : memref<1x32x128xf32, #tpu.memory_space<vmem>>, vector<1x32x128xf32>
    %24 = vector.shape_cast %23 : vector<1x32x128xf32> to vector<32x128xf32>
    %25 = vector.shape_cast %22 : vector<32x128xf32> to vector<1x32x128xf32>
    tpu.vector_store %arg5[%c0_6, %c0_7, %c0_8], %25 {strides = array<i32>} : memref<1x32x128xf32, #tpu.memory_space<vmem>>, vector<1x32x128xf32>,
    return
  }
  func.func @transform_0(%arg0: i32, %arg1: i32) -> (i32, i32, i32) {
    %c0_i32 = arith.constant 0 : i32
    %c0_i32_0 = arith.constant 0 : i32
    return %arg0, %c0_i32, %arg1 : i32, i32, i32
  }
  func.func @transform_1(%arg0: i32, %arg1: i32) -> (i32, i32) {
    %c0_i32 = arith.constant 0 : i32
    %c0_i32_0 = arith.constant 0 : i32
    %c0_i32_1 = arith.constant 0 : i32
    return %c0_i32, %c0_i32_0 : i32, i32
  }
  func.func @transform_2(%arg0: i32, %arg1: i32) -> (i32, i32) {
    %c0_i32 = arith.constant 0 : i32
    %c0_i32_0 = arith.constant 0 : i32
    %c0_i32_1 = arith.constant 0 : i32
    return %c0_i32, %c0_i32_0 : i32, i32
  }
  func.func @transform_3(%arg0: i32, %arg1: i32) -> (i32, i32, i32) {
    %c0_i32 = arith.constant 0 : i32
    %c0_i32_0 = arith.constant 0 : i32
    return %arg0, %c0_i32, %arg1 : i32, i32, i32
  }
}

module attributes {stable_mosaic.version = 11 : i64} {
  func.func @_fwd_vft_kernel(%arg0: i32, %arg1: i32, %arg2: memref<1x128x64xbf16, #tpu.memory_space<vmem>>, %arg3: memref<1x32x128xf32, #tpu.memory_space<vmem>>, %arg4: memref<32x1xf32, #tpu.memory_space<vmem>>, %arg5: memref<32x1xf32, #tpu.memory_space<vmem>>, %arg6: memref<1x32x64xf32, #tpu.memory_space<vmem>>) attributes {dimension_semantics = [#tpu.dimension_semantics<parallel>, #tpu.dimension_semantics<arbitrary>], iteration_bounds = array<i64: 2, 1>, scalar_prefetch = 0 : i64, scratch_operands = 0 : i64, tpu.core_type = #tpu.core_type<tc>, window_params = [{transform_indices = @transform_0, window_bounds = array<i64: 1, 128, 64>}, {transform_indices = @transform_1, window_bounds = array<i64: 1, 32, 128>}, {pipeline_mode = #tpu.pipeline_mode<synchronous>, transform_indices = @transform_2, window_bounds = array<i64: 32, 1>}, {pipeline_mode = #tpu.pipeline_mode<synchronous>, transform_indices = @transform_3, window_bounds = array<i64: 32, 1>}, {transform_indices = @transform_4, window_bounds = array<i64: 1, 32, 64>}]} {
    %c0 = arith.constant 0 : index
    %c0_0 = arith.constant 0 : index
    %c0_1 = arith.constant 0 : index
    %0 = vector.load %arg3[%c0, %c0_0, %c0_1] : memref<1x32x128xf32, #tpu.memory_space<vmem>>, vector<1x32x128xf32>
    %1 = vector.shape_cast %0 : vector<1x32x128xf32> to vector<32x128xf32>
    %2 = arith.truncf %1 : vector<32x128xf32> to vector<32x128xbf16>
    %c0_2 = arith.constant 0 : index
    %c0_3 = arith.constant 0 : index
    %c0_4 = arith.constant 0 : index
    %3 = vector.load %arg2[%c0_2, %c0_3, %c0_4] : memref<1x128x64xbf16, #tpu.memory_space<vmem>>, vector<1x128x64xbf16>
    %4 = vector.shape_cast %3 : vector<1x128x64xbf16> to vector<128x64xbf16>
    %cst = arith.constant dense<0.000000e+00> : vector<32x64xf32>
    %5 = tpu.matmul %2, %4, %cst {dimension_numbers = #tpu.dot_dimension_numbers<[1], [0], [0], [1], [0, 0, 1, 1], [], []>} : vector<32x128xbf16>, vector<128x64xbf16>, vector<32x64xf32> -> vector<32x64xf32>
    %c0_i32 = arith.constant 0 : i32
    %6 = arith.cmpi eq, %arg1, %c0_i32 : i32
    %7 = arith.extui %6 : i1 to i32
    %c0_i32_5 = arith.constant 0 : i32
    %8 = arith.cmpi ne, %7, %c0_i32_5 : i32
    scf.if %8 {
      %c0_8 = arith.constant 0 : index
      %c0_9 = arith.constant 0 : index
      %c0_10 = arith.constant 0 : index
      %12 = vector.load %arg6[%c0_8, %c0_9, %c0_10] : memref<1x32x64xf32, #tpu.memory_space<vmem>>, vector<1x32x64xf32>
      %13 = vector.shape_cast %12 : vector<1x32x64xf32> to vector<32x64xf32>
      %14 = vector.shape_cast %5 : vector<32x64xf32> to vector<1x32x64xf32>
      tpu.vector_store %arg6[%c0_8, %c0_9, %c0_10], %14 {strides = array<i32>} : memref<1x32x64xf32, #tpu.memory_space<vmem>>, vector<1x32x64xf32>,
    } else {
    }
    %c0_i32_6 = arith.constant 0 : i32
    %9 = arith.cmpi sgt, %arg1, %c0_i32_6 : i32
    %10 = arith.extui %9 : i1 to i32
    %c0_i32_7 = arith.constant 0 : i32
    %11 = arith.cmpi ne, %10, %c0_i32_7 : i32
    scf.if %11 {
      %c0_8 = arith.constant 0 : index
      %c0_9 = arith.constant 0 : index
      %c0_10 = arith.constant 0 : index
      %12 = vector.load %arg6[%c0_8, %c0_9, %c0_10] : memref<1x32x64xf32, #tpu.memory_space<vmem>>, vector<1x32x64xf32>
      %13 = vector.shape_cast %12 : vector<1x32x64xf32> to vector<32x64xf32>
      %14 = arith.addf %13, %5 : vector<32x64xf32>
      %c0_11 = arith.constant 0 : index
      %c0_12 = arith.constant 0 : index
      %c0_13 = arith.constant 0 : index
      %15 = vector.load %arg6[%c0_11, %c0_12, %c0_13] : memref<1x32x64xf32, #tpu.memory_space<vmem>>, vector<1x32x64xf32>
      %16 = vector.shape_cast %15 : vector<1x32x64xf32> to vector<32x64xf32>
      %17 = vector.shape_cast %14 : vector<32x64xf32> to vector<1x32x64xf32>
      tpu.vector_store %arg6[%c0_11, %c0_12, %c0_13], %17 {strides = array<i32>} : memref<1x32x64xf32, #tpu.memory_space<vmem>>, vector<1x32x64xf32>,
    } else {
    }
    return
  }
  func.func @transform_0(%arg0: i32, %arg1: i32) -> (i32, i32, i32) {
    %c0_i32 = arith.constant 0 : i32
    %c0_i32_0 = arith.constant 0 : i32
    return %arg0, %arg1, %c0_i32 : i32, i32, i32
  }
  func.func @transform_1(%arg0: i32, %arg1: i32) -> (i32, i32, i32) {
    %c0_i32 = arith.constant 0 : i32
    %c0_i32_0 = arith.constant 0 : i32
    return %arg0, %c0_i32, %arg1 : i32, i32, i32
  }
  func.func @transform_2(%arg0: i32, %arg1: i32) -> (i32, i32) {
    %c0_i32 = arith.constant 0 : i32
    %c0_i32_0 = arith.constant 0 : i32
    %c0_i32_1 = arith.constant 0 : i32
    return %c0_i32, %c0_i32_0 : i32, i32
  }
  func.func @transform_3(%arg0: i32, %arg1: i32) -> (i32, i32) {
    %c0_i32 = arith.constant 0 : i32
    %c0_i32_0 = arith.constant 0 : i32
    %c0_i32_1 = arith.constant 0 : i32
    return %c0_i32, %c0_i32_0 : i32, i32
  }
  func.func @transform_4(%arg0: i32, %arg1: i32) -> (i32, i32, i32) {
    %c0_i32 = arith.constant 0 : i32
    %c0_i32_0 = arith.constant 0 : i32
    %c0_i32_1 = arith.constant 0 : i32
    return %arg0, %c0_i32, %c0_i32_0 : i32, i32, i32
  }
}

module attributes {stable_mosaic.version = 11 : i64} {
  func.func @_mix_kernel(%arg0: i32, %arg1: memref<56x2x64xf32, #tpu.memory_space<vmem>>, %arg2: memref<56x64x64xf32, #tpu.memory_space<vmem>>, %arg3: memref<56x2x64xf32, #tpu.memory_space<vmem>>) attributes {dimension_semantics = [#tpu.dimension_semantics<arbitrary>], iteration_bounds = array<i64: 1>, scalar_prefetch = 0 : i64, scratch_operands = 0 : i64, tpu.core_type = #tpu.core_type<tc>, window_params = [{pipeline_mode = #tpu.pipeline_mode<synchronous>, transform_indices = @transform_0, window_bounds = array<i64: 56, 2, 64>}, {pipeline_mode = #tpu.pipeline_mode<synchronous>, transform_indices = @transform_1, window_bounds = array<i64: 56, 64, 64>}, {pipeline_mode = #tpu.pipeline_mode<synchronous>, transform_indices = @transform_2, window_bounds = array<i64: 56, 2, 64>}]} {
    %c0 = arith.constant 0 : index
    %c0_0 = arith.constant 0 : index
    %c0_1 = arith.constant 0 : index
    %0 = vector.load %arg1[%c0, %c0_0, %c0_1] : memref<56x2x64xf32, #tpu.memory_space<vmem>>, vector<56x2x64xf32>
    %c0_2 = arith.constant 0 : index
    %c0_3 = arith.constant 0 : index
    %c0_4 = arith.constant 0 : index
    %1 = vector.load %arg2[%c0_2, %c0_3, %c0_4] : memref<56x64x64xf32, #tpu.memory_space<vmem>>, vector<56x64x64xf32>
    "tpu.trace_start"() <{level = 10 : i32, message = "gbk,gkn->gbn"}> : () -> ()
    %cst = arith.constant dense<0.000000e+00> : vector<56x2x64xf32>
    %2 = tpu.matmul %0, %1, %cst {dimension_numbers = #tpu.dot_dimension_numbers<[2], [1], [1], [2], [0, 0, 0, 1, 1, 2], [0], [0]>} : vector<56x2x64xf32>, vector<56x64x64xf32>, vector<56x2x64xf32> -> vector<56x2x64xf32>
    "tpu.trace_stop"() : () -> ()
    %c0_5 = arith.constant 0 : index
    %c0_6 = arith.constant 0 : index
    %c0_7 = arith.constant 0 : index
    %3 = vector.load %arg3[%c0_5, %c0_6, %c0_7] : memref<56x2x64xf32, #tpu.memory_space<vmem>>, vector<56x2x64xf32>
    tpu.vector_store %arg3[%c0_5, %c0_6, %c0_7], %2 {strides = array<i32>} : memref<56x2x64xf32, #tpu.memory_space<vmem>>, vector<56x2x64xf32>,
    return
  }
  func.func @transform_0(%arg0: i32) -> (i32, i32, i32) {
    %c0_i32 = arith.constant 0 : i32
    %c0_i32_0 = arith.constant 0 : i32
    %c0_i32_1 = arith.constant 0 : i32
    %c0_i32_2 = arith.constant 0 : i32
    return %c0_i32, %c0_i32_0, %c0_i32_1 : i32, i32, i32
  }
  func.func @transform_1(%arg0: i32) -> (i32, i32, i32) {
    %c0_i32 = arith.constant 0 : i32
    %c0_i32_0 = arith.constant 0 : i32
    %c0_i32_1 = arith.constant 0 : i32
    %c0_i32_2 = arith.constant 0 : i32
    return %c0_i32, %c0_i32_0, %c0_i32_1 : i32, i32, i32
  }
  func.func @transform_2(%arg0: i32) -> (i32, i32, i32) {
    %c0_i32 = arith.constant 0 : i32
    %c0_i32_0 = arith.constant 0 : i32
    %c0_i32_1 = arith.constant 0 : i32
    %c0_i32_2 = arith.constant 0 : i32
    return %c0_i32, %c0_i32_0, %c0_i32_1 : i32, i32, i32
  }
}

module attributes {stable_mosaic.version = 11 : i64} {
  func.func @_inv_stats_kernel(%arg0: i32, %arg1: i32, %arg2: memref<1x32x112xbf16, #tpu.memory_space<vmem>>, %arg3: memref<1x112x128xbf16, #tpu.memory_space<vmem>>, %arg4: memref<1x32x128xf32, #tpu.memory_space<vmem>>, %arg5: memref<32x32xf32, #tpu.memory_space<vmem>>, %arg6: memref<32x1xf32, #tpu.memory_space<vmem>>, %arg7: memref<32x1xf32, #tpu.memory_space<vmem>>, %arg8: memref<32x1xf32, #tpu.memory_space<vmem>>, %arg9: memref<1x32x128xf32, #tpu.memory_space<vmem>>, %arg10: memref<1x32x2xf32, #tpu.memory_space<vmem>>) attributes {dimension_semantics = [#tpu.dimension_semantics<parallel>, #tpu.dimension_semantics<arbitrary>], iteration_bounds = array<i64: 2, 1>, scalar_prefetch = 0 : i64, scratch_operands = 0 : i64, tpu.core_type = #tpu.core_type<tc>, window_params = [{transform_indices = @transform_0, window_bounds = array<i64: 1, 32, 112>}, {transform_indices = @transform_1, window_bounds = array<i64: 1, 112, 128>}, {transform_indices = @transform_2, window_bounds = array<i64: 1, 32, 128>}, {pipeline_mode = #tpu.pipeline_mode<synchronous>, transform_indices = @transform_3, window_bounds = array<i64: 32, 32>}, {pipeline_mode = #tpu.pipeline_mode<synchronous>, transform_indices = @transform_4, window_bounds = array<i64: 32, 1>}, {pipeline_mode = #tpu.pipeline_mode<synchronous>, transform_indices = @transform_5, window_bounds = array<i64: 32, 1>}, {pipeline_mode = #tpu.pipeline_mode<synchronous>, transform_indices = @transform_6, window_bounds = array<i64: 32, 1>}, {transform_indices = @transform_7, window_bounds = array<i64: 1, 32, 128>}, {transform_indices = @transform_8, window_bounds = array<i64: 1, 32, 2>}]} {
    %c0 = arith.constant 0 : index
    %c0_0 = arith.constant 0 : index
    %c0_1 = arith.constant 0 : index
    %0 = vector.load %arg4[%c0, %c0_0, %c0_1] : memref<1x32x128xf32, #tpu.memory_space<vmem>>, vector<1x32x128xf32>
    %1 = vector.shape_cast %0 : vector<1x32x128xf32> to vector<32x128xf32>
    %c0_2 = arith.constant 0 : index
    %c0_3 = arith.constant 0 : index
    %c0_4 = arith.constant 0 : index
    %2 = vector.load %arg2[%c0_2, %c0_3, %c0_4] : memref<1x32x112xbf16, #tpu.memory_space<vmem>>, vector<1x32x112xbf16>
    %3 = vector.shape_cast %2 : vector<1x32x112xbf16> to vector<32x112xbf16>
    %c0_5 = arith.constant 0 : index
    %c0_6 = arith.constant 0 : index
    %c0_7 = arith.constant 0 : index
    %4 = vector.load %arg3[%c0_5, %c0_6, %c0_7] : memref<1x112x128xbf16, #tpu.memory_space<vmem>>, vector<1x112x128xbf16>
    %5 = vector.shape_cast %4 : vector<1x112x128xbf16> to vector<112x128xbf16>
    %cst = arith.constant dense<0.000000e+00> : vector<32x128xf32>
    %6 = tpu.matmul %3, %5, %cst {dimension_numbers = #tpu.dot_dimension_numbers<[1], [0], [0], [1], [0, 0, 1, 1], [], []>} : vector<32x112xbf16>, vector<112x128xbf16>, vector<32x128xf32> -> vector<32x128xf32>
    %c0_8 = arith.constant 0 : index
    %c0_9 = arith.constant 0 : index
    %7 = vector.load %arg5[%c0_8, %c0_9] : memref<32x32xf32, #tpu.memory_space<vmem>>, vector<32x32xf32>
    %cst_10 = arith.constant dense<0.000000e+00> : vector<32x128xf32>
    %8 = tpu.matmul %7, %1, %cst_10 {dimension_numbers = #tpu.dot_dimension_numbers<[1], [0], [0], [1], [0, 0, 1, 1], [], []>} : vector<32x32xf32>, vector<32x128xf32>, vector<32x128xf32> -> vector<32x128xf32>
    %9 = arith.addf %6, %8 : vector<32x128xf32>
    %c0_11 = arith.constant 0 : index
    %c0_12 = arith.constant 0 : index
    %10 = vector.load %arg6[%c0_11, %c0_12] : memref<32x1xf32, #tpu.memory_space<vmem>>, vector<32x1xf32>
    %11 = vector.broadcast %10 : vector<32x1xf32> to vector<32x128xf32>
    %12 = arith.addf %9, %11 : vector<32x128xf32>
    %c0_13 = arith.constant 0 : index
    %c0_14 = arith.constant 0 : index
    %c0_15 = arith.constant 0 : index
    %13 = vector.load %arg9[%c0_13, %c0_14, %c0_15] : memref<1x32x128xf32, #tpu.memory_space<vmem>>, vector<1x32x128xf32>
    %14 = vector.shape_cast %13 : vector<1x32x128xf32> to vector<32x128xf32>
    %15 = vector.shape_cast %12 : vector<32x128xf32> to vector<1x32x128xf32>
    tpu.vector_store %arg9[%c0_13, %c0_14, %c0_15], %15 {strides = array<i32>} : memref<1x32x128xf32, #tpu.memory_space<vmem>>, vector<1x32x128xf32>,
    %c128_i32 = arith.constant 128 : i32
    %16 = arith.muli %arg1, %c128_i32 : i32
    %17 = tpu.iota {dimensions = array<i32: 1>} : vector<32x128xi32>
    %18 = vector.broadcast %16 : i32 to vector<32x128xi32>
    %19 = arith.addi %18, %17 : vector<32x128xi32>
    %c64_i32 = arith.constant 64 : i32
    %20 = vector.broadcast %c64_i32 : i32 to vector<32x128xi32>
    %21 = arith.cmpi slt, %19, %20 : vector<32x128xi32>
    %cst_16 = arith.constant 0.000000e+00 : f32
    %22 = vector.broadcast %cst_16 : f32 to vector<32x128xf32>
    %23 = arith.select %21, %12, %22 : vector<32x128xi1>, vector<32x128xf32>
    %cst_17 = arith.constant dense<0.000000e+00> : vector<32xf32>
    %24 = vector.multi_reduction <add>, %23, %cst_17 [1] : vector<32x128xf32> to vector<32xf32>
    %25 = vector.shape_cast %24 : vector<32xf32> to vector<32x1xf32>
    %26 = arith.mulf %23, %23 : vector<32x128xf32>
    %cst_18 = arith.constant dense<0.000000e+00> : vector<32xf32>
    %27 = vector.multi_reduction <add>, %26, %cst_18 [1] : vector<32x128xf32> to vector<32xf32>
    %28 = vector.shape_cast %27 : vector<32xf32> to vector<32x1xf32>
    %29 = tpu.concatenate %25, %28 in 1 : vector<32x1xf32>, vector<32x1xf32> -> vector<32x2xf32>
    %c0_i32 = arith.constant 0 : i32
    %30 = arith.cmpi eq, %arg1, %c0_i32 : i32
    %31 = arith.extui %30 : i1 to i32
    %c0_i32_19 = arith.constant 0 : i32
    %32 = arith.cmpi ne, %31, %c0_i32_19 : i32
    scf.if %32 {
      %c0_22 = arith.constant 0 : index
      %c0_23 = arith.constant 0 : index
      %c0_24 = arith.constant 0 : index
      %36 = vector.load %arg10[%c0_22, %c0_23, %c0_24] : memref<1x32x2xf32, #tpu.memory_space<vmem>>, vector<1x32x2xf32>
      %37 = vector.shape_cast %36 : vector<1x32x2xf32> to vector<32x2xf32>
      %38 = vector.shape_cast %29 : vector<32x2xf32> to vector<1x32x2xf32>
      tpu.vector_store %arg10[%c0_22, %c0_23, %c0_24], %38 {strides = array<i32>} : memref<1x32x2xf32, #tpu.memory_space<vmem>>, vector<1x32x2xf32>,
    } else {
    }
    %c0_i32_20 = arith.constant 0 : i32
    %33 = arith.cmpi sgt, %arg1, %c0_i32_20 : i32
    %34 = arith.extui %33 : i1 to i32
    %c0_i32_21 = arith.constant 0 : i32
    %35 = arith.cmpi ne, %34, %c0_i32_21 : i32
    scf.if %35 {
      %c0_22 = arith.constant 0 : index
      %c0_23 = arith.constant 0 : index
      %c0_24 = arith.constant 0 : index
      %36 = vector.load %arg10[%c0_22, %c0_23, %c0_24] : memref<1x32x2xf32, #tpu.memory_space<vmem>>, vector<1x32x2xf32>
      %37 = vector.shape_cast %36 : vector<1x32x2xf32> to vector<32x2xf32>
      %38 = arith.addf %37, %29 : vector<32x2xf32>
      %c0_25 = arith.constant 0 : index
      %c0_26 = arith.constant 0 : index
      %c0_27 = arith.constant 0 : index
      %39 = vector.load %arg10[%c0_25, %c0_26, %c0_27] : memref<1x32x2xf32, #tpu.memory_space<vmem>>, vector<1x32x2xf32>
      %40 = vector.shape_cast %39 : vector<1x32x2xf32> to vector<32x2xf32>
      %41 = vector.shape_cast %38 : vector<32x2xf32> to vector<1x32x2xf32>
      tpu.vector_store %arg10[%c0_25, %c0_26, %c0_27], %41 {strides = array<i32>} : memref<1x32x2xf32, #tpu.memory_space<vmem>>, vector<1x32x2xf32>,
    } else {
    }
    return
  }
  func.func @transform_0(%arg0: i32, %arg1: i32) -> (i32, i32, i32) {
    %c0_i32 = arith.constant 0 : i32
    %c0_i32_0 = arith.constant 0 : i32
    %c0_i32_1 = arith.constant 0 : i32
    return %arg0, %c0_i32, %c0_i32_0 : i32, i32, i32
  }
  func.func @transform_1(%arg0: i32, %arg1: i32) -> (i32, i32, i32) {
    %c0_i32 = arith.constant 0 : i32
    %c0_i32_0 = arith.constant 0 : i32
    return %arg0, %c0_i32, %arg1 : i32, i32, i32
  }
  func.func @transform_2(%arg0: i32, %arg1: i32) -> (i32, i32, i32) {
    %c0_i32 = arith.constant 0 : i32
    %c0_i32_0 = arith.constant 0 : i32
    return %arg0, %c0_i32, %arg1 : i32, i32, i32
  }
  func.func @transform_3(%arg0: i32, %arg1: i32) -> (i32, i32) {
    %c0_i32 = arith.constant 0 : i32
    %c0_i32_0 = arith.constant 0 : i32
    %c0_i32_1 = arith.constant 0 : i32
    return %c0_i32, %c0_i32_0 : i32, i32
  }
  func.func @transform_4(%arg0: i32, %arg1: i32) -> (i32, i32) {
    %c0_i32 = arith.constant 0 : i32
    %c0_i32_0 = arith.constant 0 : i32
    %c0_i32_1 = arith.constant 0 : i32
    return %c0_i32, %c0_i32_0 : i32, i32
  }
  func.func @transform_5(%arg0: i32, %arg1: i32) -> (i32, i32) {
    %c0_i32 = arith.constant 0 : i32
    %c0_i32_0 = arith.constant 0 : i32
    %c0_i32_1 = arith.constant 0 : i32
    return %c0_i32, %c0_i32_0 : i32, i32
  }
  func.func @transform_6(%arg0: i32, %arg1: i32) -> (i32, i32) {
    %c0_i32 = arith.constant 0 : i32
    %c0_i32_0 = arith.constant 0 : i32
    %c0_i32_1 = arith.constant 0 : i32
    return %c0_i32, %c0_i32_0 : i32, i32
  }
  func.func @transform_7(%arg0: i32, %arg1: i32) -> (i32, i32, i32) {
    %c0_i32 = arith.constant 0 : i32
    %c0_i32_0 = arith.constant 0 : i32
    return %arg0, %c0_i32, %arg1 : i32, i32, i32
  }
  func.func @transform_8(%arg0: i32, %arg1: i32) -> (i32, i32, i32) {
    %c0_i32 = arith.constant 0 : i32
    %c0_i32_0 = arith.constant 0 : i32
    %c0_i32_1 = arith.constant 0 : i32
    return %arg0, %c0_i32, %c0_i32_0 : i32, i32, i32
  }
}

module attributes {stable_mosaic.version = 11 : i64} {
  func.func @_fwd_vft_kernel(%arg0: i32, %arg1: i32, %arg2: memref<1x128x64xbf16, #tpu.memory_space<vmem>>, %arg3: memref<1x32x128xf32, #tpu.memory_space<vmem>>, %arg4: memref<32x1xf32, #tpu.memory_space<vmem>>, %arg5: memref<32x1xf32, #tpu.memory_space<vmem>>, %arg6: memref<1x32x64xf32, #tpu.memory_space<vmem>>) attributes {dimension_semantics = [#tpu.dimension_semantics<parallel>, #tpu.dimension_semantics<arbitrary>], iteration_bounds = array<i64: 2, 1>, scalar_prefetch = 0 : i64, scratch_operands = 0 : i64, tpu.core_type = #tpu.core_type<tc>, window_params = [{transform_indices = @transform_0, window_bounds = array<i64: 1, 128, 64>}, {transform_indices = @transform_1, window_bounds = array<i64: 1, 32, 128>}, {pipeline_mode = #tpu.pipeline_mode<synchronous>, transform_indices = @transform_2, window_bounds = array<i64: 32, 1>}, {pipeline_mode = #tpu.pipeline_mode<synchronous>, transform_indices = @transform_3, window_bounds = array<i64: 32, 1>}, {transform_indices = @transform_4, window_bounds = array<i64: 1, 32, 64>}]} {
    %c0 = arith.constant 0 : index
    %c0_0 = arith.constant 0 : index
    %c0_1 = arith.constant 0 : index
    %0 = vector.load %arg3[%c0, %c0_0, %c0_1] : memref<1x32x128xf32, #tpu.memory_space<vmem>>, vector<1x32x128xf32>
    %1 = vector.shape_cast %0 : vector<1x32x128xf32> to vector<32x128xf32>
    %c0_2 = arith.constant 0 : index
    %c0_3 = arith.constant 0 : index
    %2 = vector.load %arg4[%c0_2, %c0_3] : memref<32x1xf32, #tpu.memory_space<vmem>>, vector<32x1xf32>
    %3 = vector.broadcast %2 : vector<32x1xf32> to vector<32x128xf32>
    %4 = arith.mulf %1, %3 : vector<32x128xf32>
    %c0_4 = arith.constant 0 : index
    %c0_5 = arith.constant 0 : index
    %5 = vector.load %arg5[%c0_4, %c0_5] : memref<32x1xf32, #tpu.memory_space<vmem>>, vector<32x1xf32>
    %6 = vector.broadcast %5 : vector<32x1xf32> to vector<32x128xf32>
    %7 = arith.addf %4, %6 : vector<32x128xf32>
    %cst = arith.constant 5.000000e-01 : f32
    %8 = vector.broadcast %cst : f32 to vector<32x128xf32>
    %9 = arith.mulf %7, %8 : vector<32x128xf32>
    %cst_6 = arith.constant 0.707106769 : f32
    %10 = vector.broadcast %cst_6 : f32 to vector<32x128xf32>
    %11 = arith.mulf %7, %10 : vector<32x128xf32>
    %12 = math.absf %11 : vector<32x128xf32>
    %cst_7 = arith.constant 0.327591091 : f32
    %13 = vector.broadcast %cst_7 : f32 to vector<32x128xf32>
    %14 = arith.mulf %13, %12 : vector<32x128xf32>
    %cst_8 = arith.constant 1.000000e+00 : f32
    %15 = vector.broadcast %cst_8 : f32 to vector<32x128xf32>
    %16 = arith.addf %15, %14 : vector<32x128xf32>
    %cst_9 = arith.constant 1.000000e+00 : f32
    %17 = vector.broadcast %cst_9 : f32 to vector<32x128xf32>
    %18 = arith.divf %17, %16 : vector<32x128xf32>
    %cst_10 = arith.constant 1.06140542 : f32
    %19 = vector.broadcast %cst_10 : f32 to vector<32x128xf32>
    %20 = arith.mulf %19, %18 : vector<32x128xf32>
    %cst_11 = arith.constant -1.45315206 : f32
    %21 = vector.broadcast %cst_11 : f32 to vector<32x128xf32>
    %22 = arith.addf %20, %21 : vector<32x128xf32>
    %23 = arith.mulf %22, %18 : vector<32x128xf32>
    %cst_12 = arith.constant 1.42141378 : f32
    %24 = vector.broadcast %cst_12 : f32 to vector<32x128xf32>
    %25 = arith.addf %23, %24 : vector<32x128xf32>
    %26 = arith.mulf %25, %18 : vector<32x128xf32>
    %cst_13 = arith.constant -0.284496725 : f32
    %27 = vector.broadcast %cst_13 : f32 to vector<32x128xf32>
    %28 = arith.addf %26, %27 : vector<32x128xf32>
    %29 = arith.mulf %28, %18 : vector<32x128xf32>
    %cst_14 = arith.constant 0.254829586 : f32
    %30 = vector.broadcast %cst_14 : f32 to vector<32x128xf32>
    %31 = arith.addf %29, %30 : vector<32x128xf32>
    %32 = arith.mulf %31, %18 : vector<32x128xf32>
    %cst_15 = arith.constant 0.000000e+00 : f32
    %33 = vector.broadcast %cst_15 : f32 to vector<32x128xf32>
    %34 = arith.subf %33, %12 : vector<32x128xf32>
    %35 = arith.mulf %34, %12 : vector<32x128xf32>
    %36 = math.exp %35 : vector<32x128xf32>
    %37 = arith.mulf %32, %36 : vector<32x128xf32>
    %cst_16 = arith.constant 1.000000e+00 : f32
    %38 = vector.broadcast %cst_16 : f32 to vector<32x128xf32>
    %39 = arith.subf %38, %37 : vector<32x128xf32>
    %cst_17 = arith.constant 0.000000e+00 : f32
    %40 = vector.broadcast %cst_17 : f32 to vector<32x128xf32>
    %41 = arith.cmpf oge, %11, %40 : vector<32x128xf32>
    %cst_18 = arith.constant 0.000000e+00 : f32
    %42 = vector.broadcast %cst_18 : f32 to vector<32x128xf32>
    %43 = arith.subf %42, %39 : vector<32x128xf32>
    %44 = arith.select %41, %39, %43 : vector<32x128xi1>, vector<32x128xf32>
    %cst_19 = arith.constant 1.000000e+00 : f32
    %45 = vector.broadcast %cst_19 : f32 to vector<32x128xf32>
    %46 = arith.addf %45, %44 : vector<32x128xf32>
    %47 = arith.mulf %9, %46 : vector<32x128xf32>
    %48 = arith.truncf %47 : vector<32x128xf32> to vector<32x128xbf16>
    %c0_20 = arith.constant 0 : index
    %c0_21 = arith.constant 0 : index
    %c0_22 = arith.constant 0 : index
    %49 = vector.load %arg2[%c0_20, %c0_21, %c0_22] : memref<1x128x64xbf16, #tpu.memory_space<vmem>>, vector<1x128x64xbf16>
    %50 = vector.shape_cast %49 : vector<1x128x64xbf16> to vector<128x64xbf16>
    %cst_23 = arith.constant dense<0.000000e+00> : vector<32x64xf32>
    %51 = tpu.matmul %48, %50, %cst_23 {dimension_numbers = #tpu.dot_dimension_numbers<[1], [0], [0], [1], [0, 0, 1, 1], [], []>} : vector<32x128xbf16>, vector<128x64xbf16>, vector<32x64xf32> -> vector<32x64xf32>
    %c0_i32 = arith.constant 0 : i32
    %52 = arith.cmpi eq, %arg1, %c0_i32 : i32
    %53 = arith.extui %52 : i1 to i32
    %c0_i32_24 = arith.constant 0 : i32
    %54 = arith.cmpi ne, %53, %c0_i32_24 : i32
    scf.if %54 {
      %c0_27 = arith.constant 0 : index
      %c0_28 = arith.constant 0 : index
      %c0_29 = arith.constant 0 : index
      %58 = vector.load %arg6[%c0_27, %c0_28, %c0_29] : memref<1x32x64xf32, #tpu.memory_space<vmem>>, vector<1x32x64xf32>
      %59 = vector.shape_cast %58 : vector<1x32x64xf32> to vector<32x64xf32>
      %60 = vector.shape_cast %51 : vector<32x64xf32> to vector<1x32x64xf32>
      tpu.vector_store %arg6[%c0_27, %c0_28, %c0_29], %60 {strides = array<i32>} : memref<1x32x64xf32, #tpu.memory_space<vmem>>, vector<1x32x64xf32>,
    } else {
    }
    %c0_i32_25 = arith.constant 0 : i32
    %55 = arith.cmpi sgt, %arg1, %c0_i32_25 : i32
    %56 = arith.extui %55 : i1 to i32
    %c0_i32_26 = arith.constant 0 : i32
    %57 = arith.cmpi ne, %56, %c0_i32_26 : i32
    scf.if %57 {
      %c0_27 = arith.constant 0 : index
      %c0_28 = arith.constant 0 : index
      %c0_29 = arith.constant 0 : index
      %58 = vector.load %arg6[%c0_27, %c0_28, %c0_29] : memref<1x32x64xf32, #tpu.memory_space<vmem>>, vector<1x32x64xf32>
      %59 = vector.shape_cast %58 : vector<1x32x64xf32> to vector<32x64xf32>
      %60 = arith.addf %59, %51 : vector<32x64xf32>
      %c0_30 = arith.constant 0 : index
      %c0_31 = arith.constant 0 : index
      %c0_32 = arith.constant 0 : index
      %61 = vector.load %arg6[%c0_30, %c0_31, %c0_32] : memref<1x32x64xf32, #tpu.memory_space<vmem>>, vector<1x32x64xf32>
      %62 = vector.shape_cast %61 : vector<1x32x64xf32> to vector<32x64xf32>
      %63 = vector.shape_cast %60 : vector<32x64xf32> to vector<1x32x64xf32>
      tpu.vector_store %arg6[%c0_30, %c0_31, %c0_32], %63 {strides = array<i32>} : memref<1x32x64xf32, #tpu.memory_space<vmem>>, vector<1x32x64xf32>,
    } else {
    }
    return
  }
  func.func @transform_0(%arg0: i32, %arg1: i32) -> (i32, i32, i32) {
    %c0_i32 = arith.constant 0 : i32
    %c0_i32_0 = arith.constant 0 : i32
    return %arg0, %arg1, %c0_i32 : i32, i32, i32
  }
  func.func @transform_1(%arg0: i32, %arg1: i32) -> (i32, i32, i32) {
    %c0_i32 = arith.constant 0 : i32
    %c0_i32_0 = arith.constant 0 : i32
    return %arg0, %c0_i32, %arg1 : i32, i32, i32
  }
  func.func @transform_2(%arg0: i32, %arg1: i32) -> (i32, i32) {
    %c0_i32 = arith.constant 0 : i32
    %c0_i32_0 = arith.constant 0 : i32
    %c0_i32_1 = arith.constant 0 : i32
    return %c0_i32, %c0_i32_0 : i32, i32
  }
  func.func @transform_3(%arg0: i32, %arg1: i32) -> (i32, i32) {
    %c0_i32 = arith.constant 0 : i32
    %c0_i32_0 = arith.constant 0 : i32
    %c0_i32_1 = arith.constant 0 : i32
    return %c0_i32, %c0_i32_0 : i32, i32
  }
  func.func @transform_4(%arg0: i32, %arg1: i32) -> (i32, i32, i32) {
    %c0_i32 = arith.constant 0 : i32
    %c0_i32_0 = arith.constant 0 : i32
    %c0_i32_1 = arith.constant 0 : i32
    return %arg0, %c0_i32, %c0_i32_0 : i32, i32, i32
  }
}

module attributes {stable_mosaic.version = 11 : i64} {
  func.func @_inv_stats_kernel(%arg0: i32, %arg1: i32, %arg2: memref<1x32x112xbf16, #tpu.memory_space<vmem>>, %arg3: memref<1x112x128xbf16, #tpu.memory_space<vmem>>, %arg4: memref<1x32x128xf32, #tpu.memory_space<vmem>>, %arg5: memref<32x32xf32, #tpu.memory_space<vmem>>, %arg6: memref<32x1xf32, #tpu.memory_space<vmem>>, %arg7: memref<32x1xf32, #tpu.memory_space<vmem>>, %arg8: memref<32x1xf32, #tpu.memory_space<vmem>>, %arg9: memref<1x32x128xf32, #tpu.memory_space<vmem>>, %arg10: memref<1x32x2xf32, #tpu.memory_space<vmem>>) attributes {dimension_semantics = [#tpu.dimension_semantics<parallel>, #tpu.dimension_semantics<arbitrary>], iteration_bounds = array<i64: 2, 1>, scalar_prefetch = 0 : i64, scratch_operands = 0 : i64, tpu.core_type = #tpu.core_type<tc>, window_params = [{transform_indices = @transform_0, window_bounds = array<i64: 1, 32, 112>}, {transform_indices = @transform_1, window_bounds = array<i64: 1, 112, 128>}, {transform_indices = @transform_2, window_bounds = array<i64: 1, 32, 128>}, {pipeline_mode = #tpu.pipeline_mode<synchronous>, transform_indices = @transform_3, window_bounds = array<i64: 32, 32>}, {pipeline_mode = #tpu.pipeline_mode<synchronous>, transform_indices = @transform_4, window_bounds = array<i64: 32, 1>}, {pipeline_mode = #tpu.pipeline_mode<synchronous>, transform_indices = @transform_5, window_bounds = array<i64: 32, 1>}, {pipeline_mode = #tpu.pipeline_mode<synchronous>, transform_indices = @transform_6, window_bounds = array<i64: 32, 1>}, {transform_indices = @transform_7, window_bounds = array<i64: 1, 32, 128>}, {transform_indices = @transform_8, window_bounds = array<i64: 1, 32, 2>}]} {
    %c0 = arith.constant 0 : index
    %c0_0 = arith.constant 0 : index
    %c0_1 = arith.constant 0 : index
    %0 = vector.load %arg4[%c0, %c0_0, %c0_1] : memref<1x32x128xf32, #tpu.memory_space<vmem>>, vector<1x32x128xf32>
    %1 = vector.shape_cast %0 : vector<1x32x128xf32> to vector<32x128xf32>
    %c0_2 = arith.constant 0 : index
    %c0_3 = arith.constant 0 : index
    %2 = vector.load %arg7[%c0_2, %c0_3] : memref<32x1xf32, #tpu.memory_space<vmem>>, vector<32x1xf32>
    %3 = vector.broadcast %2 : vector<32x1xf32> to vector<32x128xf32>
    %4 = arith.mulf %1, %3 : vector<32x128xf32>
    %c0_4 = arith.constant 0 : index
    %c0_5 = arith.constant 0 : index
    %5 = vector.load %arg8[%c0_4, %c0_5] : memref<32x1xf32, #tpu.memory_space<vmem>>, vector<32x1xf32>
    %6 = vector.broadcast %5 : vector<32x1xf32> to vector<32x128xf32>
    %7 = arith.addf %4, %6 : vector<32x128xf32>
    %cst = arith.constant 5.000000e-01 : f32
    %8 = vector.broadcast %cst : f32 to vector<32x128xf32>
    %9 = arith.mulf %7, %8 : vector<32x128xf32>
    %cst_6 = arith.constant 0.707106769 : f32
    %10 = vector.broadcast %cst_6 : f32 to vector<32x128xf32>
    %11 = arith.mulf %7, %10 : vector<32x128xf32>
    %12 = math.absf %11 : vector<32x128xf32>
    %cst_7 = arith.constant 0.327591091 : f32
    %13 = vector.broadcast %cst_7 : f32 to vector<32x128xf32>
    %14 = arith.mulf %13, %12 : vector<32x128xf32>
    %cst_8 = arith.constant 1.000000e+00 : f32
    %15 = vector.broadcast %cst_8 : f32 to vector<32x128xf32>
    %16 = arith.addf %15, %14 : vector<32x128xf32>
    %cst_9 = arith.constant 1.000000e+00 : f32
    %17 = vector.broadcast %cst_9 : f32 to vector<32x128xf32>
    %18 = arith.divf %17, %16 : vector<32x128xf32>
    %cst_10 = arith.constant 1.06140542 : f32
    %19 = vector.broadcast %cst_10 : f32 to vector<32x128xf32>
    %20 = arith.mulf %19, %18 : vector<32x128xf32>
    %cst_11 = arith.constant -1.45315206 : f32
    %21 = vector.broadcast %cst_11 : f32 to vector<32x128xf32>
    %22 = arith.addf %20, %21 : vector<32x128xf32>
    %23 = arith.mulf %22, %18 : vector<32x128xf32>
    %cst_12 = arith.constant 1.42141378 : f32
    %24 = vector.broadcast %cst_12 : f32 to vector<32x128xf32>
    %25 = arith.addf %23, %24 : vector<32x128xf32>
    %26 = arith.mulf %25, %18 : vector<32x128xf32>
    %cst_13 = arith.constant -0.284496725 : f32
    %27 = vector.broadcast %cst_13 : f32 to vector<32x128xf32>
    %28 = arith.addf %26, %27 : vector<32x128xf32>
    %29 = arith.mulf %28, %18 : vector<32x128xf32>
    %cst_14 = arith.constant 0.254829586 : f32
    %30 = vector.broadcast %cst_14 : f32 to vector<32x128xf32>
    %31 = arith.addf %29, %30 : vector<32x128xf32>
    %32 = arith.mulf %31, %18 : vector<32x128xf32>
    %cst_15 = arith.constant 0.000000e+00 : f32
    %33 = vector.broadcast %cst_15 : f32 to vector<32x128xf32>
    %34 = arith.subf %33, %12 : vector<32x128xf32>
    %35 = arith.mulf %34, %12 : vector<32x128xf32>
    %36 = math.exp %35 : vector<32x128xf32>
    %37 = arith.mulf %32, %36 : vector<32x128xf32>
    %cst_16 = arith.constant 1.000000e+00 : f32
    %38 = vector.broadcast %cst_16 : f32 to vector<32x128xf32>
    %39 = arith.subf %38, %37 : vector<32x128xf32>
    %cst_17 = arith.constant 0.000000e+00 : f32
    %40 = vector.broadcast %cst_17 : f32 to vector<32x128xf32>
    %41 = arith.cmpf oge, %11, %40 : vector<32x128xf32>
    %cst_18 = arith.constant 0.000000e+00 : f32
    %42 = vector.broadcast %cst_18 : f32 to vector<32x128xf32>
    %43 = arith.subf %42, %39 : vector<32x128xf32>
    %44 = arith.select %41, %39, %43 : vector<32x128xi1>, vector<32x128xf32>
    %cst_19 = arith.constant 1.000000e+00 : f32
    %45 = vector.broadcast %cst_19 : f32 to vector<32x128xf32>
    %46 = arith.addf %45, %44 : vector<32x128xf32>
    %47 = arith.mulf %9, %46 : vector<32x128xf32>
    %c0_20 = arith.constant 0 : index
    %c0_21 = arith.constant 0 : index
    %c0_22 = arith.constant 0 : index
    %48 = vector.load %arg2[%c0_20, %c0_21, %c0_22] : memref<1x32x112xbf16, #tpu.memory_space<vmem>>, vector<1x32x112xbf16>
    %49 = vector.shape_cast %48 : vector<1x32x112xbf16> to vector<32x112xbf16>
    %c0_23 = arith.constant 0 : index
    %c0_24 = arith.constant 0 : index
    %c0_25 = arith.constant 0 : index
    %50 = vector.load %arg3[%c0_23, %c0_24, %c0_25] : memref<1x112x128xbf16, #tpu.memory_space<vmem>>, vector<1x112x128xbf16>
    %51 = vector.shape_cast %50 : vector<1x112x128xbf16> to vector<112x128xbf16>
    %cst_26 = arith.constant dense<0.000000e+00> : vector<32x128xf32>
    %52 = tpu.matmul %49, %51, %cst_26 {dimension_numbers = #tpu.dot_dimension_numbers<[1], [0], [0], [1], [0, 0, 1, 1], [], []>} : vector<32x112xbf16>, vector<112x128xbf16>, vector<32x128xf32> -> vector<32x128xf32>
    %c0_27 = arith.constant 0 : index
    %c0_28 = arith.constant 0 : index
    %53 = vector.load %arg5[%c0_27, %c0_28] : memref<32x32xf32, #tpu.memory_space<vmem>>, vector<32x32xf32>
    %cst_29 = arith.constant dense<0.000000e+00> : vector<32x128xf32>
    %54 = tpu.matmul %53, %47, %cst_29 {dimension_numbers = #tpu.dot_dimension_numbers<[1], [0], [0], [1], [0, 0, 1, 1], [], []>} : vector<32x32xf32>, vector<32x128xf32>, vector<32x128xf32> -> vector<32x128xf32>
    %55 = arith.addf %52, %54 : vector<32x128xf32>
    %c0_30 = arith.constant 0 : index
    %c0_31 = arith.constant 0 : index
    %56 = vector.load %arg6[%c0_30, %c0_31] : memref<32x1xf32, #tpu.memory_space<vmem>>, vector<32x1xf32>
    %57 = vector.broadcast %56 : vector<32x1xf32> to vector<32x128xf32>
    %58 = arith.addf %55, %57 : vector<32x128xf32>
    %c0_32 = arith.constant 0 : index
    %c0_33 = arith.constant 0 : index
    %c0_34 = arith.constant 0 : index
    %59 = vector.load %arg9[%c0_32, %c0_33, %c0_34] : memref<1x32x128xf32, #tpu.memory_space<vmem>>, vector<1x32x128xf32>
    %60 = vector.shape_cast %59 : vector<1x32x128xf32> to vector<32x128xf32>
    %61 = vector.shape_cast %58 : vector<32x128xf32> to vector<1x32x128xf32>
    tpu.vector_store %arg9[%c0_32, %c0_33, %c0_34], %61 {strides = array<i32>} : memref<1x32x128xf32, #tpu.memory_space<vmem>>, vector<1x32x128xf32>,
    %c128_i32 = arith.constant 128 : i32
    %62 = arith.muli %arg1, %c128_i32 : i32
    %63 = tpu.iota {dimensions = array<i32: 1>} : vector<32x128xi32>
    %64 = vector.broadcast %62 : i32 to vector<32x128xi32>
    %65 = arith.addi %64, %63 : vector<32x128xi32>
    %c64_i32 = arith.constant 64 : i32
    %66 = vector.broadcast %c64_i32 : i32 to vector<32x128xi32>
    %67 = arith.cmpi slt, %65, %66 : vector<32x128xi32>
    %cst_35 = arith.constant 0.000000e+00 : f32
    %68 = vector.broadcast %cst_35 : f32 to vector<32x128xf32>
    %69 = arith.select %67, %58, %68 : vector<32x128xi1>, vector<32x128xf32>
    %cst_36 = arith.constant dense<0.000000e+00> : vector<32xf32>
    %70 = vector.multi_reduction <add>, %69, %cst_36 [1] : vector<32x128xf32> to vector<32xf32>
    %71 = vector.shape_cast %70 : vector<32xf32> to vector<32x1xf32>
    %72 = arith.mulf %69, %69 : vector<32x128xf32>
    %cst_37 = arith.constant dense<0.000000e+00> : vector<32xf32>
    %73 = vector.multi_reduction <add>, %72, %cst_37 [1] : vector<32x128xf32> to vector<32xf32>
    %74 = vector.shape_cast %73 : vector<32xf32> to vector<32x1xf32>
    %75 = tpu.concatenate %71, %74 in 1 : vector<32x1xf32>, vector<32x1xf32> -> vector<32x2xf32>
    %c0_i32 = arith.constant 0 : i32
    %76 = arith.cmpi eq, %arg1, %c0_i32 : i32
    %77 = arith.extui %76 : i1 to i32
    %c0_i32_38 = arith.constant 0 : i32
    %78 = arith.cmpi ne, %77, %c0_i32_38 : i32
    scf.if %78 {
      %c0_41 = arith.constant 0 : index
      %c0_42 = arith.constant 0 : index
      %c0_43 = arith.constant 0 : index
      %82 = vector.load %arg10[%c0_41, %c0_42, %c0_43] : memref<1x32x2xf32, #tpu.memory_space<vmem>>, vector<1x32x2xf32>
      %83 = vector.shape_cast %82 : vector<1x32x2xf32> to vector<32x2xf32>
      %84 = vector.shape_cast %75 : vector<32x2xf32> to vector<1x32x2xf32>
      tpu.vector_store %arg10[%c0_41, %c0_42, %c0_43], %84 {strides = array<i32>} : memref<1x32x2xf32, #tpu.memory_space<vmem>>, vector<1x32x2xf32>,
    } else {
    }
    %c0_i32_39 = arith.constant 0 : i32
    %79 = arith.cmpi sgt, %arg1, %c0_i32_39 : i32
    %80 = arith.extui %79 : i1 to i32
    %c0_i32_40 = arith.constant 0 : i32
    %81 = arith.cmpi ne, %80, %c0_i32_40 : i32
    scf.if %81 {
      %c0_41 = arith.constant 0 : index
      %c0_42 = arith.constant 0 : index
      %c0_43 = arith.constant 0 : index
      %82 = vector.load %arg10[%c0_41, %c0_42, %c0_43] : memref<1x32x2xf32, #tpu.memory_space<vmem>>, vector<1x32x2xf32>
      %83 = vector.shape_cast %82 : vector<1x32x2xf32> to vector<32x2xf32>
      %84 = arith.addf %83, %75 : vector<32x2xf32>
      %c0_44 = arith.constant 0 : index
      %c0_45 = arith.constant 0 : index
      %c0_46 = arith.constant 0 : index
      %85 = vector.load %arg10[%c0_44, %c0_45, %c0_46] : memref<1x32x2xf32, #tpu.memory_space<vmem>>, vector<1x32x2xf32>
      %86 = vector.shape_cast %85 : vector<1x32x2xf32> to vector<32x2xf32>
      %87 = vector.shape_cast %84 : vector<32x2xf32> to vector<1x32x2xf32>
      tpu.vector_store %arg10[%c0_44, %c0_45, %c0_46], %87 {strides = array<i32>} : memref<1x32x2xf32, #tpu.memory_space<vmem>>, vector<1x32x2xf32>,
    } else {
    }
    return
  }
  func.func @transform_0(%arg0: i32, %arg1: i32) -> (i32, i32, i32) {
    %c0_i32 = arith.constant 0 : i32
    %c0_i32_0 = arith.constant 0 : i32
    %c0_i32_1 = arith.constant 0 : i32
    return %arg0, %c0_i32, %c0_i32_0 : i32, i32, i32
  }
  func.func @transform_1(%arg0: i32, %arg1: i32) -> (i32, i32, i32) {
    %c0_i32 = arith.constant 0 : i32
    %c0_i32_0 = arith.constant 0 : i32
    return %arg0, %c0_i32, %arg1 : i32, i32, i32
  }
  func.func @transform_2(%arg0: i32, %arg1: i32) -> (i32, i32, i32) {
    %c0_i32 = arith.constant 0 : i32
    %c0_i32_0 = arith.constant 0 : i32
    return %arg0, %c0_i32, %arg1 : i32, i32, i32
  }
  func.func @transform_3(%arg0: i32, %arg1: i32) -> (i32, i32) {
    %c0_i32 = arith.constant 0 : i32
    %c0_i32_0 = arith.constant 0 : i32
    %c0_i32_1 = arith.constant 0 : i32
    return %c0_i32, %c0_i32_0 : i32, i32
  }
  func.func @transform_4(%arg0: i32, %arg1: i32) -> (i32, i32) {
    %c0_i32 = arith.constant 0 : i32
    %c0_i32_0 = arith.constant 0 : i32
    %c0_i32_1 = arith.constant 0 : i32
    return %c0_i32, %c0_i32_0 : i32, i32
  }
  func.func @transform_5(%arg0: i32, %arg1: i32) -> (i32, i32) {
    %c0_i32 = arith.constant 0 : i32
    %c0_i32_0 = arith.constant 0 : i32
    %c0_i32_1 = arith.constant 0 : i32
    return %c0_i32, %c0_i32_0 : i32, i32
  }
  func.func @transform_6(%arg0: i32, %arg1: i32) -> (i32, i32) {
    %c0_i32 = arith.constant 0 : i32
    %c0_i32_0 = arith.constant 0 : i32
    %c0_i32_1 = arith.constant 0 : i32
    return %c0_i32, %c0_i32_0 : i32, i32
  }
  func.func @transform_7(%arg0: i32, %arg1: i32) -> (i32, i32, i32) {
    %c0_i32 = arith.constant 0 : i32
    %c0_i32_0 = arith.constant 0 : i32
    return %arg0, %c0_i32, %arg1 : i32, i32, i32
  }
  func.func @transform_8(%arg0: i32, %arg1: i32) -> (i32, i32, i32) {
    %c0_i32 = arith.constant 0 : i32
    %c0_i32_0 = arith.constant 0 : i32
    %c0_i32_1 = arith.constant 0 : i32
    return %arg0, %c0_i32, %c0_i32_0 : i32, i32, i32
  }
}

module attributes {stable_mosaic.version = 11 : i64} {
  func.func @_head_kernel(%arg0: i32, %arg1: i32, %arg2: memref<1x32x128xf32, #tpu.memory_space<vmem>>, %arg3: memref<1x3x128xf32, #tpu.memory_space<vmem>>, %arg4: memref<128x32xf32, #tpu.memory_space<vmem>>, %arg5: memref<128x3xf32, #tpu.memory_space<vmem>>, %arg6: memref<128x1xf32, #tpu.memory_space<vmem>>, %arg7: memref<128x1xf32, #tpu.memory_space<vmem>>, %arg8: memref<1x1xf32, #tpu.memory_space<vmem>>, %arg9: memref<32x1xf32, #tpu.memory_space<vmem>>, %arg10: memref<32x1xf32, #tpu.memory_space<vmem>>, %arg11: memref<1x1x128xf32, #tpu.memory_space<vmem>>) attributes {dimension_semantics = [#tpu.dimension_semantics<parallel>, #tpu.dimension_semantics<parallel>], iteration_bounds = array<i64: 2, 1>, scalar_prefetch = 0 : i64, scratch_operands = 0 : i64, tpu.core_type = #tpu.core_type<tc>, window_params = [{transform_indices = @transform_0, window_bounds = array<i64: 1, 32, 128>}, {transform_indices = @transform_1, window_bounds = array<i64: 1, 3, 128>}, {pipeline_mode = #tpu.pipeline_mode<synchronous>, transform_indices = @transform_2, window_bounds = array<i64: 128, 32>}, {pipeline_mode = #tpu.pipeline_mode<synchronous>, transform_indices = @transform_3, window_bounds = array<i64: 128, 3>}, {pipeline_mode = #tpu.pipeline_mode<synchronous>, transform_indices = @transform_4, window_bounds = array<i64: 128, 1>}, {pipeline_mode = #tpu.pipeline_mode<synchronous>, transform_indices = @transform_5, window_bounds = array<i64: 128, 1>}, {pipeline_mode = #tpu.pipeline_mode<synchronous>, transform_indices = @transform_6, window_bounds = array<i64: 1, 1>}, {pipeline_mode = #tpu.pipeline_mode<synchronous>, transform_indices = @transform_7, window_bounds = array<i64: 32, 1>}, {pipeline_mode = #tpu.pipeline_mode<synchronous>, transform_indices = @transform_8, window_bounds = array<i64: 32, 1>}, {transform_indices = @transform_9, window_bounds = array<i64: 1, 1, 128>}]} {
    %c0 = arith.constant 0 : index
    %c0_0 = arith.constant 0 : index
    %c0_1 = arith.constant 0 : index
    %0 = vector.load %arg2[%c0, %c0_0, %c0_1] : memref<1x32x128xf32, #tpu.memory_space<vmem>>, vector<1x32x128xf32>
    %1 = vector.shape_cast %0 : vector<1x32x128xf32> to vector<32x128xf32>
    %c0_2 = arith.constant 0 : index
    %c0_3 = arith.constant 0 : index
    %2 = vector.load %arg9[%c0_2, %c0_3] : memref<32x1xf32, #tpu.memory_space<vmem>>, vector<32x1xf32>
    %3 = vector.broadcast %2 : vector<32x1xf32> to vector<32x128xf32>
    %4 = arith.mulf %1, %3 : vector<32x128xf32>
    %c0_4 = arith.constant 0 : index
    %c0_5 = arith.constant 0 : index
    %5 = vector.load %arg10[%c0_4, %c0_5] : memref<32x1xf32, #tpu.memory_space<vmem>>, vector<32x1xf32>
    %6 = vector.broadcast %5 : vector<32x1xf32> to vector<32x128xf32>
    %7 = arith.addf %4, %6 : vector<32x128xf32>
    %cst = arith.constant 5.000000e-01 : f32
    %8 = vector.broadcast %cst : f32 to vector<32x128xf32>
    %9 = arith.mulf %7, %8 : vector<32x128xf32>
    %cst_6 = arith.constant 0.707106769 : f32
    %10 = vector.broadcast %cst_6 : f32 to vector<32x128xf32>
    %11 = arith.mulf %7, %10 : vector<32x128xf32>
    %12 = math.absf %11 : vector<32x128xf32>
    %cst_7 = arith.constant 0.327591091 : f32
    %13 = vector.broadcast %cst_7 : f32 to vector<32x128xf32>
    %14 = arith.mulf %13, %12 : vector<32x128xf32>
    %cst_8 = arith.constant 1.000000e+00 : f32
    %15 = vector.broadcast %cst_8 : f32 to vector<32x128xf32>
    %16 = arith.addf %15, %14 : vector<32x128xf32>
    %cst_9 = arith.constant 1.000000e+00 : f32
    %17 = vector.broadcast %cst_9 : f32 to vector<32x128xf32>
    %18 = arith.divf %17, %16 : vector<32x128xf32>
    %cst_10 = arith.constant 1.06140542 : f32
    %19 = vector.broadcast %cst_10 : f32 to vector<32x128xf32>
    %20 = arith.mulf %19, %18 : vector<32x128xf32>
    %cst_11 = arith.constant -1.45315206 : f32
    %21 = vector.broadcast %cst_11 : f32 to vector<32x128xf32>
    %22 = arith.addf %20, %21 : vector<32x128xf32>
    %23 = arith.mulf %22, %18 : vector<32x128xf32>
    %cst_12 = arith.constant 1.42141378 : f32
    %24 = vector.broadcast %cst_12 : f32 to vector<32x128xf32>
    %25 = arith.addf %23, %24 : vector<32x128xf32>
    %26 = arith.mulf %25, %18 : vector<32x128xf32>
    %cst_13 = arith.constant -0.284496725 : f32
    %27 = vector.broadcast %cst_13 : f32 to vector<32x128xf32>
    %28 = arith.addf %26, %27 : vector<32x128xf32>
    %29 = arith.mulf %28, %18 : vector<32x128xf32>
    %cst_14 = arith.constant 0.254829586 : f32
    %30 = vector.broadcast %cst_14 : f32 to vector<32x128xf32>
    %31 = arith.addf %29, %30 : vector<32x128xf32>
    %32 = arith.mulf %31, %18 : vector<32x128xf32>
    %cst_15 = arith.constant 0.000000e+00 : f32
    %33 = vector.broadcast %cst_15 : f32 to vector<32x128xf32>
    %34 = arith.subf %33, %12 : vector<32x128xf32>
    %35 = arith.mulf %34, %12 : vector<32x128xf32>
    %36 = math.exp %35 : vector<32x128xf32>
    %37 = arith.mulf %32, %36 : vector<32x128xf32>
    %cst_16 = arith.constant 1.000000e+00 : f32
    %38 = vector.broadcast %cst_16 : f32 to vector<32x128xf32>
    %39 = arith.subf %38, %37 : vector<32x128xf32>
    %cst_17 = arith.constant 0.000000e+00 : f32
    %40 = vector.broadcast %cst_17 : f32 to vector<32x128xf32>
    %41 = arith.cmpf oge, %11, %40 : vector<32x128xf32>
    %cst_18 = arith.constant 0.000000e+00 : f32
    %42 = vector.broadcast %cst_18 : f32 to vector<32x128xf32>
    %43 = arith.subf %42, %39 : vector<32x128xf32>
    %44 = arith.select %41, %39, %43 : vector<32x128xi1>, vector<32x128xf32>
    %cst_19 = arith.constant 1.000000e+00 : f32
    %45 = vector.broadcast %cst_19 : f32 to vector<32x128xf32>
    %46 = arith.addf %45, %44 : vector<32x128xf32>
    %47 = arith.mulf %9, %46 : vector<32x128xf32>
    %c0_20 = arith.constant 0 : index
    %c0_21 = arith.constant 0 : index
    %c0_22 = arith.constant 0 : index
    %48 = vector.load %arg3[%c0_20, %c0_21, %c0_22] : memref<1x3x128xf32, #tpu.memory_space<vmem>>, vector<1x3x128xf32>
    %49 = vector.shape_cast %48 : vector<1x3x128xf32> to vector<3x128xf32>
    %c0_23 = arith.constant 0 : index
    %c0_24 = arith.constant 0 : index
    %50 = vector.load %arg5[%c0_23, %c0_24] : memref<128x3xf32, #tpu.memory_space<vmem>>, vector<128x3xf32>
    %c0_25 = arith.constant 0 : index
    %c0_26 = arith.constant 0 : index
    %51 = vector.load %arg4[%c0_25, %c0_26] : memref<128x32xf32, #tpu.memory_space<vmem>>, vector<128x32xf32>
    %cst_27 = arith.constant dense<0.000000e+00> : vector<128x128xf32>
    %52 = tpu.matmul %51, %47, %cst_27 {dimension_numbers = #tpu.dot_dimension_numbers<[1], [0], [0], [1], [0, 0, 1, 1], [], []>} : vector<128x32xf32>, vector<32x128xf32>, vector<128x128xf32> -> vector<128x128xf32>
    %53 = vector.extract_strided_slice %50 {offsets = [0, 0], sizes = [128, 1], strides = [1, 1]} : vector<128x3xf32> to vector<128x1xf32>
    %54 = vector.extract_strided_slice %49 {offsets = [0, 0], sizes = [1, 128], strides = [1, 1]} : vector<3x128xf32> to vector<1x128xf32>
    %55 = vector.broadcast %53 : vector<128x1xf32> to vector<128x128xf32>
    %56 = vector.broadcast %54 : vector<1x128xf32> to vector<128x128xf32>
    %57 = arith.mulf %55, %56 : vector<128x128xf32>
    %58 = arith.addf %52, %57 : vector<128x128xf32>
    %59 = vector.extract_strided_slice %50 {offsets = [0, 1], sizes = [128, 1], strides = [1, 1]} : vector<128x3xf32> to vector<128x1xf32>
    %60 = vector.extract_strided_slice %49 {offsets = [1, 0], sizes = [1, 128], strides = [1, 1]} : vector<3x128xf32> to vector<1x128xf32>
    %61 = vector.broadcast %59 : vector<128x1xf32> to vector<128x128xf32>
    %62 = vector.broadcast %60 : vector<1x128xf32> to vector<128x128xf32>
    %63 = arith.mulf %61, %62 : vector<128x128xf32>
    %64 = arith.addf %58, %63 : vector<128x128xf32>
    %65 = vector.extract_strided_slice %50 {offsets = [0, 2], sizes = [128, 1], strides = [1, 1]} : vector<128x3xf32> to vector<128x1xf32>
    %66 = vector.extract_strided_slice %49 {offsets = [2, 0], sizes = [1, 128], strides = [1, 1]} : vector<3x128xf32> to vector<1x128xf32>
    %67 = vector.broadcast %65 : vector<128x1xf32> to vector<128x128xf32>
    %68 = vector.broadcast %66 : vector<1x128xf32> to vector<128x128xf32>
    %69 = arith.mulf %67, %68 : vector<128x128xf32>
    %70 = arith.addf %64, %69 : vector<128x128xf32>
    %c0_28 = arith.constant 0 : index
    %c0_29 = arith.constant 0 : index
    %71 = vector.load %arg6[%c0_28, %c0_29] : memref<128x1xf32, #tpu.memory_space<vmem>>, vector<128x1xf32>
    %72 = vector.broadcast %71 : vector<128x1xf32> to vector<128x128xf32>
    %73 = arith.addf %70, %72 : vector<128x128xf32>
    %cst_30 = arith.constant 0.000000e+00 : f32
    %74 = vector.broadcast %cst_30 : f32 to vector<128x128xf32>
    %75 = arith.maximumf %73, %74 : vector<128x128xf32>
    %c0_31 = arith.constant 0 : index
    %c0_32 = arith.constant 0 : index
    %76 = vector.load %arg7[%c0_31, %c0_32] : memref<128x1xf32, #tpu.memory_space<vmem>>, vector<128x1xf32>
    %77 = vector.broadcast %76 : vector<128x1xf32> to vector<128x128xf32>
    %78 = arith.mulf %75, %77 : vector<128x128xf32>
    %cst_33 = arith.constant dense<0.000000e+00> : vector<128xf32>
    %79 = vector.multi_reduction <add>, %78, %cst_33 [0] : vector<128x128xf32> to vector<128xf32>
    %80 = vector.shape_cast %79 : vector<128xf32> to vector<1x128xf32>
    %c0_34 = arith.constant 0 : index
    %c0_35 = arith.constant 0 : index
    %81 = vector.load %arg8[%c0_34, %c0_35] : memref<1x1xf32, #tpu.memory_space<vmem>>, vector<1x1xf32>
    %82 = vector.broadcast %81 : vector<1x1xf32> to vector<1x128xf32>
    %83 = arith.addf %80, %82 : vector<1x128xf32>
    %c0_36 = arith.constant 0 : index
    %c0_37 = arith.constant 0 : index
    %c0_38 = arith.constant 0 : index
    %84 = vector.load %arg11[%c0_36, %c0_37, %c0_38] : memref<1x1x128xf32, #tpu.memory_space<vmem>>, vector<1x1x128xf32>
    %85 = vector.shape_cast %84 : vector<1x1x128xf32> to vector<1x128xf32>
    %86 = vector.shape_cast %83 : vector<1x128xf32> to vector<1x1x128xf32>
    tpu.vector_store %arg11[%c0_36, %c0_37, %c0_38], %86 {strides = array<i32>} : memref<1x1x128xf32, #tpu.memory_space<vmem>>, vector<1x1x128xf32>,
    return
  }
  func.func @transform_0(%arg0: i32, %arg1: i32) -> (i32, i32, i32) {
    %c0_i32 = arith.constant 0 : i32
    %c0_i32_0 = arith.constant 0 : i32
    return %arg0, %c0_i32, %arg1 : i32, i32, i32
  }
  func.func @transform_1(%arg0: i32, %arg1: i32) -> (i32, i32, i32) {
    %c0_i32 = arith.constant 0 : i32
    %c0_i32_0 = arith.constant 0 : i32
    return %arg0, %c0_i32, %arg1 : i32, i32, i32
  }
  func.func @transform_2(%arg0: i32, %arg1: i32) -> (i32, i32) {
    %c0_i32 = arith.constant 0 : i32
    %c0_i32_0 = arith.constant 0 : i32
    %c0_i32_1 = arith.constant 0 : i32
    return %c0_i32, %c0_i32_0 : i32, i32
  }
  func.func @transform_3(%arg0: i32, %arg1: i32) -> (i32, i32) {
    %c0_i32 = arith.constant 0 : i32
    %c0_i32_0 = arith.constant 0 : i32
    %c0_i32_1 = arith.constant 0 : i32
    return %c0_i32, %c0_i32_0 : i32, i32
  }
  func.func @transform_4(%arg0: i32, %arg1: i32) -> (i32, i32) {
    %c0_i32 = arith.constant 0 : i32
    %c0_i32_0 = arith.constant 0 : i32
    %c0_i32_1 = arith.constant 0 : i32
    return %c0_i32, %c0_i32_0 : i32, i32
  }
  func.func @transform_5(%arg0: i32, %arg1: i32) -> (i32, i32) {
    %c0_i32 = arith.constant 0 : i32
    %c0_i32_0 = arith.constant 0 : i32
    %c0_i32_1 = arith.constant 0 : i32
    return %c0_i32, %c0_i32_0 : i32, i32
  }
  func.func @transform_6(%arg0: i32, %arg1: i32) -> (i32, i32) {
    %c0_i32 = arith.constant 0 : i32
    %c0_i32_0 = arith.constant 0 : i32
    %c0_i32_1 = arith.constant 0 : i32
    return %c0_i32, %c0_i32_0 : i32, i32
  }
  func.func @transform_7(%arg0: i32, %arg1: i32) -> (i32, i32) {
    %c0_i32 = arith.constant 0 : i32
    %c0_i32_0 = arith.constant 0 : i32
    %c0_i32_1 = arith.constant 0 : i32
    return %c0_i32, %c0_i32_0 : i32, i32
  }
  func.func @transform_8(%arg0: i32, %arg1: i32) -> (i32, i32) {
    %c0_i32 = arith.constant 0 : i32
    %c0_i32_0 = arith.constant 0 : i32
    %c0_i32_1 = arith.constant 0 : i32
    return %c0_i32, %c0_i32_0 : i32, i32
  }
  func.func @transform_9(%arg0: i32, %arg1: i32) -> (i32, i32, i32) {
    %c0_i32 = arith.constant 0 : i32
    %c0_i32_0 = arith.constant 0 : i32
    return %arg0, %c0_i32, %arg1 : i32, i32, i32
  }
}

</mosaic_0001>

<bundles_post_ra>
// kernel: fno_dse_forward.8
= control target key start
LH: loop header
LB: loop body
LE: loop exit
PB: predicated region body
PF: predicated region fallthrough
CT: control target
= control target key end

     0   :  { %s492_s12 = smov 0   ;;  %s494_s13 = smov 0   ;;  %s557_s0 = inlined_call_operand.vmem [shape: f32[2,3,128], index: 0, kind: input, shape index: {}]   ;;  %s558_s1 = inlined_call_operand.vmem [shape: f32[32,3], index: 1, kind: input, shape index: {}]   ;;  %s559_s2 = inlined_call_operand.vmem [shape: f32[32,1], index: 2, kind: input, shape index: {}]   ;;  %s560_s3 = inlined_call_operand.vmem [shape: f32[2,32,128], index: 3, kind: output, shape index: {}]  }
   0x1   :  { %s496_s14 = smov 0  }
   0x2 LB: > { %s25_s15 = sadd.s32 1, %s463_s13  ;;  %p404_p0 = scmp.ge.s32.totalorder %s467_s14, 1  ;;  %s467_s14 = sphi %s496_s14, %s13_s14   ;;  %s463_s13 = sphi %s494_s13, %s562_s13   ;;  %s459_s12 = sphi %s492_s12, %s561_s12  }
   0x3   : > { %p27_p1 = scmp.ge.s32.totalorder %s25_s15, 2  ;;  %p155_p2 = scmp.lt.s32.totalorder %s467_s14, 3 }
   0x5   : > { %s564_s15 = smov (%p27_p1, %s25_s15), 0  ;;  %p156_p3 = pnand %p404_p0, %p155_p2 }
   0x6   : > { %v202_v0 = vld [vmem:[%s558_s1 + $0x10] sm:$0xff] (!%p156_p3)  ;;  %v200_v1 = vld [vmem:[%s558_s1] sm:$0xff] (!%p156_p3)  ;;  %v469_v2 = vmov (!%p156_p3), 1   ;;  %v470_v3 = vmov (!%p156_p3), 0   ;;  %v203_v4 = vld [vmem:[%s558_s1 + $0x18] sm:$0xff] (!%p156_p3)  ;;  %v471_v6 = vmov (!%p156_p3), 2   ;;  %v224_v13 = vlaneseq (!%p156_p3) }
   0x7   : > { %159 = sbr.rel (%p156_p3) target bundleno = 174 (0xae), region = 32  ;;  %439 = vset.pattern.permute.xlu0 (!%p156_p3), %v469_v2  ;;  %438 = vset.pattern.permute.xlu1 (!%p156_p3), %v470_v3  ;;  %v201_v5 = vld [vmem:[%s558_s1 + $0x8] sm:$0xff] (!%p156_p3)  ;;  %v288_v7 = vld [vmem:[%s559_s2] sm:$0xff] (!%p156_p3)  ;;  %v291_v8 = vld [vmem:[%s559_s2 + $0x18] sm:$0xff] (!%p156_p3)  ;;  %p184_p4 = scmp.lt.s32.totalorder (!%p156_p3), %s459_s12, 1 }
   0x8   : > { %216 = vperm.xlu1 (!%p156_p3), %438, %v202_v0   ;;  %233 = vperm.xlu0 (!%p156_p3), %439, %v200_v1   ;;  %v289_v9 = vld [vmem:[%s559_s2 + $0x8] sm:$0xff] (!%p156_p3)  ;;  %v290_v10 = vld [vmem:[%s559_s2 + $0x10] sm:$0xff] (!%p156_p3)  ;;  %v225_v15 = vshrl.u32 (!%p156_p3), %v224_v13, 7 }
   0xa   : > { %v226_v17 = vsub.s32 (!%p156_p3), 0, %v225_v15  ;;  %v250_v21 = vsub.s32 (!%p156_p3), 1, %v225_v15  ;;  %v278_v22 = vsub.s32 (!%p156_p3), 2, %v225_v15 }
   0xc   : > { %221 = vperm.xlu1 (!%p156_p3), %438, %v203_v4   ;;  %245 = vperm.xlu0 (!%p156_p3), %439, %v203_v4  }
   0xe   : > { %s566_s12 = smov (!%p184_p4, %s459_s12), 1 }
   0xf   : > { %s405_s5 = sshll.u32 %s566_s12, 2  ;;  %s410_s9 = sshll.u32 %s566_s12, 5 }
  0x10   : > { %440 = vset.pattern.permute.xlu1 %v469_v2  ;;  %442 = vset.pattern.permute.xlu0 %v471_v6  ;;  %s190_s8 = scalar_lea.vmem %s557_s0, %s405_s5  ;;  %s198_s16 = scalar_lea.vmem %s560_s3, %s410_s9 }
  0x11   : > { %237 = vperm.xlu1 %440, %v201_v5   ;;  %265 = vperm.xlu0 %442, %v201_v5   ;;  %v199_v20 = vld [vmem:[%s190_s8] sm:$0x7] }
  0x12   : > { %v227_v23 = vrot.slane %v199_v20, %v226_v17  ;;  %v251_v26 = vrot.slane %v199_v20, %v250_v21  ;;  %v279_v27 = vrot.slane %v199_v20, %v278_v22 }
  0x15   : > { %241 = vperm.xlu1 %440, %v202_v0   ;;  %443 = vset.pattern.permute.xlu0 %v470_v3 }
  0x16   : > { %206 = vperm.xlu0 %443, %v200_v1  }
  0x19   : > { %441 = vset.pattern.permute.xlu1 %v471_v6 }
  0x1a   : > { %261 = vperm.xlu1 %441, %v200_v1   ;;  %211 = vperm.xlu0 %443, %v201_v5  }
  0x1e   : > { %269 = vperm.xlu1 %441, %v202_v0   ;;  %294 = vperm.xlu0 %443, %v288_v7  }
  0x22   : > { %273 = vperm.xlu1 %441, %v203_v4   ;;  %309 = vperm.xlu0 %443, %v291_v8  }
  0x26   : > { %444 = vset.pattern.permute.xlu1 %v470_v3 }
  0x27   : > { %299 = vperm.xlu1 %444, %v289_v9  }
  0x2b   : > { %304 = vperm.xlu1 %444, %v290_v10  }
  0x87   : > { %v217_v11 = vpop.permute.xlu1 %216  ;;  %v234_v12 = vpop.permute.xlu0 %233 }
  0x88   : > { %v252_v29 = vmul.f32 %v251_v26, %v234_v12  ;;  %v230_v49 = vmul.f32 %v227_v23, %v217_v11 }
  0x8b   : > { %v222_v14 = vpop.permute.xlu1 %221  ;;  %v246_v16 = vpop.permute.xlu0 %245 }
  0x8c   : > { %v231_v38 = vmul.f32 %v227_v23, %v222_v14  ;;  %v255_v39 = vmul.f32 %v251_v26, %v246_v16 }
  0x8e   : > { %v259_v44 = vadd.f32 %v255_v39, %v231_v38 }
  0x90   : > { %v238_v18 = vpop.permute.xlu1 %237  ;;  %v266_v19 = vpop.permute.xlu0 %265 }
  0x91   : > { %v253_v41 = vmul.f32 %v251_v26, %v238_v18  ;;  %v281_v46 = vmul.f32 %v279_v27, %v266_v19 }
  0x94   : > { %v242_v24 = vpop.permute.xlu1 %241 }
  0x95   : > { %v207_v25 = vpop.permute.xlu0 %206  ;;  %v254_v47 = vmul.f32 %v251_v26, %v242_v24 }
  0x96   : > { %v228_v28 = vmul.f32 %v227_v23, %v207_v25 }
  0x97   : > { %v258_v55 = vadd.f32 %v254_v47, %v230_v49 }
  0x98   : > { %v256_v32 = vadd.f32 %v252_v29, %v228_v28 }
  0x99   : > { %v262_v30 = vpop.permute.xlu1 %261  ;;  %v212_v31 = vpop.permute.xlu0 %211 }
  0x9a   : > { %v280_v33 = vmul.f32 %v279_v27, %v262_v30  ;;  %v229_v35 = vmul.f32 %v227_v23, %v212_v31 }
  0x9c   : > { %v284_v34 = vadd.f32 %v280_v33, %v256_v32  ;;  %v257_v42 = vadd.f32 %v253_v41, %v229_v35 }
  0x9d   : > { %v270_v36 = vpop.permute.xlu1 %269  ;;  %v295_v37 = vpop.permute.xlu0 %294 }
  0x9e   : > { %v312_v40 = vadd.f32 %v295_v37, %v284_v34  ;;  %v282_v50 = vmul.f32 %v279_v27, %v270_v36  ;;  %v285_v52 = vadd.f32 %v281_v46, %v257_v42 }
  0xa0   : > { %316 = vst [vmem:[%s198_s16] sm:$0xff] %v312_v40  ;;  %v286_v57 = vadd.f32 %v282_v50, %v258_v55 }
  0xa1   : > { %v274_v43 = vpop.permute.xlu1 %273  ;;  %v310_v51 = vpop.permute.xlu0 %309 }
  0xa2   : > { %v283_v45 = vmul.f32 %v279_v27, %v274_v43 }
  0xa4   : > { %v287_v48 = vadd.f32 %v283_v45, %v259_v44 }
  0xa6   : > { %v315_v53 = vadd.f32 %v310_v51, %v287_v48  ;;  %v300_v54 = vpop.permute.xlu1 %299 }
  0xa7   : > { %v313_v56 = vadd.f32 %v300_v54, %v285_v52 }
  0xa8   : > { %319 = vst [vmem:[%s198_s16 + $0x18] sm:$0xff] %v315_v53 }
  0xa9   : > { %317 = vst [vmem:[%s198_s16 + $0x8] sm:$0xff] %v313_v56 }
  0xaa   : > { %v305_v58 = vpop.permute.xlu1 %304 }
  0xab   : > { %v314_v59 = vadd.f32 %v305_v58, %v286_v57 }
  0xad   : > { %318 = vst [vmem:[%s198_s16 + $0x10] sm:$0xff] %v314_v59 }
  0xae PF: > { %s13_s14 = sadd.s32 1, %s467_s14   ;;  %s561_s12 = smov %s463_s13 }
  0xaf   : > { %p10_p5 = scmp.ge.s32.totalorder %s13_s14, 4   ;;  %s562_s13 = smov %s564_s15 }
  0xb1   :  { %12 = sbr.rel (!%p10_p5) target bundleno = 2 (0x2), region = 62 }

// kernel: fno_dse_forward.9
= control target key start
LH: loop header
LB: loop body
LE: loop exit
PB: predicated region body
PF: predicated region fallthrough
CT: control target
= control target key end

     0   :  { %s625_s15 = smov 0   ;;  %s627_s16 = smov 0   ;;  %s669_s0 = inlined_call_operand.vmem [shape: bf16[2,128,64], index: 0, kind: input, shape index: {}]   ;;  %s670_s1 = inlined_call_operand.vmem [shape: f32[2,32,128], index: 1, kind: input, shape index: {}]   ;;  %s671_s2 = inlined_call_operand.vmem [shape: f32[32,1], index: 2, kind: input, shape index: {}]   ;;  %s672_s3 = inlined_call_operand.vmem [shape: f32[32,1], index: 3, kind: input, shape index: {}]   ;;  %s673_s4 = inlined_call_operand.vmem [shape: f32[2,32,64], index: 4, kind: output, shape index: {}]  }
   0x1   :  { %s629_s17 = smov 0  }
   0x2 LB: > { %s26_s2 = sadd.s32 1, %s594_s16  ;;  %p494_p0 = scmp.ge.s32.totalorder %s598_s17, 1  ;;  %s598_s17 = sphi %s629_s17, %s14_s17   ;;  %s594_s16 = sphi %s627_s16, %s675_s16   ;;  %s590_s15 = sphi %s625_s15, %s674_s15  }
   0x3   : > { %p28_p1 = scmp.ge.s32.totalorder %s26_s2, 2  ;;  %p196_p2 = scmp.lt.s32.totalorder %s598_s17, 3 }
   0x5   : > { %s677_s2 = smov (%p28_p1, %s26_s2), 0  ;;  %p197_p3 = pnand %p494_p0, %p196_p2 }
   0x6   : > { %p235_p4 = scmp.lt.s32.totalorder (!%p197_p3), %s590_s15, 1  ;;  %vm381_vm0 = vcmask (!%p197_p3), 523264  }
   0x7   : > { %200 = sbr.rel (%p197_p3) target bundleno = 266 (0x10a), region = 36 }
   0xe   : > { %s679_s15 = smov (!%p235_p4, %s590_s15), 1 }
   0xf   : > { %s511_s3 = sshll.u32 %s679_s15, 6  ;;  %s512_s21 = sshll.u32 %s679_s15, 5 }
  0x10   : > { %s242_s20 = scalar_lea.vmem %s669_s0, %s511_s3  ;;  %s251_s24 = scalar_lea.vmem %s670_s1, %s512_s21 }
  0x11   : > { %v568_v0 = vld [vmem:[%s242_s20] sm:$0xff]   ;;  %v569_v1 = vld [vmem:[%s242_s20 + $0x8] sm:$0xff]   ;;  %v570_v2 = vld [vmem:[%s242_s20 + $0x10] sm:$0xff]   ;;  %s256_s27 = scalar_lea.vmem %s673_s4, %s512_s21 }
  0x12   : > { %524 = vmatprep.subr.bf16.mxu0 %v568_v0  ;;  %v571_v3 = vld [vmem:[%s242_s20 + $0x18] sm:$0xff]   ;;  %v258_v4 = vld [vmem:[%s251_s24] sm:$0xff]  ;;  %v259_v5 = vld [vmem:[%s251_s24 + $0x8] sm:$0xff] }
  0x13   : > { %525 = vmatpush3.bf16.msra.mxu0 %v568_v0  ;;  %v262_v6 = vpack.c.bf16 %v259_v5, %v258_v4  ;;  %v572_v7 = vld [vmem:[%s242_s20 + $0x20] sm:$0xff]   ;;  %v573_v8 = vld [vmem:[%s242_s20 + $0x28] sm:$0xff]   ;;  %v574_v9 = vld [vmem:[%s242_s20 + $0x30] sm:$0xff]  }
  0x14   : > { %526 = vmatprep.subr.bf16.mxu0 %v569_v1  ;;  %v575_v10 = vld [vmem:[%s242_s20 + $0x38] sm:$0xff]   ;;  %v260_v11 = vld [vmem:[%s251_s24 + $0x10] sm:$0xff] }
  0x15   : > { %540 = vmatprep.mubr.bf16.mxu0 %v262_v6  ;;  %v261_v12 = vld [vmem:[%s251_s24 + $0x18] sm:$0xff] }
  0x16   : > { %v263_v13 = vpack.c.bf16 %v261_v12, %v260_v11 }
  0x17   : > { %527 = vmatpush3.bf16.msra.mxu0 %v569_v1 }
  0x18   : > { %528 = vmatprep.subr.bf16.mxu0 %v570_v2 }
  0x1b   : > { %529 = vmatpush3.bf16.msra.mxu0 %v570_v2 }
  0x1c   : > { %530 = vmatprep.subr.bf16.mxu0 %v571_v3 }
  0x1f   : > { %531 = vmatpush3.bf16.msra.mxu0 %v571_v3 }
  0x20   : > { %532 = vmatprep.subr.bf16.mxu0 %v572_v7 }
  0x23   : > { %533 = vmatpush3.bf16.msra.mxu0 %v572_v7 }
  0x24   : > { %534 = vmatprep.subr.bf16.mxu0 %v573_v8 }
  0x27   : > { %535 = vmatpush3.bf16.msra.mxu0 %v573_v8 }
  0x28   : > { %536 = vmatprep.subr.bf16.mxu0 %v574_v9 }
  0x2b   : > { %537 = vmatpush3.bf16.msra.mxu0 %v574_v9 }
  0x2c   : > { %538 = vmatprep.subr.bf16.mxu0 %v575_v10 }
  0x2f   : > { %539 = vmatpush3.bf16.msra.mxu0 %v575_v10 }
  0x32   : > { %541 = vmatmul.mubr.bf16.vlgmr.msra.gmra.mrb[0].mxu0 %v263_v13 }
 0x105   : > { %v542_v14 = vpop.f32.mrb[0].mxu0 }
 0x106   : > { %384 = vst.msk [vmem:[%s256_s27 + $0x10] sm:$0xff] %vm381_vm0, %v542_v14  ;;  %v362_v15 = vpop.f32.mrb[1].mxu0 }
 0x107   : > { %382 = vst.msk [vmem:[%s256_s27] sm:$0xff] %vm381_vm0, %v362_v15  ;;  %v543_v16 = vpop.f32.mrb[2].mxu0 }
 0x108   : > { %385 = vst.msk [vmem:[%s256_s27 + $0x18] sm:$0xff] %vm381_vm0, %v543_v16  ;;  %v365_v17 = vpop.f32.mrb[3].mxu0 }
 0x109   : > { %383 = vst.msk [vmem:[%s256_s27 + $0x8] sm:$0xff] %vm381_vm0, %v365_v17 }
 0x10a PF: > { %s14_s17 = sadd.s32 1, %s598_s17   ;;  %s674_s15 = smov %s594_s16 }
 0x10b   : > { %p11_p5 = scmp.ge.s32.totalorder %s14_s17, 4   ;;  %s675_s16 = smov %s677_s2 }
 0x10d   :  { %13 = sbr.rel (!%p11_p5) target bundleno = 2 (0x2), region = 77 }

// kernel: fno_dse_forward.11
= control target key start
LH: loop header
LB: loop body
LE: loop exit
PB: predicated region body
PF: predicated region fallthrough
CT: control target
= control target key end

     0   :  { %s1072_s27 = smov 0   ;;  %s1074_s28 = smov 0   ;;  %s1167_s0 = inlined_call_operand.vmem [shape: bf16[2,32,112], index: 0, kind: input, shape index: {}]   ;;  %s1168_s1 = inlined_call_operand.vmem [shape: bf16[2,112,128], index: 1, kind: input, shape index: {}]   ;;  %s1169_s2 = inlined_call_operand.vmem [shape: f32[2,32,128], index: 2, kind: input, shape index: {}]   ;;  %s1170_s3 = inlined_call_operand.vmem [shape: f32[32,32], index: 3, kind: input, shape index: {}]   ;;  %s1171_s4 = inlined_call_operand.vmem [shape: f32[32,1], index: 4, kind: input, shape index: {}]   ;;  %s1172_s5 = inlined_call_operand.vmem [shape: f32[32,1], index: 5, kind: input, shape index: {}]   ;;  %s1173_s6 = inlined_call_operand.vmem [shape: f32[32,1], index: 6, kind: input, shape index: {}]   ;;  %s1174_s7 = inlined_call_operand.vmem [shape: f32[2,32,128], index: 7, kind: output, shape index: {0}]   ;;  %s1175_s8 = inlined_call_operand.vmem [shape: f32[2,32,2], index: 8, kind: output, shape index: {1}]  }
   0x1   :  { %s1076_s29 = smov 0  }
   0x2 LB: > { %s31_s5 = sadd.s32 1, %s1020_s28  ;;  %p877_p0 = scmp.ge.s32.totalorder %s1024_s29, 1  ;;  %s1024_s29 = sphi %s1076_s29, %s19_s29   ;;  %s1020_s28 = sphi %s1074_s28, %s1177_s28   ;;  %s1016_s27 = sphi %s1072_s27, %s1176_s27  }
   0x3   : > { %p33_p1 = scmp.ge.s32.totalorder %s31_s5, 2  ;;  %p309_p2 = scmp.lt.s32.totalorder %s1024_s29, 3 }
   0x5   : > { %s1179_s5 = smov (%p33_p1, %s31_s5), 0  ;;  %p310_p3 = pnand %p877_p0, %p309_p2 }
   0x6   : > { %p367_p4 = scmp.lt.s32.totalorder (!%p310_p3), %s1016_s27, 1  ;;  %v424_v0 = vld [vmem:[%s1170_s3] sm:$0xff] (!%p310_p3)  ;;  %vm428_vm0 = vcmask (!%p310_p3), 261120   ;;  %v636_v1 = vld [vmem:[%s1171_s4 + $0x10] sm:$0xff] (!%p310_p3)  ;;  %v1026_v3 = vmov (!%p310_p3), 0   ;;  %v637_v4 = vld [vmem:[%s1171_s4 + $0x18] sm:$0xff] (!%p310_p3)  ;;  %v667_v28 = vlaneseq (!%p310_p3) }
   0x7   : > { %313 = sbr.rel (%p310_p3) target bundleno = 424 (0x1a8), region = 48  ;;  %933 = vmatprep.mubr.msk.f32.mxu0 (!%p310_p3), %vm428_vm0, %v424_v0  ;;  %v634_v2 = vld [vmem:[%s1171_s4] sm:$0xff] (!%p310_p3)  ;;  %992 = vset.pattern.permute.xlu1 (!%p310_p3), %v1026_v3  ;;  %v635_v5 = vld [vmem:[%s1171_s4 + $0x8] sm:$0xff] (!%p310_p3)  ;;  %vm578_vm1 = vcmask (!%p310_p3), 916480   ;;  %v426_v18 = vld [vmem:[%s1170_s3 + $0x10] sm:$0xff] (!%p310_p3)  ;;  %vm696_vm3 = vcmask (!%p310_p3), 7168  }
   0x8   : > { %991 = vset.pattern.permute.xlu0 (!%p310_p3), %v1026_v3  ;;  %650 = vperm.xlu1 (!%p310_p3), %992, %v636_v1   ;;  %v425_v17 = vld [vmem:[%s1170_s3 + $0x8] sm:$0xff] (!%p310_p3)  ;;  %v427_v20 = vld [vmem:[%s1170_s3 + $0x18] sm:$0xff] (!%p310_p3)  ;;  %v668_v31 = vand.u32 (!%p310_p3), 127, %v667_v28  ;;  %vm705_vm4 = vcmask (!%p310_p3), 15360  }
   0x9   : > { %640 = vperm.xlu0 (!%p310_p3), %991, %v634_v2  }
   0xa   : > { %vm671_vm2 = vcmp.lt.s32.totalorder (!%p310_p3), %v668_v31, 64 }
   0xc   : > { %655 = vperm.xlu1 (!%p310_p3), %992, %v637_v4  }
   0xd   : > { %645 = vperm.xlu0 (!%p310_p3), %991, %v635_v5  }
   0xe   : > { %s1181_s27 = smov (!%p367_p4, %s1016_s27), 1 }
   0xf   : > { %s965_s13 = smul.u32 56, %s1181_s27  ;;  %s1104_s14 = sshll.u32 %s1181_s27, 5 }
  0x10   : > { %s387_s21 = scalar_lea.vmem %s1169_s2, %s1104_s14  ;;  %s904_s25 = sshll.u32 %s1181_s27, 4 }
  0x11   : > { %s1119_s24 = scalar_lea.vmem %s1168_s1, %s965_s13  ;;  %v402_v6 = vld [vmem:[%s387_s21] sm:$0xff]  ;;  %v403_v7 = vld [vmem:[%s387_s21 + $0x8] sm:$0xff]  ;;  %v404_v11 = vld [vmem:[%s387_s21 + $0x10] sm:$0xff]  ;;  %s371_s30 = scalar_lea.vmem %s1167_s0, %s904_s25 }
  0x12   : > { %v993_v8 = vld [vmem:[%s1119_s24] sm:$0xff]   ;;  %v957_v9 = vpack.c.bf16 %v403_v7, %v402_v6  ;;  %v994_v10 = vld [vmem:[%s1119_s24 + $0x8] sm:$0xff]   ;;  %v995_v12 = vld [vmem:[%s1119_s24 + $0x10] sm:$0xff]   ;;  %s395_s17 = scalar_lea.vmem %s1174_s7, %s1104_s14  ;;  %s400_s20 = scalar_lea.vmem %s1175_s8, %s1104_s14 }
  0x13   : > { %939 = vmatprep.subr.bf16.mxu1 %v993_v8  ;;  %v405_v13 = vld [vmem:[%s387_s21 + $0x18] sm:$0xff]  ;;  %v1000_v16 = vld [vmem:[%s371_s30] sm:$0xff]   ;;  %v998_v21 = vld [vmem:[%s1119_s24 + $0x28] sm:$0xff]  }
  0x14   : > { %958 = vmatprep.subr.bf16.mxu0 %v957_v9  ;;  %940 = vmatpush3.bf16.msra.mxu1 %v993_v8  ;;  %v961_v14 = vpack.c.bf16 %v405_v13, %v404_v11  ;;  %v996_v15 = vld [vmem:[%s1119_s24 + $0x18] sm:$0xff]   ;;  %v997_v19 = vld [vmem:[%s1119_s24 + $0x20] sm:$0xff]   ;;  %v999_v22 = vld [vmem:[%s1119_s24 + $0x30] sm:$0xff]  }
  0x15   : > { %960 = vmatpush3.bf16.msra.mxu0 %v957_v9  ;;  %941 = vmatprep.subr.bf16.mxu1 %v994_v10  ;;  %v1001_v23 = vld [vmem:[%s371_s30 + $0x8] sm:$0xff]  }
  0x16   : > { %962 = vmatprep.subr.bf16.mxu0 %v961_v14  ;;  %953 = vmatprep.mubr.msk.bf16.mxu1 %vm578_vm1, %v1000_v16 }
  0x18   : > { %942 = vmatpush3.bf16.msra.mxu1 %v994_v10 }
  0x19   : > { %943 = vmatprep.subr.bf16.mxu1 %v995_v12  ;;  %964 = vmatpush3.bf16.msra.mxu0 %v961_v14 }
  0x1c   : > { %944 = vmatpush3.bf16.msra.mxu1 %v995_v12  ;;  %934 = vmatmul.mubr.msk.f32.vlgmr.msra.gmra.mrb[0].mxu0 %vm428_vm0, %v425_v17 }
  0x1d   : > { %945 = vmatprep.subr.bf16.mxu1 %v996_v15  ;;  %936 = vmatprep.mubr.msk.f32.mxu0 %vm428_vm0, %v426_v18 }
  0x20   : > { %946 = vmatpush3.bf16.msra.mxu1 %v996_v15  ;;  %937 = vmatmul.mubr.msk.f32.gmra.mrb[2].mxu0 %vm428_vm0, %v427_v20 }
  0x21   : > { %947 = vmatprep.subr.bf16.mxu1 %v997_v19 }
  0x24   : > { %948 = vmatpush3.bf16.msra.mxu1 %v997_v19 }
  0x25   : > { %949 = vmatprep.subr.bf16.mxu1 %v998_v21 }
  0x28   : > { %950 = vmatpush3.bf16.msra.mxu1 %v998_v21 }
  0x29   : > { %951 = vmatprep.subr.bf16.mxu1 %v999_v22 }
  0x2c   : > { %952 = vmatpush3.bf16.msra.mxu1 %v999_v22 }
  0x2f   : > { %954 = vmatmul.mubr.msk.bf16.vlgmr.msra.gmra.mrb[0].mxu1 %vm578_vm1, %v1001_v23 }
  0x87   : > { %v651_v30 = vpop.permute.xlu1 %650 }
  0x88   : > { %v641_v29 = vpop.permute.xlu0 %640 }
  0x8b   : > { %v656_v41 = vpop.permute.xlu1 %655 }
  0x8c   : > { %v646_v39 = vpop.permute.xlu0 %645 }
  0xef   : > { %v935_v24 = vpop.f32.mrb[0].mxu0 }
  0xf0   : > { %v507_v25 = vpop.f32.mrb[1].mxu0 }
  0xf3   : > { %v938_v26 = vpop.f32.mrb[2].mxu0 }
  0xf4   : > { %v517_v27 = vpop.f32.mrb[3].mxu0 }
 0x102   : > { %v955_v32 = vpop.f32.mrb[0].mxu1 }
 0x103   : > { %v628_v33 = vadd.f32 %v955_v32, %v517_v27  ;;  %v619_v34 = vpop.f32.mrb[1].mxu1 }
 0x104   : > { %v620_v35 = vadd.f32 %v619_v34, %v507_v25  ;;  %v956_v36 = vpop.f32.mrb[2].mxu1 }
 0x105   : > { %v631_v37 = vadd.f32 %v956_v36, %v938_v26  ;;  %v622_v38 = vpop.f32.mrb[3].mxu1  ;;  %v660_v40 = vadd.f32 %v651_v30, %v628_v33 }
 0x106   : > { %v623_v42 = vadd.f32 %v935_v24, %v622_v38  ;;  %v658_v43 = vadd.f32 %v641_v29, %v620_v35 }
 0x107   : > { %v674_v44 = vsel %vm671_vm2, %v660_v40, 0.0  ;;  %664 = vst [vmem:[%s395_s17 + $0x10] sm:$0xff] %v660_v40  ;;  %v661_v45 = vadd.f32 %v656_v41, %v631_v37 }
 0x108   : > { %v659_v46 = vadd.f32 %v646_v39, %v623_v42  ;;  %680 = vadd.xlane.f32.xlu0 %v674_v44  ;;  %662 = vst [vmem:[%s395_s17] sm:$0xff] %v658_v43  ;;  %v672_v48 = vsel %vm671_vm2, %v658_v43, 0.0  ;;  %v686_v51 = vmul.f32 %v674_v44, %v674_v44 }
 0x109   : > { %665 = vst [vmem:[%s395_s17 + $0x18] sm:$0xff] %v661_v45  ;;  %v684_v49 = vmul.f32 %v672_v48, %v672_v48  ;;  %v675_v50 = vsel %vm671_vm2, %v661_v45, 0.0 }
 0x10a   : > { %663 = vst [vmem:[%s395_s17 + $0x8] sm:$0xff] %v659_v46  ;;  %v673_v47 = vsel %vm671_vm2, %v659_v46, 0.0  ;;  %v687_v53 = vmul.f32 %v675_v50, %v675_v50 }
 0x10b   : > { %678 = vadd.xlane.f32.xlu1 %v673_v47  ;;  %v685_v52 = vmul.f32 %v673_v47, %v673_v47 }
 0x10c   : > { %676 = vadd.xlane.f32.xlu0 %v672_v48 }
 0x10f   : > { %688 = vadd.xlane.f32.xlu1 %v684_v49 }
 0x110   : > { %682 = vadd.xlane.f32.xlu0 %v675_v50 }
 0x113   : > { %692 = vadd.xlane.f32.xlu1 %v686_v51 }
 0x114   : > { %690 = vadd.xlane.f32.xlu0 %v685_v52 }
 0x118   : > { %694 = vadd.xlane.f32.xlu0 %v687_v53 }
 0x195   : > { %v681_v54 = vpop.xlane.xlu0 %680 }
 0x198   : > { %v679_v55 = vpop.xlane.xlu1 %678 }
 0x199   : > { %v677_v56 = vpop.xlane.xlu0 %676 }
 0x19c   : > { %v689_v57 = vpop.xlane.xlu1 %688 }
 0x19d   : > { %v697_v58 = vsel %vm696_vm3, %v677_v56, %v689_v57  ;;  %v683_v59 = vpop.xlane.xlu0 %682 }
 0x19e   : > { %706 = vst.msk [vmem:[%s400_s20] sm:$0xff] %vm705_vm4, %v697_v58 }
 0x1a0   : > { %v693_v60 = vpop.xlane.xlu1 %692 }
 0x1a1   : > { %v699_v61 = vsel %vm696_vm3, %v681_v54, %v693_v60  ;;  %v691_v62 = vpop.xlane.xlu0 %690 }
 0x1a2   : > { %708 = vst.msk [vmem:[%s400_s20 + $0x10] sm:$0xff] %vm705_vm4, %v699_v61  ;;  %v698_v63 = vsel %vm696_vm3, %v679_v55, %v691_v62 }
 0x1a3   : > { %707 = vst.msk [vmem:[%s400_s20 + $0x8] sm:$0xff] %vm705_vm4, %v698_v63 }
 0x1a5   : > { %v695_v0 = vpop.xlane.xlu0 %694 }
 0x1a6   : > { %v700_v1 = vsel %vm696_vm3, %v683_v59, %v695_v0 }
 0x1a7   : > { %709 = vst.msk [vmem:[%s400_s20 + $0x18] sm:$0xff] %vm705_vm4, %v700_v1 }
 0x1a8 PF: > { %s19_s29 = sadd.s32 1, %s1024_s29   ;;  %s1176_s27 = smov %s1020_s28 }
 0x1a9   : > { %p16_p5 = scmp.ge.s32.totalorder %s19_s29, 4   ;;  %s1177_s28 = smov %s1179_s5 }
 0x1ab   :  { %18 = sbr.rel (!%p16_p5) target bundleno = 2 (0x2), region = 104 }

// kernel: fno_dse_forward.12
= control target key start
LH: loop header
LB: loop body
LE: loop exit
PB: predicated region body
PF: predicated region fallthrough
CT: control target
= control target key end

     0   :  { %s809_s15 = smov 0   ;;  %s811_s16 = smov 0   ;;  %s909_s0 = inlined_call_operand.vmem [shape: bf16[2,128,64], index: 0, kind: input, shape index: {}]   ;;  %s910_s1 = inlined_call_operand.vmem [shape: f32[2,32,128], index: 1, kind: input, shape index: {}]   ;;  %s911_s2 = inlined_call_operand.vmem [shape: f32[32,1], index: 2, kind: input, shape index: {}]   ;;  %s912_s3 = inlined_call_operand.vmem [shape: f32[32,1], index: 3, kind: input, shape index: {}]   ;;  %s913_s4 = inlined_call_operand.vmem [shape: f32[2,32,64], index: 4, kind: output, shape index: {}]  }
   0x1   :  { %s813_s17 = smov 0  }
   0x2 LB: > { %s26_s18 = sadd.s32 1, %s777_s16  ;;  %p658_p0 = scmp.ge.s32.totalorder %s781_s17, 1  ;;  %s781_s17 = sphi %s813_s17, %s14_s17   ;;  %s777_s16 = sphi %s811_s16, %s915_s16   ;;  %s773_s15 = sphi %s809_s15, %s914_s15  }
   0x3   : > { %p28_p1 = scmp.ge.s32.totalorder %s26_s18, 2  ;;  %p196_p2 = scmp.lt.s32.totalorder %s781_s17, 3 }
   0x5   : > { %s917_s18 = smov (%p28_p1, %s26_s18), 0  ;;  %p197_p3 = pnand %p658_p0, %p196_p2 }
   0x6   : > { %v264_v0 = vld [vmem:[%s911_s2 + $0x10] sm:$0xff] (!%p197_p3)  ;;  %v262_v1 = vld [vmem:[%s911_s2] sm:$0xff] (!%p197_p3)  ;;  %p235_p4 = scmp.lt.s32.totalorder (!%p197_p3), %s773_s15, 1  ;;  %v783_v2 = vmov (!%p197_p3), 0   ;;  %v265_v3 = vld [vmem:[%s911_s2 + $0x18] sm:$0xff] (!%p197_p3)  ;;  %vm545_vm4 = vcmask (!%p197_p3), 523264  }
   0x7   : > { %200 = sbr.rel (%p197_p3) target bundleno = 417 (0x1a1), region = 36  ;;  %734 = vset.pattern.permute.xlu1 (!%p197_p3), %v783_v2  ;;  %733 = vset.pattern.permute.xlu0 (!%p197_p3), %v783_v2  ;;  %v263_v4 = vld [vmem:[%s911_s2 + $0x8] sm:$0xff] (!%p197_p3)  ;;  %v290_v6 = vld [vmem:[%s912_s3] sm:$0xff] (!%p197_p3)  ;;  %v293_v7 = vld [vmem:[%s912_s3 + $0x18] sm:$0xff] (!%p197_p3) }
   0x8   : > { %278 = vperm.xlu1 (!%p197_p3), %734, %v264_v0   ;;  %268 = vperm.xlu0 (!%p197_p3), %733, %v262_v1   ;;  %v291_v5 = vld [vmem:[%s912_s3 + $0x8] sm:$0xff] (!%p197_p3)  ;;  %v292_v8 = vld [vmem:[%s912_s3 + $0x10] sm:$0xff] (!%p197_p3) }
   0xc   : > { %283 = vperm.xlu1 (!%p197_p3), %734, %v265_v3   ;;  %273 = vperm.xlu0 (!%p197_p3), %733, %v263_v4  }
   0xe   : > { %s919_s15 = smov (!%p235_p4, %s773_s15), 1 }
   0xf   : > { %s675_s27 = sshll.u32 %s919_s15, 6  ;;  %s676_s13 = sshll.u32 %s919_s15, 5 }
  0x10   : > { %s242_s6 = scalar_lea.vmem %s909_s0, %s675_s27  ;;  %301 = vperm.xlu1 %734, %v291_v5   ;;  %296 = vperm.xlu0 %733, %v290_v6   ;;  %s251_s20 = scalar_lea.vmem %s910_s1, %s676_s13 }
  0x11   : > { %v735_v9 = vld [vmem:[%s242_s6] sm:$0xff]   ;;  %v736_v10 = vld [vmem:[%s242_s6 + $0x8] sm:$0xff]   ;;  %v737_v11 = vld [vmem:[%s242_s6 + $0x10] sm:$0xff]   ;;  %s256_s23 = scalar_lea.vmem %s913_s4, %s676_s13 }
  0x12   : > { %688 = vmatprep.subr.bf16.mxu0 %v735_v9  ;;  %v738_v12 = vld [vmem:[%s242_s6 + $0x18] sm:$0xff]   ;;  %v739_v13 = vld [vmem:[%s242_s6 + $0x20] sm:$0xff]   ;;  %v740_v14 = vld [vmem:[%s242_s6 + $0x28] sm:$0xff]  }
  0x13   : > { %689 = vmatpush3.bf16.msra.mxu0 %v735_v9  ;;  %v741_v15 = vld [vmem:[%s242_s6 + $0x30] sm:$0xff]   ;;  %v742_v16 = vld [vmem:[%s242_s6 + $0x38] sm:$0xff]   ;;  %v258_v19 = vld [vmem:[%s251_s20] sm:$0xff] }
  0x14   : > { %311 = vperm.xlu1 %734, %v293_v7   ;;  %306 = vperm.xlu0 %733, %v292_v8   ;;  %v259_v22 = vld [vmem:[%s251_s20 + $0x8] sm:$0xff]  ;;  %v260_v27 = vld [vmem:[%s251_s20 + $0x10] sm:$0xff]  ;;  %v261_v28 = vld [vmem:[%s251_s20 + $0x18] sm:$0xff] }
  0x15   : > { %690 = vmatprep.subr.bf16.mxu0 %v736_v10 }
  0x17   : > { %691 = vmatpush3.bf16.msra.mxu0 %v736_v10 }
  0x18   : > { %692 = vmatprep.subr.bf16.mxu0 %v737_v11 }
  0x1b   : > { %693 = vmatpush3.bf16.msra.mxu0 %v737_v11 }
  0x1c   : > { %694 = vmatprep.subr.bf16.mxu0 %v738_v12 }
  0x1f   : > { %695 = vmatpush3.bf16.msra.mxu0 %v738_v12 }
  0x20   : > { %696 = vmatprep.subr.bf16.mxu0 %v739_v13 }
  0x23   : > { %697 = vmatpush3.bf16.msra.mxu0 %v739_v13 }
  0x24   : > { %698 = vmatprep.subr.bf16.mxu0 %v740_v14 }
  0x27   : > { %699 = vmatpush3.bf16.msra.mxu0 %v740_v14 }
  0x28   : > { %700 = vmatprep.subr.bf16.mxu0 %v741_v15 }
  0x2b   : > { %701 = vmatpush3.bf16.msra.mxu0 %v741_v15 }
  0x2c   : > { %702 = vmatprep.subr.bf16.mxu0 %v742_v16 }
  0x2f   : > { %703 = vmatpush3.bf16.msra.mxu0 %v742_v16 }
  0x87   : > { %v279_v17 = vpop.permute.xlu1 %278  ;;  %v269_v18 = vpop.permute.xlu0 %268 }
  0x88   : > { %v286_v23 = vmul.f32 %v269_v18, %v258_v19  ;;  %v288_v33 = vmul.f32 %v279_v17, %v260_v27 }
  0x8b   : > { %v284_v20 = vpop.permute.xlu1 %283  ;;  %v274_v21 = vpop.permute.xlu0 %273 }
  0x8c   : > { %v287_v24 = vmul.f32 %v274_v21, %v259_v22  ;;  %v289_v34 = vmul.f32 %v284_v20, %v261_v28 }
  0x8f   : > { %v302_v25 = vpop.permute.xlu1 %301  ;;  %v297_v26 = vpop.permute.xlu0 %296 }
  0x90   : > { %v863_v29 = vadd.f32 %v302_v25, %v287_v24  ;;  %v865_v30 = vadd.f32 %v297_v26, %v286_v23 }
  0x92   : > { %v868_v31 = vmul.f32 0.70710677, %v863_v29  ;;  %v871_v32 = vmul.f32 0.70710677, %v865_v30 }
  0x93   : > { %v312_v35 = vpop.permute.xlu1 %311  ;;  %v307_v36 = vpop.permute.xlu0 %306 }
  0x94   : > { %v327_v37 = vand.u32 2147483647, %v868_v31  ;;  %v326_v38 = vand.u32 2147483647, %v871_v32  ;;  %v875_v39 = vadd.f32 %v312_v35, %v289_v34  ;;  %v877_v40 = vadd.f32 %v307_v36, %v288_v33 }
  0x95   : > { %vm407_vm0 = vcmp.ge.f32.partialorder %v868_v31, 0.0  ;;  %vm406_vm1 = vcmp.ge.f32.partialorder %v871_v32, 0.0 }
  0x96   : > { %v331_v41 = vmul.f32 0.3275911, %v327_v37  ;;  %v330_v42 = vmul.f32 0.3275911, %v326_v38  ;;  %v880_v43 = vmul.f32 0.70710677, %v875_v39 }
  0x97   : > { %v883_v44 = vmul.f32 0.70710677, %v877_v40  ;;  %v383_v53 = vsub.f32 0.0, %v327_v37  ;;  %v382_v54 = vsub.f32 0.0, %v326_v38  ;;  %v321_v32 = vmul.f32 0.5, %v875_v39 }
  0x98   : > { %v335_v45 = vadd.f32 1.0, %v331_v41  ;;  %v334_v46 = vadd.f32 1.0, %v330_v42  ;;  %v329_v47 = vand.u32 2147483647, %v880_v43  ;;  %vm409_vm2 = vcmp.ge.f32.partialorder %v880_v43, 0.0 }
  0x99   : > { %v328_v48 = vand.u32 2147483647, %v883_v44  ;;  %v387_v56 = vmul.f32 %v383_v53, %v327_v37  ;;  %v386_v58 = vmul.f32 %v382_v54, %v326_v38  ;;  %vm408_vm3 = vcmp.ge.f32.partialorder %v883_v44, 0.0 }
  0x9a   : > { %743 = vrcp.f32 %v335_v45  ;;  %v333_v49 = vmul.f32 0.3275911, %v329_v47  ;;  %v385_v59 = vsub.f32 0.0, %v329_v47 }
  0x9b   : > { %745 = vrcp.f32 %v334_v46  ;;  %v332_v50 = vmul.f32 0.3275911, %v328_v48  ;;  %v384_v61 = vsub.f32 0.0, %v328_v48  ;;  %v392_v0 = vmul.f32 1.442695, %v387_v56 }
  0x9c   : > { %v337_v51 = vadd.f32 1.0, %v333_v49  ;;  %v390_v3 = vmul.f32 1.442695, %v386_v58  ;;  %v389_v4 = vmul.f32 %v385_v59, %v329_v47 }
  0x9d   : > { %v336_v52 = vadd.f32 1.0, %v332_v50  ;;  %v388_v8 = vmul.f32 %v384_v61, %v328_v48 }
  0x9e   : > { %747 = vrcp.f32 %v337_v51  ;;  %v396_v14 = vmul.f32 1.442695, %v389_v4 }
  0x9f   : > { %749 = vrcp.f32 %v336_v52  ;;  %v394_v18 = vmul.f32 1.442695, %v388_v8 }
  0xa0   : > { %751 = vpow2.f32 %v392_v0 }
  0xa1   : > { %753 = vpow2.f32 %v390_v3 }
  0xa2   : > { %755 = vpow2.f32 %v396_v14 }
  0xa3   : > { %757 = vpow2.f32 %v394_v18 }
  0xa4   : > { %v744_v55 = vpop.eup %743 }
  0xa5   : > { %v746_v57 = vpop.eup %745  ;;  %v347_v60 = vmul.f32 1.0614054, %v744_v55 }
  0xa6   : > { %v346_v62 = vmul.f32 1.0614054, %v746_v57 }
  0xa7   : > { %v351_v63 = vadd.f32 -1.4531521, %v347_v60 }
  0xa8   : > { %v350_v1 = vadd.f32 -1.4531521, %v346_v62  ;;  %v748_v2 = vpop.eup %747  ;;  %v319_v62 = vmul.f32 0.5, %v863_v29 }
  0xa9   : > { %v355_v5 = vmul.f32 %v744_v55, %v351_v63  ;;  %v750_v6 = vpop.eup %749  ;;  %v349_v7 = vmul.f32 1.0614054, %v748_v2 }
  0xaa   : > { %v354_v9 = vmul.f32 %v746_v57, %v350_v1  ;;  %v348_v10 = vmul.f32 1.0614054, %v750_v6  ;;  %v752_v38 = vpop.eup %751 }
  0xab   : > { %v359_v11 = vadd.f32 1.4214138, %v355_v5  ;;  %v353_v12 = vadd.f32 -1.4531521, %v349_v7  ;;  %v754_v45 = vpop.eup %753 }
  0xac   : > { %v358_v13 = vadd.f32 1.4214138, %v354_v9  ;;  %v352_v15 = vadd.f32 -1.4531521, %v348_v10  ;;  %v756_v54 = vpop.eup %755 }
  0xad   : > { %v363_v16 = vmul.f32 %v744_v55, %v359_v11  ;;  %v357_v17 = vmul.f32 %v748_v2, %v353_v12  ;;  %v758_v59 = vpop.eup %757  ;;  %v320_v11 = vmul.f32 0.5, %v877_v40 }
  0xae   : > { %v362_v19 = vmul.f32 %v746_v57, %v358_v13  ;;  %v356_v20 = vmul.f32 %v750_v6, %v352_v15 }
  0xaf   : > { %v367_v21 = vadd.f32 -0.28449672, %v363_v16  ;;  %v361_v22 = vadd.f32 1.4214138, %v357_v17 }
  0xb0   : > { %v366_v23 = vadd.f32 -0.28449672, %v362_v19  ;;  %v360_v24 = vadd.f32 1.4214138, %v356_v20 }
  0xb1   : > { %v371_v25 = vmul.f32 %v744_v55, %v367_v21  ;;  %v365_v26 = vmul.f32 %v748_v2, %v361_v22 }
  0xb2   : > { %v370_v27 = vmul.f32 %v746_v57, %v366_v23  ;;  %v364_v28 = vmul.f32 %v750_v6, %v360_v24 }
  0xb3   : > { %v375_v33 = vadd.f32 0.2548296, %v371_v25  ;;  %v369_v34 = vadd.f32 -0.28449672, %v365_v26 }
  0xb4   : > { %v374_v35 = vadd.f32 0.2548296, %v370_v27  ;;  %v368_v36 = vadd.f32 -0.28449672, %v364_v28 }
  0xb5   : > { %v379_v37 = vmul.f32 %v744_v55, %v375_v33  ;;  %v373_v41 = vmul.f32 %v748_v2, %v369_v34 }
  0xb6   : > { %v378_v42 = vmul.f32 %v746_v57, %v374_v35  ;;  %v372_v46 = vmul.f32 %v750_v6, %v368_v36 }
  0xb7   : > { %v399_v47 = vmul.f32 %v752_v38, %v379_v37  ;;  %v377_v48 = vadd.f32 0.2548296, %v373_v41 }
  0xb8   : > { %v398_v49 = vmul.f32 %v754_v45, %v378_v42  ;;  %v376_v50 = vadd.f32 0.2548296, %v372_v46 }
  0xb9   : > { %v403_v51 = vsub.f32 1.0, %v399_v47  ;;  %v381_v52 = vmul.f32 %v748_v2, %v377_v48  ;;  %v318_v2 = vmul.f32 0.5, %v865_v30 }
  0xba   : > { %v402_v53 = vsub.f32 1.0, %v398_v49  ;;  %v380_v56 = vmul.f32 %v750_v6, %v376_v50 }
  0xbb   : > { %v411_v58 = vsub.f32 0.0, %v403_v51  ;;  %v401_v60 = vmul.f32 %v756_v54, %v381_v52 }
  0xbc   : > { %v410_v55 = vsub.f32 0.0, %v402_v53  ;;  %v400_v57 = vmul.f32 %v758_v59, %v380_v56 }
  0xbd   : > { %v415_v61 = vsel %vm407_vm0, %v403_v51, %v411_v58  ;;  %v405_v63 = vsub.f32 1.0, %v401_v60 }
  0xbe   : > { %v414_v0 = vsel %vm406_vm1, %v402_v53, %v410_v55  ;;  %v419_v1 = vadd.f32 1.0, %v415_v61  ;;  %v404_v3 = vsub.f32 1.0, %v400_v57 }
  0xbf   : > { %v418_v4 = vadd.f32 1.0, %v414_v0  ;;  %v413_v5 = vsub.f32 0.0, %v405_v63 }
  0xc0   : > { %v423_v6 = vmul.f32 %v419_v1, %v319_v62  ;;  %v412_v31 = vsub.f32 0.0, %v404_v3 }
  0xc1   : > { %v422_v7 = vmul.f32 %v418_v4, %v318_v2  ;;  %v417_v8 = vsel %vm409_vm2, %v405_v63, %v413_v5 }
  0xc2   : > { %v421_v29 = vadd.f32 1.0, %v417_v8  ;;  %v416_v9 = vsel %vm408_vm3, %v404_v3, %v412_v31 }
  0xc3   : > { %v426_v10 = vpack.c.bf16 %v423_v6, %v422_v7  ;;  %v420_v30 = vadd.f32 1.0, %v416_v9 }
  0xc4   : > { %v425_v12 = vmul.f32 %v421_v29, %v321_v32 }
  0xc5   : > { %704 = vmatprep.mubr.bf16.mxu0 %v426_v10  ;;  %v424_v13 = vmul.f32 %v420_v30, %v320_v11 }
  0xc7   : > { %v427_v14 = vpack.c.bf16 %v425_v12, %v424_v13 }
  0xc9   : > { %705 = vmatmul.mubr.bf16.vlgmr.msra.gmra.mrb[0].mxu0 %v427_v14 }
 0x19c   : > { %v706_v43 = vpop.f32.mrb[0].mxu0 }
 0x19d   : > { %548 = vst.msk [vmem:[%s256_s23 + $0x10] sm:$0xff] %vm545_vm4, %v706_v43  ;;  %v526_v39 = vpop.f32.mrb[1].mxu0 }
 0x19e   : > { %546 = vst.msk [vmem:[%s256_s23] sm:$0xff] %vm545_vm4, %v526_v39  ;;  %v707_v44 = vpop.f32.mrb[2].mxu0 }
 0x19f   : > { %549 = vst.msk [vmem:[%s256_s23 + $0x18] sm:$0xff] %vm545_vm4, %v707_v44  ;;  %v529_v15 = vpop.f32.mrb[3].mxu0 }
 0x1a0   : > { %547 = vst.msk [vmem:[%s256_s23 + $0x8] sm:$0xff] %vm545_vm4, %v529_v15 }
 0x1a1 PF: > { %s14_s17 = sadd.s32 1, %s781_s17   ;;  %s914_s15 = smov %s777_s16 }
 0x1a2   : > { %p11_p5 = scmp.ge.s32.totalorder %s14_s17, 4   ;;  %s915_s16 = smov %s917_s18 }
 0x1a4   :  { %13 = sbr.rel (!%p11_p5) target bundleno = 2 (0x2), region = 77 }

// kernel: fno_dse_forward.14
= control target key start
LH: loop header
LB: loop body
LE: loop exit
PB: predicated region body
PF: predicated region fallthrough
CT: control target
= control target key end

     0   :  { %s1252_s27 = smov 0   ;;  %s1254_s28 = smov 0   ;;  %s1401_s0 = inlined_call_operand.vmem [shape: bf16[2,32,112], index: 0, kind: input, shape index: {}]   ;;  %s1402_s1 = inlined_call_operand.vmem [shape: bf16[2,112,128], index: 1, kind: input, shape index: {}]   ;;  %s1403_s2 = inlined_call_operand.vmem [shape: f32[2,32,128], index: 2, kind: input, shape index: {}]   ;;  %s1404_s3 = inlined_call_operand.vmem [shape: f32[32,32], index: 3, kind: input, shape index: {}]   ;;  %s1405_s4 = inlined_call_operand.vmem [shape: f32[32,1], index: 4, kind: input, shape index: {}]   ;;  %s1406_s5 = inlined_call_operand.vmem [shape: f32[32,1], index: 5, kind: input, shape index: {}]   ;;  %s1407_s6 = inlined_call_operand.vmem [shape: f32[32,1], index: 6, kind: input, shape index: {}]   ;;  %s1408_s7 = inlined_call_operand.vmem [shape: f32[2,32,128], index: 7, kind: output, shape index: {0}]   ;;  %s1409_s8 = inlined_call_operand.vmem [shape: f32[2,32,2], index: 8, kind: output, shape index: {1}]  }
   0x1   :  { %s1256_s29 = smov 0  }
   0x2 LB: > { %s31_s30 = sadd.s32 1, %s1200_s28  ;;  %p1041_p0 = scmp.ge.s32.totalorder %s1204_s29, 1  ;;  %s1204_s29 = sphi %s1256_s29, %s19_s29   ;;  %s1200_s28 = sphi %s1254_s28, %s1411_s28   ;;  %s1196_s27 = sphi %s1252_s27, %s1410_s27  }
   0x3   : > { %p33_p1 = scmp.ge.s32.totalorder %s31_s30, 2  ;;  %p309_p2 = scmp.lt.s32.totalorder %s1204_s29, 3 }
   0x5   : > { %s1413_s30 = smov (%p33_p1, %s31_s30), 0  ;;  %p310_p3 = pnand %p1041_p0, %p309_p2 }
   0x6   : > { %v434_v0 = vld [vmem:[%s1407_s6] sm:$0xff] (!%p310_p3)  ;;  %p367_p4 = scmp.lt.s32.totalorder (!%p310_p3), %s1196_s27, 1  ;;  %v1206_v2 = vmov (!%p310_p3), 0   ;;  %v435_v3 = vld [vmem:[%s1407_s6 + $0x8] sm:$0xff] (!%p310_p3)  ;;  %v409_v5 = vld [vmem:[%s1406_s5 + $0x18] sm:$0xff] (!%p310_p3)  ;;  %vm742_vm0 = vcmask (!%p310_p3), 916480  }
   0x7   : > { %313 = sbr.rel (%p310_p3) target bundleno = 583 (0x247), region = 48  ;;  %v406_v1 = vld [vmem:[%s1406_s5] sm:$0xff] (!%p310_p3)  ;;  %1156 = vset.pattern.permute.xlu1 (!%p310_p3), %v1206_v2  ;;  %1155 = vset.pattern.permute.xlu0 (!%p310_p3), %v1206_v2  ;;  %v407_v4 = vld [vmem:[%s1406_s5 + $0x8] sm:$0xff] (!%p310_p3)  ;;  %v408_v6 = vld [vmem:[%s1406_s5 + $0x10] sm:$0xff] (!%p310_p3)  ;;  %vm592_vm1 = vcmask (!%p310_p3), 261120   ;;  %vm860_vm7 = vcmask (!%p310_p3), 7168  }
   0x8   : > { %440 = vperm.xlu1 (!%p310_p3), %1156, %v434_v0   ;;  %412 = vperm.xlu0 (!%p310_p3), %1155, %v406_v1   ;;  %v437_v7 = vld [vmem:[%s1407_s6 + $0x18] sm:$0xff] (!%p310_p3)  ;;  %v436_v8 = vld [vmem:[%s1407_s6 + $0x10] sm:$0xff] (!%p310_p3)  ;;  %v799_v9 = vld [vmem:[%s1405_s4 + $0x8] sm:$0xff] (!%p310_p3)  ;;  %vm869_vm8 = vcmask (!%p310_p3), 15360  }
   0x9   : > { %v798_v10 = vld [vmem:[%s1405_s4] sm:$0xff] (!%p310_p3)  ;;  %v801_v11 = vld [vmem:[%s1405_s4 + $0x18] sm:$0xff] (!%p310_p3)  ;;  %v800_v12 = vld [vmem:[%s1405_s4 + $0x10] sm:$0xff] (!%p310_p3) }
   0xa   : > { %v588_v22 = vld [vmem:[%s1404_s3] sm:$0xff] (!%p310_p3) }
   0xb   : > { %1097 = vmatprep.mubr.msk.f32.mxu0 (!%p310_p3), %vm592_vm1, %v588_v22 }
   0xc   : > { %445 = vperm.xlu1 (!%p310_p3), %1156, %v435_v3   ;;  %417 = vperm.xlu0 (!%p310_p3), %1155, %v407_v4  }
   0xe   : > { %s1415_s27 = smov (!%p367_p4, %s1196_s27), 1 }
   0xf   : > { %s1129_s17 = smul.u32 56, %s1415_s27  ;;  %s1068_s19 = sshll.u32 %s1415_s27, 4 }
  0x10   : > { %427 = vperm.xlu1 %1156, %v409_v5   ;;  %422 = vperm.xlu0 %1155, %v408_v6   ;;  %s371_s22 = scalar_lea.vmem %s1401_s0, %s1068_s19 }
  0x11   : > { %s1294_s24 = scalar_lea.vmem %s1402_s1, %s1129_s17  ;;  %v1164_v20 = vld [vmem:[%s371_s22] sm:$0xff]   ;;  %v1165_v21 = vld [vmem:[%s371_s22 + $0x8] sm:$0xff]  }
  0x12   : > { %v1157_v13 = vld [vmem:[%s1294_s24] sm:$0xff]   ;;  %v1158_v14 = vld [vmem:[%s1294_s24 + $0x8] sm:$0xff]   ;;  %v1159_v15 = vld [vmem:[%s1294_s24 + $0x10] sm:$0xff]   ;;  %1117 = vmatprep.mubr.msk.bf16.mxu1 %vm742_vm0, %v1164_v20 }
  0x13   : > { %1103 = vmatprep.subr.bf16.mxu1 %v1157_v13  ;;  %v1160_v16 = vld [vmem:[%s1294_s24 + $0x18] sm:$0xff]   ;;  %v1161_v17 = vld [vmem:[%s1294_s24 + $0x20] sm:$0xff]   ;;  %v1162_v18 = vld [vmem:[%s1294_s24 + $0x28] sm:$0xff]  }
  0x14   : > { %455 = vperm.xlu1 %1156, %v437_v7   ;;  %450 = vperm.xlu0 %1155, %v436_v8   ;;  %v1163_v19 = vld [vmem:[%s1294_s24 + $0x30] sm:$0xff]   ;;  %s1330_s24 = sshll.u32 %s1415_s27, 5 }
  0x15   : > { %1104 = vmatpush3.bf16.msra.mxu1 %v1157_v13  ;;  %s387_s10 = scalar_lea.vmem %s1403_s2, %s1330_s24  ;;  %s395_s18 = scalar_lea.vmem %s1408_s7, %s1330_s24 }
  0x16   : > { %1105 = vmatprep.subr.bf16.mxu1 %v1158_v14  ;;  %v402_v23 = vld [vmem:[%s387_s10] sm:$0xff]  ;;  %v403_v27 = vld [vmem:[%s387_s10 + $0x8] sm:$0xff]  ;;  %v405_v39 = vld [vmem:[%s387_s10 + $0x18] sm:$0xff]  ;;  %s400_s21 = scalar_lea.vmem %s1409_s8, %s1330_s24 }
  0x17   : > { %v404_v40 = vld [vmem:[%s387_s10 + $0x10] sm:$0xff] }
  0x18   : > { %809 = vperm.xlu1 %1156, %v799_v9   ;;  %804 = vperm.xlu0 %1155, %v798_v10  }
  0x19   : > { %1106 = vmatpush3.bf16.msra.mxu1 %v1158_v14 }
  0x1a   : > { %1107 = vmatprep.subr.bf16.mxu1 %v1159_v15 }
  0x1c   : > { %819 = vperm.xlu1 %1156, %v801_v11   ;;  %814 = vperm.xlu0 %1155, %v800_v12  }
  0x1d   : > { %1108 = vmatpush3.bf16.msra.mxu1 %v1159_v15 }
  0x1e   : > { %1109 = vmatprep.subr.bf16.mxu1 %v1160_v16 }
  0x21   : > { %1110 = vmatpush3.bf16.msra.mxu1 %v1160_v16 }
  0x22   : > { %1111 = vmatprep.subr.bf16.mxu1 %v1161_v17 }
  0x25   : > { %1112 = vmatpush3.bf16.msra.mxu1 %v1161_v17 }
  0x26   : > { %1113 = vmatprep.subr.bf16.mxu1 %v1162_v18 }
  0x29   : > { %1114 = vmatpush3.bf16.msra.mxu1 %v1162_v18 }
  0x2a   : > { %1115 = vmatprep.subr.bf16.mxu1 %v1163_v19 }
  0x2d   : > { %1116 = vmatpush3.bf16.msra.mxu1 %v1163_v19 }
  0x30   : > { %1118 = vmatmul.mubr.msk.bf16.vlgmr.msra.gmra.mrb[0].mxu1 %vm742_vm0, %v1165_v21 }
  0x87   : > { %v441_v24 = vpop.permute.xlu1 %440  ;;  %v413_v25 = vpop.permute.xlu0 %412 }
  0x88   : > { %v430_v26 = vmul.f32 %v413_v25, %v402_v23 }
  0x8a   : > { %v1336_v28 = vadd.f32 %v441_v24, %v430_v26 }
  0x8b   : > { %v446_v29 = vpop.permute.xlu1 %445  ;;  %v418_v30 = vpop.permute.xlu0 %417 }
  0x8c   : > { %v1339_v31 = vmul.f32 0.70710677, %v1336_v28  ;;  %v431_v32 = vmul.f32 %v418_v30, %v403_v27 }
  0x8e   : > { %v470_v33 = vand.u32 2147483647, %v1339_v31  ;;  %v1342_v34 = vadd.f32 %v446_v29, %v431_v32  ;;  %vm550_vm2 = vcmp.ge.f32.partialorder %v1339_v31, 0.0 }
  0x8f   : > { %v428_v35 = vpop.permute.xlu1 %427  ;;  %v423_v36 = vpop.permute.xlu0 %422 }
  0x90   : > { %v474_v37 = vmul.f32 0.3275911, %v470_v33  ;;  %v1345_v38 = vmul.f32 0.70710677, %v1342_v34  ;;  %v433_v43 = vmul.f32 %v428_v35, %v405_v39  ;;  %v432_v44 = vmul.f32 %v423_v36, %v404_v40 }
  0x91   : > { %v526_v55 = vsub.f32 0.0, %v470_v33 }
  0x92   : > { %v478_v41 = vadd.f32 1.0, %v474_v37  ;;  %v471_v42 = vand.u32 2147483647, %v1345_v38  ;;  %vm551_vm3 = vcmp.ge.f32.partialorder %v1345_v38, 0.0 }
  0x93   : > { %v456_v45 = vpop.permute.xlu1 %455  ;;  %v451_v46 = vpop.permute.xlu0 %450  ;;  %v530_v61 = vmul.f32 %v526_v55, %v470_v33 }
  0x94   : > { %1166 = vrcp.f32 %v478_v41  ;;  %v475_v47 = vmul.f32 0.3275911, %v471_v42  ;;  %v1348_v48 = vadd.f32 %v456_v45, %v433_v43  ;;  %v1350_v49 = vadd.f32 %v451_v46, %v432_v44 }
  0x95   : > { %v527_v62 = vsub.f32 0.0, %v471_v42  ;;  %v534_v2 = vmul.f32 1.442695, %v530_v61 }
  0x96   : > { %v479_v50 = vadd.f32 1.0, %v475_v47  ;;  %v1353_v51 = vmul.f32 0.70710677, %v1348_v48  ;;  %v1356_v52 = vmul.f32 0.70710677, %v1350_v49 }
  0x97   : > { %v531_v3 = vmul.f32 %v527_v62, %v471_v42 }
  0x98   : > { %1168 = vrcp.f32 %v479_v50  ;;  %v473_v53 = vand.u32 2147483647, %v1353_v51  ;;  %v472_v54 = vand.u32 2147483647, %v1356_v52  ;;  %vm553_vm4 = vcmp.ge.f32.partialorder %v1353_v51, 0.0  ;;  %v589_v51 = vld [vmem:[%s1404_s3 + $0x8] sm:$0xff] }
  0x99   : > { %v536_v9 = vmul.f32 1.442695, %v531_v3  ;;  %vm552_vm5 = vcmp.ge.f32.partialorder %v1356_v52, 0.0  ;;  %v590_v52 = vld [vmem:[%s1404_s3 + $0x10] sm:$0xff] }
  0x9a   : > { %v477_v56 = vmul.f32 0.3275911, %v473_v53  ;;  %v476_v57 = vmul.f32 0.3275911, %v472_v54  ;;  %v529_v6 = vsub.f32 0.0, %v473_v53  ;;  %v528_v10 = vsub.f32 0.0, %v472_v54 }
  0x9c   : > { %v481_v58 = vadd.f32 1.0, %v477_v56  ;;  %v480_v59 = vadd.f32 1.0, %v476_v57  ;;  %v533_v13 = vmul.f32 %v529_v6, %v473_v53  ;;  %v532_v19 = vmul.f32 %v528_v10, %v472_v54 }
  0x9e   : > { %v1167_v60 = vpop.eup %1166  ;;  %1170 = vrcp.f32 %v481_v58  ;;  %v540_v24 = vmul.f32 1.442695, %v533_v13  ;;  %v538_v30 = vmul.f32 1.442695, %v532_v19 }
  0x9f   : > { %v490_v63 = vmul.f32 1.0614054, %v1167_v60  ;;  %1172 = vrcp.f32 %v480_v59 }
  0xa0   : > { %1174 = vpow2.f32 %v534_v2 }
  0xa1   : > { %v494_v0 = vadd.f32 -1.4531521, %v490_v63  ;;  %1176 = vpow2.f32 %v536_v9 }
  0xa2   : > { %v1169_v1 = vpop.eup %1168  ;;  %1178 = vpow2.f32 %v540_v24  ;;  %v831_v24 = vlaneseq }
  0xa3   : > { %v491_v4 = vmul.f32 1.0614054, %v1169_v1  ;;  %v498_v5 = vmul.f32 %v1167_v60, %v494_v0  ;;  %1180 = vpow2.f32 %v538_v30 }
  0xa5   : > { %v495_v7 = vadd.f32 -1.4531521, %v491_v4  ;;  %v502_v8 = vadd.f32 1.4214138, %v498_v5  ;;  %v462_v4 = vmul.f32 0.5, %v1336_v28  ;;  %v463_v5 = vmul.f32 0.5, %v1342_v34 }
  0xa6   : > { %v465_v28 = vmul.f32 0.5, %v1348_v48  ;;  %v591_v48 = vld [vmem:[%s1404_s3 + $0x18] sm:$0xff] }
  0xa7   : > { %v499_v11 = vmul.f32 %v1169_v1, %v495_v7  ;;  %v506_v12 = vmul.f32 %v1167_v60, %v502_v8 }
  0xa8   : > { %v1171_v14 = vpop.eup %1170 }
  0xa9   : > { %v503_v15 = vadd.f32 1.4214138, %v499_v11  ;;  %v510_v16 = vadd.f32 -0.28449672, %v506_v12  ;;  %v1173_v17 = vpop.eup %1172  ;;  %v493_v18 = vmul.f32 1.0614054, %v1171_v14 }
  0xaa   : > { %v492_v20 = vmul.f32 1.0614054, %v1173_v17  ;;  %v1175_v36 = vpop.eup %1174 }
  0xab   : > { %v507_v21 = vmul.f32 %v1169_v1, %v503_v15  ;;  %v514_v22 = vmul.f32 %v1167_v60, %v510_v16  ;;  %v497_v23 = vadd.f32 -1.4531521, %v493_v18  ;;  %v1177_v46 = vpop.eup %1176  ;;  %v464_v16 = vmul.f32 0.5, %v1350_v49 }
  0xac   : > { %v496_v25 = vadd.f32 -1.4531521, %v492_v20  ;;  %v1179_v0 = vpop.eup %1178 }
  0xad   : > { %v511_v26 = vadd.f32 -0.28449672, %v507_v21  ;;  %v518_v27 = vadd.f32 0.2548296, %v514_v22  ;;  %v501_v29 = vmul.f32 %v1171_v14, %v497_v23  ;;  %v1181_v3 = vpop.eup %1180 }
  0xae   : > { %v500_v32 = vmul.f32 %v1173_v17, %v496_v25  ;;  %v832_v25 = vand.u32 127, %v831_v24 }
  0xaf   : > { %v515_v33 = vmul.f32 %v1169_v1, %v511_v26  ;;  %v522_v35 = vmul.f32 %v1167_v60, %v518_v27  ;;  %v505_v37 = vadd.f32 1.4214138, %v501_v29  ;;  %v810_v26 = vpop.permute.xlu1 %809  ;;  %v805_v29 = vpop.permute.xlu0 %804 }
  0xb0   : > { %v504_v39 = vadd.f32 1.4214138, %v500_v32  ;;  %vm835_vm6 = vcmp.lt.s32.totalorder %v832_v25, 64 }
  0xb1   : > { %v519_v40 = vadd.f32 0.2548296, %v515_v33  ;;  %v542_v41 = vmul.f32 %v1175_v36, %v522_v35  ;;  %v509_v42 = vmul.f32 %v1171_v14, %v505_v37 }
  0xb2   : > { %v508_v43 = vmul.f32 %v1173_v17, %v504_v39 }
  0xb3   : > { %v523_v44 = vmul.f32 %v1169_v1, %v519_v40  ;;  %v546_v45 = vsub.f32 1.0, %v542_v41  ;;  %v513_v47 = vadd.f32 -0.28449672, %v509_v42  ;;  %v820_v42 = vpop.permute.xlu1 %819 }
  0xb4   : > { %v512_v50 = vadd.f32 -0.28449672, %v508_v43 }
  0xb5   : > { %v543_v53 = vmul.f32 %v1177_v46, %v523_v44  ;;  %v554_v54 = vsub.f32 0.0, %v546_v45  ;;  %v517_v55 = vmul.f32 %v1171_v14, %v513_v47 }
  0xb6   : > { %v516_v56 = vmul.f32 %v1173_v17, %v512_v50 }
  0xb7   : > { %v547_v57 = vsub.f32 1.0, %v543_v53  ;;  %v558_v58 = vsel %vm550_vm2, %v546_v45, %v554_v54  ;;  %v521_v59 = vadd.f32 0.2548296, %v517_v55  ;;  %v815_v45 = vpop.permute.xlu0 %814 }
  0xb8   : > { %v520_v60 = vadd.f32 0.2548296, %v516_v56  ;;  %v562_v63 = vadd.f32 1.0, %v558_v58 }
  0xb9   : > { %v555_v61 = vsub.f32 0.0, %v547_v57  ;;  %v525_v62 = vmul.f32 %v1171_v14, %v521_v59 }
  0xba   : > { %v524_v1 = vmul.f32 %v1173_v17, %v520_v60  ;;  %v566_v9 = vmul.f32 %v562_v63, %v462_v4 }
  0xbb   : > { %v559_v2 = vsel %vm551_vm3, %v547_v57, %v555_v61  ;;  %v545_v31 = vmul.f32 %v1179_v0, %v525_v62 }
  0xbc   : > { %v563_v6 = vadd.f32 1.0, %v559_v2  ;;  %v544_v7 = vmul.f32 %v1181_v3, %v524_v1 }
  0xbd   : > { %v549_v8 = vsub.f32 1.0, %v545_v31 }
  0xbe   : > { %v567_v10 = vmul.f32 %v563_v6, %v463_v5  ;;  %v548_v11 = vsub.f32 1.0, %v544_v7 }
  0xbf   : > { %v557_v12 = vsub.f32 0.0, %v549_v8 }
  0xc0   : > { %v1121_v13 = vpack.c.bf16 %v567_v10, %v566_v9  ;;  %v556_v38 = vsub.f32 0.0, %v548_v11 }
  0xc1   : > { %v561_v14 = vsel %vm553_vm4, %v549_v8, %v557_v12 }
  0xc2   : > { %1122 = vmatprep.subr.bf16.mxu0 %v1121_v13  ;;  %v565_v15 = vadd.f32 1.0, %v561_v14  ;;  %v560_v34 = vsel %vm552_vm5, %v548_v11, %v556_v38 }
  0xc3   : > { %1124 = vmatpush3.bf16.msra.mxu0 %v1121_v13  ;;  %v564_v17 = vadd.f32 1.0, %v560_v34 }
  0xc4   : > { %v569_v18 = vmul.f32 %v565_v15, %v465_v28 }
  0xc5   : > { %v568_v19 = vmul.f32 %v564_v17, %v464_v16 }
  0xc7   : > { %v1125_v20 = vpack.c.bf16 %v569_v18, %v568_v19 }
  0xc9   : > { %1126 = vmatprep.subr.bf16.mxu0 %v1125_v20 }
  0xca   : > { %1128 = vmatpush3.bf16.msra.mxu0 %v1125_v20 }
  0xcd   : > { %1098 = vmatmul.mubr.msk.f32.vlgmr.msra.gmra.mrb[0].mxu0 %vm592_vm1, %v589_v51 }
  0xce   : > { %1100 = vmatprep.mubr.msk.f32.mxu0 %vm592_vm1, %v590_v52 }
  0xd1   : > { %1101 = vmatmul.mubr.msk.f32.gmra.mrb[2].mxu0 %vm592_vm1, %v591_v48 }
 0x103   : > { %v1119_v49 = vpop.f32.mrb[0].mxu1 }
 0x104   : > { %v783_v21 = vpop.f32.mrb[1].mxu1 }
 0x105   : > { %v1120_v22 = vpop.f32.mrb[2].mxu1 }
 0x106   : > { %v786_v23 = vpop.f32.mrb[3].mxu1 }
 0x1a0   : > { %v1099_v27 = vpop.f32.mrb[0].mxu0 }
 0x1a1   : > { %v787_v30 = vadd.f32 %v1099_v27, %v786_v23  ;;  %v671_v32 = vpop.f32.mrb[1].mxu0 }
 0x1a2   : > { %v784_v33 = vadd.f32 %v783_v21, %v671_v32 }
 0x1a3   : > { %v823_v35 = vadd.f32 %v810_v26, %v787_v30 }
 0x1a4   : > { %v1102_v36 = vpop.f32.mrb[2].mxu0  ;;  %v822_v37 = vadd.f32 %v805_v29, %v784_v33 }
 0x1a5   : > { %v795_v39 = vadd.f32 %v1120_v22, %v1102_v36  ;;  %v681_v40 = vpop.f32.mrb[3].mxu0  ;;  %v837_v41 = vsel %vm835_vm6, %v823_v35, 0.0  ;;  %827 = vst [vmem:[%s395_s18 + $0x8] sm:$0xff] %v823_v35 }
 0x1a6   : > { %v792_v43 = vadd.f32 %v1119_v49, %v681_v40  ;;  %842 = vadd.xlane.f32.xlu1 %v837_v41  ;;  %v836_v44 = vsel %vm835_vm6, %v822_v37, 0.0  ;;  %826 = vst [vmem:[%s395_s18] sm:$0xff] %v822_v37  ;;  %v849_v53 = vmul.f32 %v837_v41, %v837_v41 }
 0x1a7   : > { %840 = vadd.xlane.f32.xlu0 %v836_v44  ;;  %v848_v46 = vmul.f32 %v836_v44, %v836_v44  ;;  %v825_v47 = vadd.f32 %v820_v42, %v795_v39 }
 0x1a8   : > { %v824_v50 = vadd.f32 %v815_v45, %v792_v43 }
 0x1a9   : > { %829 = vst [vmem:[%s395_s18 + $0x18] sm:$0xff] %v825_v47  ;;  %v839_v56 = vsel %vm835_vm6, %v825_v47, 0.0 }
 0x1aa   : > { %828 = vst [vmem:[%s395_s18 + $0x10] sm:$0xff] %v824_v50  ;;  %852 = vadd.xlane.f32.xlu1 %v848_v46  ;;  %v838_v54 = vsel %vm835_vm6, %v824_v50, 0.0  ;;  %v851_v57 = vmul.f32 %v839_v56, %v839_v56 }
 0x1ab   : > { %854 = vadd.xlane.f32.xlu0 %v849_v53  ;;  %v850_v55 = vmul.f32 %v838_v54, %v838_v54 }
 0x1ae   : > { %856 = vadd.xlane.f32.xlu1 %v850_v55 }
 0x1af   : > { %846 = vadd.xlane.f32.xlu0 %v839_v56 }
 0x1b3   : > { %844 = vadd.xlane.f32.xlu0 %v838_v54 }
 0x1b7   : > { %858 = vadd.xlane.f32.xlu0 %v851_v57 }
 0x233   : > { %v843_v58 = vpop.xlane.xlu1 %842 }
 0x234   : > { %v841_v59 = vpop.xlane.xlu0 %840 }
 0x237   : > { %v853_v60 = vpop.xlane.xlu1 %852 }
 0x238   : > { %v861_v61 = vsel %vm860_vm7, %v841_v59, %v853_v60  ;;  %v855_v62 = vpop.xlane.xlu0 %854 }
 0x239   : > { %870 = vst.msk [vmem:[%s400_s21] sm:$0xff] %vm869_vm8, %v861_v61  ;;  %v862_v63 = vsel %vm860_vm7, %v843_v58, %v855_v62 }
 0x23a   : > { %871 = vst.msk [vmem:[%s400_s21 + $0x8] sm:$0xff] %vm869_vm8, %v862_v63 }
 0x23b   : > { %v857_v1 = vpop.xlane.xlu1 %856 }
 0x23c   : > { %v847_v0 = vpop.xlane.xlu0 %846 }
 0x240   : > { %v845_v2 = vpop.xlane.xlu0 %844 }
 0x241   : > { %v863_v3 = vsel %vm860_vm7, %v845_v2, %v857_v1 }
 0x242   : > { %872 = vst.msk [vmem:[%s400_s21 + $0x10] sm:$0xff] %vm869_vm8, %v863_v3 }
 0x244   : > { %v859_v4 = vpop.xlane.xlu0 %858 }
 0x245   : > { %v864_v5 = vsel %vm860_vm7, %v847_v0, %v859_v4 }
 0x246   : > { %873 = vst.msk [vmem:[%s400_s21 + $0x18] sm:$0xff] %vm869_vm8, %v864_v5 }
 0x247 PF: > { %s19_s29 = sadd.s32 1, %s1204_s29   ;;  %s1410_s27 = smov %s1200_s28 }
 0x248   : > { %p16_p5 = scmp.ge.s32.totalorder %s19_s29, 4   ;;  %s1411_s28 = smov %s1413_s30 }
 0x24a   :  { %18 = sbr.rel (!%p16_p5) target bundleno = 2 (0x2), region = 104 }

// kernel: fno_dse_forward.10
= control target key start
LH: loop header
LB: loop body
LE: loop exit
PB: predicated region body
PF: predicated region fallthrough
CT: control target
= control target key end

     0   :  { %v6964_v0 = vmov 0.0|0.0   ;;  %vm6965_vm0 = vmmov 0   ;;  %v6966_v8 = vmov 0.0   ;;  %vm515_vm1 = vcmask 523264   ;;  %s9110_s1 = inlined_call_operand.vmem [shape: f32[56,64,64], index: 1, kind: input, shape index: {}]   ;;  %s9111_s0 = inlined_call_operand.vmem [shape: f32[56,2,64], index: 0, kind: input, shape index: {}]   ;;  %s9112_s2 = inlined_call_operand.vmem [shape: f32[56,2,64], index: 2, kind: output, shape index: {}]  }
   0x1   :  { %6289 = vmatprep.subr.bf16.mxu0 %v6964_v0  ;;  %6301 = vmatprep.subr.bf16.mxu1 %v6964_v0  ;;  %v67_v1 = vld [vmem:[%s9110_s1] sm:$0xff]  ;;  %v68_v2 = vld [vmem:[%s9110_s1 + $0x8] sm:$0xff]  ;;  %v69_v6 = vld [vmem:[%s9110_s1 + $0x10] sm:$0xff]  ;;  %vm4604_vm2 = vcmask 517120  }
   0x2   :  { %v75_v3 = vld [vmem:[%s9110_s1 + $0x40] sm:$0xff]  ;;  %v6290_v4 = vpack.c.bf16 %v68_v2, %v67_v1  ;;  %v76_v5 = vld [vmem:[%s9110_s1 + $0x48] sm:$0xff]  ;;  %v70_v7 = vld [vmem:[%s9110_s1 + $0x18] sm:$0xff]  ;;  %5241 = vmatprep.mubr.msk.f32.mxu0 %vm6965_vm0, %v6966_v8  ;;  %5260 = vmatprep.mubr.msk.f32.mxu1 %vm6965_vm0, %v6966_v8 }
   0x3   :  { %v6302_v9 = vpack.c.bf16 %v76_v5, %v75_v3  ;;  %v77_v10 = vld [vmem:[%s9110_s1 + $0x50] sm:$0xff]  ;;  %v78_v11 = vld [vmem:[%s9110_s1 + $0x58] sm:$0xff]  ;;  %v6293_v12 = vpack.c.bf16 %v70_v7, %v69_v6  ;;  %v71_v14 = vld [vmem:[%s9110_s1 + $0x20] sm:$0xff] }
   0x4   :  { %6291 = vmatpush3.bf16.msra.mxu0 %v6290_v4  ;;  %v6305_v13 = vpack.c.bf16 %v78_v11, %v77_v10  ;;  %v72_v15 = vld [vmem:[%s9110_s1 + $0x28] sm:$0xff]  ;;  %v79_v16 = vld [vmem:[%s9110_s1 + $0x60] sm:$0xff]  ;;  %v73_v20 = vld [vmem:[%s9110_s1 + $0x30] sm:$0xff] }
   0x5   :  { %6303 = vmatpush3.bf16.msra.mxu1 %v6302_v9  ;;  %6292 = vmatprep.subr.bf16.mxu0 %v6964_v0  ;;  %v80_v17 = vld [vmem:[%s9110_s1 + $0x68] sm:$0xff]  ;;  %v6296_v18 = vpack.c.bf16 %v72_v15, %v71_v14  ;;  %v74_v21 = vld [vmem:[%s9110_s1 + $0x38] sm:$0xff]  ;;  %v81_v22 = vld [vmem:[%s9110_s1 + $0x70] sm:$0xff] }
   0x6   :  { %6304 = vmatprep.subr.bf16.mxu1 %v6964_v0  ;;  %v6308_v19 = vpack.c.bf16 %v80_v17, %v79_v16  ;;  %v82_v23 = vld [vmem:[%s9110_s1 + $0x78] sm:$0xff]  ;;  %v6299_v24 = vpack.c.bf16 %v74_v21, %v73_v20  ;;  %v83_v26 = vld [vmem:[%s9110_s1 + $0x80] sm:$0xff]  ;;  %v84_v27 = vld [vmem:[%s9110_s1 + $0x88] sm:$0xff] }
   0x7   :  { %v6311_v25 = vpack.c.bf16 %v82_v23, %v81_v22  ;;  %v91_v28 = vld [vmem:[%s9110_s1 + $0xc0] sm:$0xff]  ;;  %v92_v29 = vld [vmem:[%s9110_s1 + $0xc8] sm:$0xff]  ;;  %v6314_v31 = vpack.c.bf16 %v84_v27, %v83_v26  ;;  %v85_v34 = vld [vmem:[%s9110_s1 + $0x90] sm:$0xff] }
   0x8   :  { %6294 = vmatpush3.bf16.msra.mxu0 %v6293_v12  ;;  %v11_v30 = vld [vmem:[%s9111_s0] sm:$0x3]  ;;  %v12_v32 = vld [vmem:[%s9111_s0 + $0x2] sm:$0x3]  ;;  %v6326_v33 = vpack.c.bf16 %v92_v29, %v91_v28  ;;  %v86_v35 = vld [vmem:[%s9110_s1 + $0x98] sm:$0xff] }
   0x9   :  { %6306 = vmatpush3.bf16.msra.mxu1 %v6305_v13  ;;  %6295 = vmatprep.subr.bf16.mxu0 %v6964_v0  ;;  %v93_v36 = vld [vmem:[%s9110_s1 + $0xd0] sm:$0xff]  ;;  %v94_v37 = vld [vmem:[%s9110_s1 + $0xd8] sm:$0xff]  ;;  %v6317_v38 = vpack.c.bf16 %v86_v35, %v85_v34  ;;  %v87_v40 = vld [vmem:[%s9110_s1 + $0xa0] sm:$0xff] }
   0xa   :  { %6307 = vmatprep.subr.bf16.mxu1 %v6964_v0  ;;  %v6329_v39 = vpack.c.bf16 %v94_v37, %v93_v36  ;;  %v88_v41 = vld [vmem:[%s9110_s1 + $0xa8] sm:$0xff]  ;;  %v95_v42 = vld [vmem:[%s9110_s1 + $0xe0] sm:$0xff]  ;;  %v89_v46 = vld [vmem:[%s9110_s1 + $0xb0] sm:$0xff] }
   0xb   :  { %v96_v43 = vld [vmem:[%s9110_s1 + $0xe8] sm:$0xff]  ;;  %v6320_v44 = vpack.c.bf16 %v88_v41, %v87_v40  ;;  %v90_v47 = vld [vmem:[%s9110_s1 + $0xb8] sm:$0xff]  ;;  %v97_v48 = vld [vmem:[%s9110_s1 + $0xf0] sm:$0xff] }
   0xc   :  { %6297 = vmatpush3.bf16.msra.mxu0 %v6296_v18  ;;  %v6332_v45 = vpack.c.bf16 %v96_v43, %v95_v42  ;;  %v98_v49 = vld [vmem:[%s9110_s1 + $0xf8] sm:$0xff]  ;;  %v6323_v50 = vpack.c.bf16 %v90_v47, %v89_v46  ;;  %v99_v52 = vld [vmem:[%s9110_s1 + $0x100] sm:$0xff]  ;;  %v100_v53 = vld [vmem:[%s9110_s1 + $0x108] sm:$0xff] }
   0xd   :  { %6309 = vmatpush3.bf16.msra.mxu1 %v6308_v19  ;;  %6298 = vmatprep.subr.bf16.mxu0 %v6964_v0  ;;  %v6335_v51 = vpack.c.bf16 %v98_v49, %v97_v48  ;;  %v107_v54 = vld [vmem:[%s9110_s1 + $0x140] sm:$0xff]  ;;  %v108_v55 = vld [vmem:[%s9110_s1 + $0x148] sm:$0xff]  ;;  %v6338_v57 = vpack.c.bf16 %v100_v53, %v99_v52  ;;  %v101_v60 = vld [vmem:[%s9110_s1 + $0x110] sm:$0xff] }
   0xe   :  { %6310 = vmatprep.subr.bf16.mxu1 %v6964_v0  ;;  %v13_v56 = vld [vmem:[%s9111_s0 + $0x4] sm:$0x3]  ;;  %v14_v58 = vld [vmem:[%s9111_s0 + $0x6] sm:$0x3]  ;;  %v6350_v59 = vpack.c.bf16 %v108_v55, %v107_v54  ;;  %v102_v61 = vld [vmem:[%s9110_s1 + $0x118] sm:$0xff] }
   0xf   :  { %v109_v62 = vld [vmem:[%s9110_s1 + $0x150] sm:$0xff]  ;;  %v110_v63 = vld [vmem:[%s9110_s1 + $0x158] sm:$0xff]  ;;  %v6341_v1 = vpack.c.bf16 %v102_v61, %v101_v60  ;;  %v103_v3 = vld [vmem:[%s9110_s1 + $0x120] sm:$0xff] }
  0x10   :  { %6300 = vmatpush3.bf16.msra.mxu0 %v6299_v24  ;;  %v6353_v2 = vpack.c.bf16 %v110_v63, %v109_v62  ;;  %v104_v4 = vld [vmem:[%s9110_s1 + $0x128] sm:$0xff]  ;;  %v111_v5 = vld [vmem:[%s9110_s1 + $0x160] sm:$0xff]  ;;  %v105_v10 = vld [vmem:[%s9110_s1 + $0x130] sm:$0xff] }
  0x11   :  { %6312 = vmatpush3.bf16.msra.mxu1 %v6311_v25  ;;  %6313 = vmatprep.subr.bf16.mxu0 %v6964_v0  ;;  %v112_v6 = vld [vmem:[%s9110_s1 + $0x168] sm:$0xff]  ;;  %v6344_v7 = vpack.c.bf16 %v104_v4, %v103_v3  ;;  %v106_v11 = vld [vmem:[%s9110_s1 + $0x138] sm:$0xff]  ;;  %v113_v12 = vld [vmem:[%s9110_s1 + $0x170] sm:$0xff] }
  0x12   :  { %6325 = vmatprep.subr.bf16.mxu1 %v6964_v0  ;;  %v6356_v9 = vpack.c.bf16 %v112_v6, %v111_v5  ;;  %v114_v13 = vld [vmem:[%s9110_s1 + $0x178] sm:$0xff]  ;;  %v6347_v14 = vpack.c.bf16 %v106_v11, %v105_v10  ;;  %v115_v16 = vld [vmem:[%s9110_s1 + $0x180] sm:$0xff]  ;;  %v116_v17 = vld [vmem:[%s9110_s1 + $0x188] sm:$0xff] }
  0x13   :  { %5242 = vmatmul.mubr.msk.f32.vlgmr.msra.gmra.mrb[0].mxu0 %vm515_vm1, %v11_v30  ;;  %v6359_v15 = vpack.c.bf16 %v114_v13, %v113_v12  ;;  %v123_v18 = vld [vmem:[%s9110_s1 + $0x1c0] sm:$0xff]  ;;  %v124_v19 = vld [vmem:[%s9110_s1 + $0x1c8] sm:$0xff]  ;;  %v6362_v21 = vpack.c.bf16 %v116_v17, %v115_v16  ;;  %v117_v24 = vld [vmem:[%s9110_s1 + $0x190] sm:$0xff] }
  0x14   :  { %5261 = vmatmul.mubr.msk.f32.vlgmr.msra.gmra.mrb[0].mxu1 %vm515_vm1, %v12_v32  ;;  %6315 = vmatpush3.bf16.msra.mxu0 %v6314_v31  ;;  %v15_v20 = vld [vmem:[%s9111_s0 + $0x8] sm:$0x3]  ;;  %v16_v22 = vld [vmem:[%s9111_s0 + $0xa] sm:$0x3]  ;;  %v6374_v23 = vpack.c.bf16 %v124_v19, %v123_v18  ;;  %v118_v25 = vld [vmem:[%s9110_s1 + $0x198] sm:$0xff] }
  0x15   :  { %6327 = vmatpush3.bf16.msra.mxu1 %v6326_v33  ;;  %6316 = vmatprep.subr.bf16.mxu0 %v6964_v0  ;;  %v125_v26 = vld [vmem:[%s9110_s1 + $0x1d0] sm:$0xff]  ;;  %v126_v27 = vld [vmem:[%s9110_s1 + $0x1d8] sm:$0xff]  ;;  %v6365_v28 = vpack.c.bf16 %v118_v25, %v117_v24  ;;  %v119_v30 = vld [vmem:[%s9110_s1 + $0x1a0] sm:$0xff] }
  0x16   :  { %6328 = vmatprep.subr.bf16.mxu1 %v6964_v0  ;;  %5279 = vmatprep.mubr.msk.f32.mxu0 %vm6965_vm0, %v6966_v8  ;;  %v6377_v29 = vpack.c.bf16 %v126_v27, %v125_v26  ;;  %v120_v31 = vld [vmem:[%s9110_s1 + $0x1a8] sm:$0xff]  ;;  %v127_v32 = vld [vmem:[%s9110_s1 + $0x1e0] sm:$0xff]  ;;  %v121_v36 = vld [vmem:[%s9110_s1 + $0x1b0] sm:$0xff] }
  0x17   :  { %5298 = vmatprep.mubr.msk.f32.mxu1 %vm6965_vm0, %v6966_v8  ;;  %v128_v33 = vld [vmem:[%s9110_s1 + $0x1e8] sm:$0xff]  ;;  %v6368_v34 = vpack.c.bf16 %v120_v31, %v119_v30  ;;  %v122_v37 = vld [vmem:[%s9110_s1 + $0x1b8] sm:$0xff]  ;;  %v131_v42 = vld [vmem:[%s9110_s1 + $0x200] sm:$0xff] }
  0x18   :  { %6318 = vmatpush3.bf16.msra.mxu0 %v6317_v38  ;;  %v6380_v35 = vpack.c.bf16 %v128_v33, %v127_v32  ;;  %v129_v38 = vld [vmem:[%s9110_s1 + $0x1f0] sm:$0xff]  ;;  %v6371_v40 = vpack.c.bf16 %v122_v37, %v121_v36  ;;  %v132_v43 = vld [vmem:[%s9110_s1 + $0x208] sm:$0xff]  ;;  %v142_v53 = vld [vmem:[%s9110_s1 + $0x258] sm:$0xff] }
  0x19   :  { %6330 = vmatpush3.bf16.msra.mxu1 %v6329_v39  ;;  %6319 = vmatprep.subr.bf16.mxu0 %v6964_v0  ;;  %v130_v39 = vld [vmem:[%s9110_s1 + $0x1f8] sm:$0xff]  ;;  %v17_v46 = vld [vmem:[%s9111_s0 + $0xc] sm:$0x3]  ;;  %v6386_v47 = vpack.c.bf16 %v132_v43, %v131_v42  ;;  %v18_v48 = vld [vmem:[%s9111_s0 + $0xe] sm:$0x3] }
  0x1a   :  { %6331 = vmatprep.subr.bf16.mxu1 %v6964_v0  ;;  %v6383_v41 = vpack.c.bf16 %v130_v39, %v129_v38  ;;  %v141_v52 = vld [vmem:[%s9110_s1 + $0x250] sm:$0xff]  ;;  %v138_v63 = vld [vmem:[%s9110_s1 + $0x238] sm:$0xff]  ;;  %v147_v5 = vld [vmem:[%s9110_s1 + $0x280] sm:$0xff] }
  0x1b   :  { %v6401_v55 = vpack.c.bf16 %v142_v53, %v141_v52  ;;  %v137_v62 = vld [vmem:[%s9110_s1 + $0x230] sm:$0xff]  ;;  %v148_v6 = vld [vmem:[%s9110_s1 + $0x288] sm:$0xff]  ;;  %v158_v17 = vld [vmem:[%s9110_s1 + $0x2d8] sm:$0xff] }
  0x1c   :  { %6321 = vmatpush3.bf16.msra.mxu0 %v6320_v44  ;;  %v139_v44 = vld [vmem:[%s9110_s1 + $0x240] sm:$0xff]  ;;  %v6395_v3 = vpack.c.bf16 %v138_v63, %v137_v62  ;;  %v19_v10 = vld [vmem:[%s9111_s0 + $0x10] sm:$0x3]  ;;  %v6410_v11 = vpack.c.bf16 %v148_v6, %v147_v5  ;;  %v20_v12 = vld [vmem:[%s9111_s0 + $0x12] sm:$0x3] }
  0x1d   :  { %6333 = vmatpush3.bf16.msra.mxu1 %v6332_v45  ;;  %6322 = vmatprep.subr.bf16.mxu0 %v6964_v0  ;;  %v140_v45 = vld [vmem:[%s9110_s1 + $0x248] sm:$0xff]  ;;  %v157_v16 = vld [vmem:[%s9110_s1 + $0x2d0] sm:$0xff]  ;;  %v154_v27 = vld [vmem:[%s9110_s1 + $0x2b8] sm:$0xff] }
  0x1e   :  { %6334 = vmatprep.subr.bf16.mxu1 %v6964_v0  ;;  %v6398_v49 = vpack.c.bf16 %v140_v45, %v139_v44  ;;  %v6425_v19 = vpack.c.bf16 %v158_v17, %v157_v16  ;;  %v153_v26 = vld [vmem:[%s9110_s1 + $0x2b0] sm:$0xff]  ;;  %v163_v32 = vld [vmem:[%s9110_s1 + $0x300] sm:$0xff]  ;;  %v164_v33 = vld [vmem:[%s9110_s1 + $0x308] sm:$0xff] }
  0x1f   :  { %v6419_v30 = vpack.c.bf16 %v154_v27, %v153_v26  ;;  %v21_v36 = vld [vmem:[%s9111_s0 + $0x14] sm:$0x3]  ;;  %v6434_v37 = vpack.c.bf16 %v164_v33, %v163_v32  ;;  %v22_v38 = vld [vmem:[%s9111_s0 + $0x16] sm:$0x3]  ;;  %v174_v43 = vld [vmem:[%s9110_s1 + $0x358] sm:$0xff] }
  0x20   :  { %6324 = vmatpush3.bf16.msra.mxu0 %v6323_v50  ;;  %v133_v50 = vld [vmem:[%s9110_s1 + $0x210] sm:$0xff]  ;;  %v170_v53 = vld [vmem:[%s9110_s1 + $0x338] sm:$0xff] }
  0x21   :  { %6336 = vmatpush3.bf16.msra.mxu1 %v6335_v51  ;;  %6337 = vmatprep.subr.bf16.mxu0 %v6964_v0  ;;  %v134_v51 = vld [vmem:[%s9110_s1 + $0x218] sm:$0xff]  ;;  %v173_v42 = vld [vmem:[%s9110_s1 + $0x350] sm:$0xff] }
  0x22   :  { %6349 = vmatprep.subr.bf16.mxu1 %v6964_v0  ;;  %v6389_v54 = vpack.c.bf16 %v134_v51, %v133_v50  ;;  %v6449_v45 = vpack.c.bf16 %v174_v43, %v173_v42  ;;  %v169_v52 = vld [vmem:[%s9110_s1 + $0x330] sm:$0xff]  ;;  %v23_v62 = vld [vmem:[%s9111_s0 + $0x18] sm:$0x3]  ;;  %v25_v26 = vld [vmem:[%s9111_s0 + $0x1c] sm:$0x3] }
  0x23   :  { %5280 = vmatmul.mubr.msk.f32.vlgmr.msra.gmra.mrb[2].mxu0 %vm515_vm1, %v13_v56  ;;  %v135_v56 = vld [vmem:[%s9110_s1 + $0x220] sm:$0xff]  ;;  %v189_v5 = vld [vmem:[%s9110_s1 + $0x3d0] sm:$0xff]  ;;  %v190_v6 = vld [vmem:[%s9110_s1 + $0x3d8] sm:$0xff] }
  0x24   :  { %5299 = vmatmul.mubr.msk.f32.vlgmr.msra.gmra.mrb[2].mxu1 %vm515_vm1, %v14_v58  ;;  %6339 = vmatpush3.bf16.msra.mxu0 %v6338_v57  ;;  %v136_v57 = vld [vmem:[%s9110_s1 + $0x228] sm:$0xff]  ;;  %v143_v58 = vld [vmem:[%s9110_s1 + $0x260] sm:$0xff]  ;;  %v185_v16 = vld [vmem:[%s9110_s1 + $0x3b0] sm:$0xff] }
  0x25   :  { %6351 = vmatpush3.bf16.msra.mxu1 %v6350_v59  ;;  %6340 = vmatprep.subr.bf16.mxu0 %v6964_v0  ;;  %v144_v59 = vld [vmem:[%s9110_s1 + $0x268] sm:$0xff]  ;;  %v6392_v60 = vpack.c.bf16 %v136_v57, %v135_v56  ;;  %v6443_v56 = vpack.c.bf16 %v170_v53, %v169_v52  ;;  %v186_v17 = vld [vmem:[%s9110_s1 + $0x3b8] sm:$0xff]  ;;  %v205_v32 = vld [vmem:[%s9110_s1 + $0x450] sm:$0xff] }
  0x26   :  { %6352 = vmatprep.subr.bf16.mxu1 %v6964_v0  ;;  %5317 = vmatprep.mubr.msk.f32.mxu0 %vm6965_vm0, %v6966_v8  ;;  %v6404_v61 = vpack.c.bf16 %v144_v59, %v143_v58  ;;  %v179_v58 = vld [vmem:[%s9110_s1 + $0x380] sm:$0xff]  ;;  %v180_v59 = vld [vmem:[%s9110_s1 + $0x388] sm:$0xff]  ;;  %v206_v33 = vld [vmem:[%s9110_s1 + $0x458] sm:$0xff] }
  0x27   :  { %5336 = vmatprep.mubr.msk.f32.mxu1 %vm6965_vm0, %v6966_v8  ;;  %v6458_v63 = vpack.c.bf16 %v180_v59, %v179_v58  ;;  %v201_v42 = vld [vmem:[%s9110_s1 + $0x430] sm:$0xff]  ;;  %v202_v43 = vld [vmem:[%s9110_s1 + $0x438] sm:$0xff]  ;;  %v27_v52 = vld [vmem:[%s9111_s0 + $0x20] sm:$0x3] }
  0x28   :  { %6342 = vmatpush3.bf16.msra.mxu0 %v6341_v1  ;;  %v145_v1 = vld [vmem:[%s9110_s1 + $0x270] sm:$0xff]  ;;  %v222_v59 = vld [vmem:[%s9110_s1 + $0x4d8] sm:$0xff] }
  0x29   :  { %6354 = vmatpush3.bf16.msra.mxu1 %v6353_v2  ;;  %6343 = vmatprep.subr.bf16.mxu0 %v6964_v0  ;;  %v146_v2 = vld [vmem:[%s9110_s1 + $0x278] sm:$0xff]  ;;  %v221_v58 = vld [vmem:[%s9110_s1 + $0x4d0] sm:$0xff] }
  0x2a   :  { %6355 = vmatprep.subr.bf16.mxu1 %v6964_v0  ;;  %v6407_v4 = vpack.c.bf16 %v146_v2, %v145_v1  ;;  %v24_v1 = vld [vmem:[%s9111_s0 + $0x1a] sm:$0x3] }
  0x2c   :  { %6345 = vmatpush3.bf16.msra.mxu0 %v6344_v7  ;;  %v155_v7 = vld [vmem:[%s9110_s1 + $0x2c0] sm:$0xff] }
  0x2d   :  { %6357 = vmatpush3.bf16.msra.mxu1 %v6356_v9  ;;  %6346 = vmatprep.subr.bf16.mxu0 %v6964_v0  ;;  %v156_v9 = vld [vmem:[%s9110_s1 + $0x2c8] sm:$0xff] }
  0x2e   :  { %6358 = vmatprep.subr.bf16.mxu1 %v6964_v0  ;;  %v6422_v13 = vpack.c.bf16 %v156_v9, %v155_v7  ;;  %v6473_v9 = vpack.c.bf16 %v190_v6, %v189_v5  ;;  %v217_v5 = vld [vmem:[%s9110_s1 + $0x4b0] sm:$0xff]  ;;  %v218_v6 = vld [vmem:[%s9110_s1 + $0x4b8] sm:$0xff] }
  0x30   :  { %6348 = vmatpush3.bf16.msra.mxu0 %v6347_v14  ;;  %v149_v14 = vld [vmem:[%s9110_s1 + $0x290] sm:$0xff] }
  0x31   :  { %6360 = vmatpush3.bf16.msra.mxu1 %v6359_v15  ;;  %6361 = vmatprep.subr.bf16.mxu0 %v6964_v0  ;;  %v150_v15 = vld [vmem:[%s9110_s1 + $0x298] sm:$0xff] }
  0x32   :  { %6373 = vmatprep.subr.bf16.mxu1 %v6964_v0  ;;  %v6413_v18 = vpack.c.bf16 %v150_v15, %v149_v14 }
  0x33   :  { %5318 = vmatmul.mubr.msk.f32.vlgmr.msra.gmra.mrb[4].mxu0 %vm515_vm1, %v15_v20  ;;  %v151_v20 = vld [vmem:[%s9110_s1 + $0x2a0] sm:$0xff] }
  0x34   :  { %5337 = vmatmul.mubr.msk.f32.vlgmr.msra.gmra.mrb[4].mxu1 %vm515_vm1, %v16_v22  ;;  %6363 = vmatpush3.bf16.msra.mxu0 %v6362_v21  ;;  %v152_v21 = vld [vmem:[%s9110_s1 + $0x2a8] sm:$0xff]  ;;  %v159_v22 = vld [vmem:[%s9110_s1 + $0x2e0] sm:$0xff] }
  0x35   :  { %6375 = vmatpush3.bf16.msra.mxu1 %v6374_v23  ;;  %6364 = vmatprep.subr.bf16.mxu0 %v6964_v0  ;;  %v160_v23 = vld [vmem:[%s9110_s1 + $0x2e8] sm:$0xff]  ;;  %v6416_v24 = vpack.c.bf16 %v152_v21, %v151_v20  ;;  %v6467_v20 = vpack.c.bf16 %v186_v17, %v185_v16  ;;  %v29_v16 = vld [vmem:[%s9111_s0 + $0x24] sm:$0x3] }
  0x36   :  { %6376 = vmatprep.subr.bf16.mxu1 %v6964_v0  ;;  %5355 = vmatprep.mubr.msk.f32.mxu0 %vm6965_vm0, %v6966_v8  ;;  %v6428_v25 = vpack.c.bf16 %v160_v23, %v159_v22  ;;  %v195_v22 = vld [vmem:[%s9110_s1 + $0x400] sm:$0xff]  ;;  %v196_v23 = vld [vmem:[%s9110_s1 + $0x408] sm:$0xff] }
  0x37   :  { %5374 = vmatprep.mubr.msk.f32.mxu1 %vm6965_vm0, %v6966_v8  ;;  %v6482_v27 = vpack.c.bf16 %v196_v23, %v195_v22  ;;  %v237_v22 = vld [vmem:[%s9110_s1 + $0x550] sm:$0xff]  ;;  %v238_v23 = vld [vmem:[%s9110_s1 + $0x558] sm:$0xff] }
  0x38   :  { %6366 = vmatpush3.bf16.msra.mxu0 %v6365_v28  ;;  %v161_v28 = vld [vmem:[%s9110_s1 + $0x2f0] sm:$0xff] }
  0x39   :  { %6378 = vmatpush3.bf16.msra.mxu1 %v6377_v29  ;;  %6367 = vmatprep.subr.bf16.mxu0 %v6964_v0  ;;  %v162_v29 = vld [vmem:[%s9110_s1 + $0x2f8] sm:$0xff] }
  0x3a   :  { %6379 = vmatprep.subr.bf16.mxu1 %v6964_v0  ;;  %v6431_v31 = vpack.c.bf16 %v162_v29, %v161_v28  ;;  %v26_v28 = vld [vmem:[%s9111_s0 + $0x1e] sm:$0x3] }
  0x3c   :  { %6369 = vmatpush3.bf16.msra.mxu0 %v6368_v34  ;;  %v171_v34 = vld [vmem:[%s9110_s1 + $0x340] sm:$0xff] }
  0x3d   :  { %6381 = vmatpush3.bf16.msra.mxu1 %v6380_v35  ;;  %6370 = vmatprep.subr.bf16.mxu0 %v6964_v0  ;;  %v172_v35 = vld [vmem:[%s9110_s1 + $0x348] sm:$0xff] }
  0x3e   :  { %6382 = vmatprep.subr.bf16.mxu1 %v6964_v0  ;;  %v6446_v39 = vpack.c.bf16 %v172_v35, %v171_v34  ;;  %v6497_v35 = vpack.c.bf16 %v206_v33, %v205_v32  ;;  %v233_v32 = vld [vmem:[%s9110_s1 + $0x530] sm:$0xff]  ;;  %v234_v33 = vld [vmem:[%s9110_s1 + $0x538] sm:$0xff] }
  0x40   :  { %6372 = vmatpush3.bf16.msra.mxu0 %v6371_v40  ;;  %v165_v40 = vld [vmem:[%s9110_s1 + $0x310] sm:$0xff] }
  0x41   :  { %6384 = vmatpush3.bf16.msra.mxu1 %v6383_v41  ;;  %6385 = vmatprep.subr.bf16.mxu0 %v6964_v0  ;;  %v166_v41 = vld [vmem:[%s9110_s1 + $0x318] sm:$0xff] }
  0x42   :  { %6397 = vmatprep.subr.bf16.mxu1 %v6964_v0  ;;  %v6437_v44 = vpack.c.bf16 %v166_v41, %v165_v40 }
  0x43   :  { %5356 = vmatmul.mubr.msk.f32.vlgmr.msra.gmra.mrb[6].mxu0 %vm515_vm1, %v17_v46  ;;  %v167_v46 = vld [vmem:[%s9110_s1 + $0x320] sm:$0xff] }
  0x44   :  { %5375 = vmatmul.mubr.msk.f32.vlgmr.msra.gmra.mrb[6].mxu1 %vm515_vm1, %v18_v48  ;;  %6387 = vmatpush3.bf16.msra.mxu0 %v6386_v47  ;;  %v168_v47 = vld [vmem:[%s9110_s1 + $0x328] sm:$0xff]  ;;  %v175_v48 = vld [vmem:[%s9110_s1 + $0x360] sm:$0xff] }
  0x45   :  { %6399 = vmatpush3.bf16.msra.mxu1 %v6398_v49  ;;  %6388 = vmatprep.subr.bf16.mxu0 %v6964_v0  ;;  %v176_v49 = vld [vmem:[%s9110_s1 + $0x368] sm:$0xff]  ;;  %v6440_v50 = vpack.c.bf16 %v168_v47, %v167_v46  ;;  %v6491_v46 = vpack.c.bf16 %v202_v43, %v201_v42 }
  0x46   :  { %6400 = vmatprep.subr.bf16.mxu1 %v6964_v0  ;;  %5393 = vmatprep.mubr.msk.f32.mxu0 %vm6965_vm0, %v6966_v8  ;;  %v6452_v51 = vpack.c.bf16 %v176_v49, %v175_v48  ;;  %v211_v48 = vld [vmem:[%s9110_s1 + $0x480] sm:$0xff]  ;;  %v212_v49 = vld [vmem:[%s9110_s1 + $0x488] sm:$0xff] }
  0x47   :  { %5412 = vmatprep.mubr.msk.f32.mxu1 %vm6965_vm0, %v6966_v8  ;;  %v6506_v53 = vpack.c.bf16 %v212_v49, %v211_v48  ;;  %v31_v42 = vld [vmem:[%s9111_s0 + $0x28] sm:$0x3]  ;;  %v253_v48 = vld [vmem:[%s9110_s1 + $0x5d0] sm:$0xff]  ;;  %v254_v49 = vld [vmem:[%s9110_s1 + $0x5d8] sm:$0xff] }
  0x48   :  { %6390 = vmatpush3.bf16.msra.mxu0 %v6389_v54  ;;  %v177_v54 = vld [vmem:[%s9110_s1 + $0x370] sm:$0xff] }
  0x49   :  { %6402 = vmatpush3.bf16.msra.mxu1 %v6401_v55  ;;  %6391 = vmatprep.subr.bf16.mxu0 %v6964_v0  ;;  %v178_v55 = vld [vmem:[%s9110_s1 + $0x378] sm:$0xff] }
  0x4a   :  { %6403 = vmatprep.subr.bf16.mxu1 %v6964_v0  ;;  %v6455_v57 = vpack.c.bf16 %v178_v55, %v177_v54  ;;  %v28_v54 = vld [vmem:[%s9111_s0 + $0x22] sm:$0x3] }
  0x4c   :  { %6393 = vmatpush3.bf16.msra.mxu0 %v6392_v60  ;;  %v187_v60 = vld [vmem:[%s9110_s1 + $0x3c0] sm:$0xff] }
  0x4d   :  { %6405 = vmatpush3.bf16.msra.mxu1 %v6404_v61  ;;  %6394 = vmatprep.subr.bf16.mxu0 %v6964_v0  ;;  %v188_v61 = vld [vmem:[%s9110_s1 + $0x3c8] sm:$0xff] }
  0x4e   :  { %6406 = vmatprep.subr.bf16.mxu1 %v6964_v0  ;;  %v6470_v2 = vpack.c.bf16 %v188_v61, %v187_v60  ;;  %v6521_v61 = vpack.c.bf16 %v222_v59, %v221_v58  ;;  %v249_v58 = vld [vmem:[%s9110_s1 + $0x5b0] sm:$0xff]  ;;  %v250_v59 = vld [vmem:[%s9110_s1 + $0x5b8] sm:$0xff] }
  0x50   :  { %6396 = vmatpush3.bf16.msra.mxu0 %v6395_v3  ;;  %v181_v3 = vld [vmem:[%s9110_s1 + $0x390] sm:$0xff] }
  0x51   :  { %6408 = vmatpush3.bf16.msra.mxu1 %v6407_v4  ;;  %6409 = vmatprep.subr.bf16.mxu0 %v6964_v0  ;;  %v182_v4 = vld [vmem:[%s9110_s1 + $0x398] sm:$0xff] }
  0x52   :  { %6421 = vmatprep.subr.bf16.mxu1 %v6964_v0  ;;  %v6461_v7 = vpack.c.bf16 %v182_v4, %v181_v3 }
  0x53   :  { %5394 = vmatmul.mubr.msk.f32.vlgmr.msra.gmra.mrb[8].mxu0 %vm515_vm1, %v19_v10  ;;  %v183_v10 = vld [vmem:[%s9110_s1 + $0x3a0] sm:$0xff] }
  0x54   :  { %5413 = vmatmul.mubr.msk.f32.vlgmr.msra.gmra.mrb[8].mxu1 %vm515_vm1, %v20_v12  ;;  %6411 = vmatpush3.bf16.msra.mxu0 %v6410_v11  ;;  %v184_v11 = vld [vmem:[%s9110_s1 + $0x3a8] sm:$0xff]  ;;  %v191_v12 = vld [vmem:[%s9110_s1 + $0x3e0] sm:$0xff] }
  0x55   :  { %6423 = vmatpush3.bf16.msra.mxu1 %v6422_v13  ;;  %6412 = vmatprep.subr.bf16.mxu0 %v6964_v0  ;;  %v192_v13 = vld [vmem:[%s9110_s1 + $0x3e8] sm:$0xff]  ;;  %v6464_v14 = vpack.c.bf16 %v184_v11, %v183_v10  ;;  %v6515_v10 = vpack.c.bf16 %v218_v6, %v217_v5 }
  0x56   :  { %6424 = vmatprep.subr.bf16.mxu1 %v6964_v0  ;;  %5431 = vmatprep.mubr.msk.f32.mxu0 %vm6965_vm0, %v6966_v8  ;;  %v6476_v15 = vpack.c.bf16 %v192_v13, %v191_v12  ;;  %v227_v12 = vld [vmem:[%s9110_s1 + $0x500] sm:$0xff]  ;;  %v228_v13 = vld [vmem:[%s9110_s1 + $0x508] sm:$0xff] }
  0x57   :  { %5450 = vmatprep.mubr.msk.f32.mxu1 %vm6965_vm0, %v6966_v8  ;;  %v6530_v17 = vpack.c.bf16 %v228_v13, %v227_v12  ;;  %v33_v5 = vld [vmem:[%s9111_s0 + $0x2c] sm:$0x3]  ;;  %v269_v12 = vld [vmem:[%s9110_s1 + $0x650] sm:$0xff]  ;;  %v270_v13 = vld [vmem:[%s9110_s1 + $0x658] sm:$0xff] }
  0x58   :  { %6414 = vmatpush3.bf16.msra.mxu0 %v6413_v18  ;;  %v193_v18 = vld [vmem:[%s9110_s1 + $0x3f0] sm:$0xff] }
  0x59   :  { %6426 = vmatpush3.bf16.msra.mxu1 %v6425_v19  ;;  %6415 = vmatprep.subr.bf16.mxu0 %v6964_v0  ;;  %v194_v19 = vld [vmem:[%s9110_s1 + $0x3f8] sm:$0xff] }
  0x5a   :  { %6427 = vmatprep.subr.bf16.mxu1 %v6964_v0  ;;  %v6479_v21 = vpack.c.bf16 %v194_v19, %v193_v18  ;;  %v30_v18 = vld [vmem:[%s9111_s0 + $0x26] sm:$0x3] }
  0x5c   :  { %6417 = vmatpush3.bf16.msra.mxu0 %v6416_v24  ;;  %v203_v24 = vld [vmem:[%s9110_s1 + $0x440] sm:$0xff] }
  0x5d   :  { %6429 = vmatpush3.bf16.msra.mxu1 %v6428_v25  ;;  %6418 = vmatprep.subr.bf16.mxu0 %v6964_v0  ;;  %v204_v25 = vld [vmem:[%s9110_s1 + $0x448] sm:$0xff] }
  0x5e   :  { %6430 = vmatprep.subr.bf16.mxu1 %v6964_v0  ;;  %v6494_v29 = vpack.c.bf16 %v204_v25, %v203_v24  ;;  %v6545_v25 = vpack.c.bf16 %v238_v23, %v237_v22  ;;  %v265_v22 = vld [vmem:[%s9110_s1 + $0x630] sm:$0xff]  ;;  %v266_v23 = vld [vmem:[%s9110_s1 + $0x638] sm:$0xff] }
  0x60   :  { %6420 = vmatpush3.bf16.msra.mxu0 %v6419_v30  ;;  %v197_v30 = vld [vmem:[%s9110_s1 + $0x410] sm:$0xff] }
  0x61   :  { %6432 = vmatpush3.bf16.msra.mxu1 %v6431_v31  ;;  %6433 = vmatprep.subr.bf16.mxu0 %v6964_v0  ;;  %v198_v31 = vld [vmem:[%s9110_s1 + $0x418] sm:$0xff] }
  0x62   :  { %6445 = vmatprep.subr.bf16.mxu1 %v6964_v0  ;;  %v6485_v34 = vpack.c.bf16 %v198_v31, %v197_v30 }
  0x63   :  { %5432 = vmatmul.mubr.msk.f32.vlgmr.msra.gmra.mrb[10].mxu0 %vm515_vm1, %v21_v36  ;;  %v199_v36 = vld [vmem:[%s9110_s1 + $0x420] sm:$0xff] }
  0x64   :  { %5451 = vmatmul.mubr.msk.f32.vlgmr.msra.gmra.mrb[10].mxu1 %vm515_vm1, %v22_v38  ;;  %6435 = vmatpush3.bf16.msra.mxu0 %v6434_v37  ;;  %v200_v37 = vld [vmem:[%s9110_s1 + $0x428] sm:$0xff]  ;;  %v207_v38 = vld [vmem:[%s9110_s1 + $0x460] sm:$0xff] }
  0x65   :  { %6447 = vmatpush3.bf16.msra.mxu1 %v6446_v39  ;;  %6436 = vmatprep.subr.bf16.mxu0 %v6964_v0  ;;  %v208_v39 = vld [vmem:[%s9110_s1 + $0x468] sm:$0xff]  ;;  %v6488_v40 = vpack.c.bf16 %v200_v37, %v199_v36  ;;  %v6539_v36 = vpack.c.bf16 %v234_v33, %v233_v32  ;;  %v35_v32 = vld [vmem:[%s9111_s0 + $0x30] sm:$0x3] }
  0x66   :  { %6448 = vmatprep.subr.bf16.mxu1 %v6964_v0  ;;  %5469 = vmatprep.mubr.msk.f32.mxu0 %vm6965_vm0, %v6966_v8  ;;  %v6500_v41 = vpack.c.bf16 %v208_v39, %v207_v38  ;;  %v243_v38 = vld [vmem:[%s9110_s1 + $0x580] sm:$0xff]  ;;  %v244_v39 = vld [vmem:[%s9110_s1 + $0x588] sm:$0xff] }
  0x67   :  { %5488 = vmatprep.mubr.msk.f32.mxu1 %vm6965_vm0, %v6966_v8  ;;  %v6554_v43 = vpack.c.bf16 %v244_v39, %v243_v38  ;;  %v285_v38 = vld [vmem:[%s9110_s1 + $0x6d0] sm:$0xff]  ;;  %v286_v39 = vld [vmem:[%s9110_s1 + $0x6d8] sm:$0xff] }
  0x68   :  { %6438 = vmatpush3.bf16.msra.mxu0 %v6437_v44  ;;  %v209_v44 = vld [vmem:[%s9110_s1 + $0x470] sm:$0xff] }
  0x69   :  { %6450 = vmatpush3.bf16.msra.mxu1 %v6449_v45  ;;  %6439 = vmatprep.subr.bf16.mxu0 %v6964_v0  ;;  %v210_v45 = vld [vmem:[%s9110_s1 + $0x478] sm:$0xff] }
  0x6a   :  { %6451 = vmatprep.subr.bf16.mxu1 %v6964_v0  ;;  %v6503_v47 = vpack.c.bf16 %v210_v45, %v209_v44  ;;  %v32_v44 = vld [vmem:[%s9111_s0 + $0x2a] sm:$0x3] }
  0x6c   :  { %6441 = vmatpush3.bf16.msra.mxu0 %v6440_v50  ;;  %v219_v50 = vld [vmem:[%s9110_s1 + $0x4c0] sm:$0xff] }
  0x6d   :  { %6453 = vmatpush3.bf16.msra.mxu1 %v6452_v51  ;;  %6442 = vmatprep.subr.bf16.mxu0 %v6964_v0  ;;  %v220_v51 = vld [vmem:[%s9110_s1 + $0x4c8] sm:$0xff] }
  0x6e   :  { %6454 = vmatprep.subr.bf16.mxu1 %v6964_v0  ;;  %v6518_v55 = vpack.c.bf16 %v220_v51, %v219_v50  ;;  %v6569_v51 = vpack.c.bf16 %v254_v49, %v253_v48  ;;  %v281_v48 = vld [vmem:[%s9110_s1 + $0x6b0] sm:$0xff]  ;;  %v282_v49 = vld [vmem:[%s9110_s1 + $0x6b8] sm:$0xff] }
  0x70   :  { %6444 = vmatpush3.bf16.msra.mxu0 %v6443_v56  ;;  %v213_v56 = vld [vmem:[%s9110_s1 + $0x490] sm:$0xff] }
  0x71   :  { %6456 = vmatpush3.bf16.msra.mxu1 %v6455_v57  ;;  %6457 = vmatprep.subr.bf16.mxu0 %v6964_v0  ;;  %v214_v57 = vld [vmem:[%s9110_s1 + $0x498] sm:$0xff] }
  0x72   :  { %6469 = vmatprep.subr.bf16.mxu1 %v6964_v0  ;;  %v6509_v60 = vpack.c.bf16 %v214_v57, %v213_v56 }
  0x73   :  { %5470 = vmatmul.mubr.msk.f32.vlgmr.msra.gmra.mrb[12].mxu0 %vm515_vm1, %v23_v62  ;;  %v215_v62 = vld [vmem:[%s9110_s1 + $0x4a0] sm:$0xff] }
  0x74   :  { %5489 = vmatmul.mubr.msk.f32.vlgmr.msra.gmra.mrb[12].mxu1 %vm515_vm1, %v24_v1  ;;  %6459 = vmatpush3.bf16.msra.mxu0 %v6458_v63  ;;  %v216_v63 = vld [vmem:[%s9110_s1 + $0x4a8] sm:$0xff]  ;;  %v223_v1 = vld [vmem:[%s9110_s1 + $0x4e0] sm:$0xff] }
  0x75   :  { %6471 = vmatpush3.bf16.msra.mxu1 %v6470_v2  ;;  %6460 = vmatprep.subr.bf16.mxu0 %v6964_v0  ;;  %v224_v2 = vld [vmem:[%s9110_s1 + $0x4e8] sm:$0xff]  ;;  %v6512_v3 = vpack.c.bf16 %v216_v63, %v215_v62  ;;  %v6563_v62 = vpack.c.bf16 %v250_v59, %v249_v58  ;;  %v37_v58 = vld [vmem:[%s9111_s0 + $0x34] sm:$0x3] }
  0x76   :  { %6472 = vmatprep.subr.bf16.mxu1 %v6964_v0  ;;  %5507 = vmatprep.mubr.msk.f32.mxu0 %vm6965_vm0, %v6966_v8  ;;  %v6524_v4 = vpack.c.bf16 %v224_v2, %v223_v1  ;;  %v259_v1 = vld [vmem:[%s9110_s1 + $0x600] sm:$0xff]  ;;  %v260_v2 = vld [vmem:[%s9110_s1 + $0x608] sm:$0xff] }
  0x77   :  { %5526 = vmatprep.mubr.msk.f32.mxu1 %vm6965_vm0, %v6966_v8  ;;  %v6578_v6 = vpack.c.bf16 %v260_v2, %v259_v1  ;;  %v301_v1 = vld [vmem:[%s9110_s1 + $0x750] sm:$0xff]  ;;  %v302_v2 = vld [vmem:[%s9110_s1 + $0x758] sm:$0xff] }
  0x78   :  { %6462 = vmatpush3.bf16.msra.mxu0 %v6461_v7  ;;  %v225_v7 = vld [vmem:[%s9110_s1 + $0x4f0] sm:$0xff] }
  0x79   :  { %6474 = vmatpush3.bf16.msra.mxu1 %v6473_v9  ;;  %6463 = vmatprep.subr.bf16.mxu0 %v6964_v0  ;;  %v226_v9 = vld [vmem:[%s9110_s1 + $0x4f8] sm:$0xff] }
  0x7a   :  { %6475 = vmatprep.subr.bf16.mxu1 %v6964_v0  ;;  %v6527_v11 = vpack.c.bf16 %v226_v9, %v225_v7  ;;  %v34_v7 = vld [vmem:[%s9111_s0 + $0x2e] sm:$0x3] }
  0x7c   :  { %6465 = vmatpush3.bf16.msra.mxu0 %v6464_v14  ;;  %v235_v14 = vld [vmem:[%s9110_s1 + $0x540] sm:$0xff] }
  0x7d   :  { %6477 = vmatpush3.bf16.msra.mxu1 %v6476_v15  ;;  %6466 = vmatprep.subr.bf16.mxu0 %v6964_v0  ;;  %v236_v15 = vld [vmem:[%s9110_s1 + $0x548] sm:$0xff] }
  0x7e   :  { %6478 = vmatprep.subr.bf16.mxu1 %v6964_v0  ;;  %v6542_v19 = vpack.c.bf16 %v236_v15, %v235_v14  ;;  %v6593_v15 = vpack.c.bf16 %v270_v13, %v269_v12 }
  0x80   :  { %6468 = vmatpush3.bf16.msra.mxu0 %v6467_v20  ;;  %v229_v20 = vld [vmem:[%s9110_s1 + $0x510] sm:$0xff] }
  0x81   :  { %6480 = vmatpush3.bf16.msra.mxu1 %v6479_v21  ;;  %6481 = vmatprep.subr.bf16.mxu0 %v6964_v0  ;;  %v230_v21 = vld [vmem:[%s9110_s1 + $0x518] sm:$0xff] }
  0x82   :  { %6493 = vmatprep.subr.bf16.mxu1 %v6964_v0  ;;  %v6533_v24 = vpack.c.bf16 %v230_v21, %v229_v20 }
  0x83   :  { %5508 = vmatmul.mubr.msk.f32.vlgmr.msra.gmra.mrb[14].mxu0 %vm515_vm1, %v25_v26  ;;  %v231_v26 = vld [vmem:[%s9110_s1 + $0x520] sm:$0xff] }
  0x84   :  { %5527 = vmatmul.mubr.msk.f32.vlgmr.msra.gmra.mrb[14].mxu1 %vm515_vm1, %v26_v28  ;;  %6483 = vmatpush3.bf16.msra.mxu0 %v6482_v27  ;;  %v232_v27 = vld [vmem:[%s9110_s1 + $0x528] sm:$0xff]  ;;  %v239_v28 = vld [vmem:[%s9110_s1 + $0x560] sm:$0xff] }
  0x85   :  { %6495 = vmatpush3.bf16.msra.mxu1 %v6494_v29  ;;  %6484 = vmatprep.subr.bf16.mxu0 %v6964_v0  ;;  %v240_v29 = vld [vmem:[%s9110_s1 + $0x568] sm:$0xff]  ;;  %v6536_v30 = vpack.c.bf16 %v232_v27, %v231_v26  ;;  %v6587_v26 = vpack.c.bf16 %v266_v23, %v265_v22  ;;  %v307_v22 = vld [vmem:[%s9110_s1 + $0x780] sm:$0xff] }
  0x86   :  { %6496 = vmatprep.subr.bf16.mxu1 %v6964_v0  ;;  %5545 = vmatprep.mubr.msk.f32.mxu0 %vm6965_vm0, %v6966_v8  ;;  %v6548_v31 = vpack.c.bf16 %v240_v29, %v239_v28  ;;  %v275_v28 = vld [vmem:[%s9110_s1 + $0x680] sm:$0xff]  ;;  %v276_v29 = vld [vmem:[%s9110_s1 + $0x688] sm:$0xff] }
  0x87   :  { %5564 = vmatprep.mubr.msk.f32.mxu1 %vm6965_vm0, %v6966_v8  ;;  %v6602_v33 = vpack.c.bf16 %v276_v29, %v275_v28  ;;  %v308_v23 = vld [vmem:[%s9110_s1 + $0x788] sm:$0xff]  ;;  %v40_v28 = vld [vmem:[%s9111_s0 + $0x3a] sm:$0x3] }
  0x88   :  { %6486 = vmatpush3.bf16.msra.mxu0 %v6485_v34  ;;  %v241_v34 = vld [vmem:[%s9110_s1 + $0x570] sm:$0xff] }
  0x89   :  { %6498 = vmatpush3.bf16.msra.mxu1 %v6497_v35  ;;  %6487 = vmatprep.subr.bf16.mxu0 %v6964_v0  ;;  %v242_v35 = vld [vmem:[%s9110_s1 + $0x578] sm:$0xff] }
  0x8a   :  { %6499 = vmatprep.subr.bf16.mxu1 %v6964_v0  ;;  %v6551_v37 = vpack.c.bf16 %v242_v35, %v241_v34  ;;  %v36_v34 = vld [vmem:[%s9111_s0 + $0x32] sm:$0x3] }
  0x8c   :  { %6489 = vmatpush3.bf16.msra.mxu0 %v6488_v40  ;;  %v251_v40 = vld [vmem:[%s9110_s1 + $0x5c0] sm:$0xff] }
  0x8d   :  { %6501 = vmatpush3.bf16.msra.mxu1 %v6500_v41  ;;  %6490 = vmatprep.subr.bf16.mxu0 %v6964_v0  ;;  %v252_v41 = vld [vmem:[%s9110_s1 + $0x5c8] sm:$0xff] }
  0x8e   :  { %6502 = vmatprep.subr.bf16.mxu1 %v6964_v0  ;;  %v6566_v45 = vpack.c.bf16 %v252_v41, %v251_v40  ;;  %v6617_v41 = vpack.c.bf16 %v286_v39, %v285_v38  ;;  %v319_v39 = vld [vmem:[%s9110_s1 + $0x7e0] sm:$0xff] }
  0x90   :  { %6492 = vmatpush3.bf16.msra.mxu0 %v6491_v46  ;;  %v245_v46 = vld [vmem:[%s9110_s1 + $0x590] sm:$0xff] }
  0x91   :  { %6504 = vmatpush3.bf16.msra.mxu1 %v6503_v47  ;;  %6505 = vmatprep.subr.bf16.mxu0 %v6964_v0  ;;  %v246_v47 = vld [vmem:[%s9110_s1 + $0x598] sm:$0xff] }
  0x92   :  { %6517 = vmatprep.subr.bf16.mxu1 %v6964_v0  ;;  %v6557_v50 = vpack.c.bf16 %v246_v47, %v245_v46 }
  0x93   :  { %5546 = vmatmul.mubr.msk.f32.vlgmr.msra.gmra.mrb[16].mxu0 %vm515_vm1, %v27_v52  ;;  %v247_v52 = vld [vmem:[%s9110_s1 + $0x5a0] sm:$0xff] }
  0x94   :  { %5565 = vmatmul.mubr.msk.f32.vlgmr.msra.gmra.mrb[16].mxu1 %vm515_vm1, %v28_v54  ;;  %6507 = vmatpush3.bf16.msra.mxu0 %v6506_v53  ;;  %v248_v53 = vld [vmem:[%s9110_s1 + $0x5a8] sm:$0xff]  ;;  %v255_v54 = vld [vmem:[%s9110_s1 + $0x5e0] sm:$0xff] }
  0x95   :  { %6519 = vmatpush3.bf16.msra.mxu1 %v6518_v55  ;;  %6508 = vmatprep.subr.bf16.mxu0 %v6964_v0  ;;  %v256_v55 = vld [vmem:[%s9110_s1 + $0x5e8] sm:$0xff]  ;;  %v6560_v56 = vpack.c.bf16 %v248_v53, %v247_v52  ;;  %v6611_v52 = vpack.c.bf16 %v282_v49, %v281_v48  ;;  %v321_v48 = vld [vmem:[%s9110_s1 + $0x7f0] sm:$0xff]  ;;  %v322_v49 = vld [vmem:[%s9110_s1 + $0x7f8] sm:$0xff] }
  0x96   :  { %6520 = vmatprep.subr.bf16.mxu1 %v6964_v0  ;;  %5583 = vmatprep.mubr.msk.f32.mxu0 %vm6965_vm0, %v6966_v8  ;;  %v6572_v57 = vpack.c.bf16 %v256_v55, %v255_v54  ;;  %v291_v54 = vld [vmem:[%s9110_s1 + $0x700] sm:$0xff]  ;;  %v292_v55 = vld [vmem:[%s9110_s1 + $0x708] sm:$0xff] }
  0x97   :  { %5602 = vmatprep.mubr.msk.f32.mxu1 %vm6965_vm0, %v6966_v8  ;;  %v6626_v59 = vpack.c.bf16 %v292_v55, %v291_v54  ;;  %v331_v54 = vld [vmem:[%s9110_s1 + $0x840] sm:$0xff]  ;;  %v332_v55 = vld [vmem:[%s9110_s1 + $0x848] sm:$0xff] }
  0x98   :  { %6510 = vmatpush3.bf16.msra.mxu0 %v6509_v60  ;;  %v257_v60 = vld [vmem:[%s9110_s1 + $0x5f0] sm:$0xff] }
  0x99   :  { %6522 = vmatpush3.bf16.msra.mxu1 %v6521_v61  ;;  %6511 = vmatprep.subr.bf16.mxu0 %v6964_v0  ;;  %v258_v61 = vld [vmem:[%s9110_s1 + $0x5f8] sm:$0xff] }
  0x9a   :  { %6523 = vmatprep.subr.bf16.mxu1 %v6964_v0  ;;  %v6575_v63 = vpack.c.bf16 %v258_v61, %v257_v60  ;;  %v38_v60 = vld [vmem:[%s9111_s0 + $0x36] sm:$0x3] }
  0x9c   :  { %6513 = vmatpush3.bf16.msra.mxu0 %v6512_v3  ;;  %v267_v3 = vld [vmem:[%s9110_s1 + $0x640] sm:$0xff] }
  0x9d   :  { %6525 = vmatpush3.bf16.msra.mxu1 %v6524_v4  ;;  %6514 = vmatprep.subr.bf16.mxu0 %v6964_v0  ;;  %v268_v4 = vld [vmem:[%s9110_s1 + $0x648] sm:$0xff] }
  0x9e   :  { %6526 = vmatprep.subr.bf16.mxu1 %v6964_v0  ;;  %v6590_v9 = vpack.c.bf16 %v268_v4, %v267_v3  ;;  %v6641_v4 = vpack.c.bf16 %v302_v2, %v301_v1 }
  0xa0   :  { %6516 = vmatpush3.bf16.msra.mxu0 %v6515_v10  ;;  %v261_v10 = vld [vmem:[%s9110_s1 + $0x610] sm:$0xff] }
  0xa1   :  { %6528 = vmatpush3.bf16.msra.mxu1 %v6527_v11  ;;  %6529 = vmatprep.subr.bf16.mxu0 %v6964_v0  ;;  %v262_v11 = vld [vmem:[%s9110_s1 + $0x618] sm:$0xff] }
  0xa2   :  { %6541 = vmatprep.subr.bf16.mxu1 %v6964_v0  ;;  %v6581_v14 = vpack.c.bf16 %v262_v11, %v261_v10  ;;  %v304_v10 = vld [vmem:[%s9110_s1 + $0x768] sm:$0xff] }
  0xa3   :  { %5584 = vmatmul.mubr.msk.f32.vlgmr.msra.gmra.mrb[18].mxu0 %vm515_vm1, %v29_v16  ;;  %v263_v16 = vld [vmem:[%s9110_s1 + $0x620] sm:$0xff] }
  0xa4   :  { %5603 = vmatmul.mubr.msk.f32.vlgmr.msra.gmra.mrb[18].mxu1 %vm515_vm1, %v30_v18  ;;  %6531 = vmatpush3.bf16.msra.mxu0 %v6530_v17  ;;  %v264_v17 = vld [vmem:[%s9110_s1 + $0x628] sm:$0xff]  ;;  %v271_v18 = vld [vmem:[%s9110_s1 + $0x660] sm:$0xff] }
  0xa5   :  { %6543 = vmatpush3.bf16.msra.mxu1 %v6542_v19  ;;  %6532 = vmatprep.subr.bf16.mxu0 %v6964_v0  ;;  %v272_v19 = vld [vmem:[%s9110_s1 + $0x668] sm:$0xff]  ;;  %v6584_v20 = vpack.c.bf16 %v264_v17, %v263_v16  ;;  %v297_v16 = vld [vmem:[%s9110_s1 + $0x730] sm:$0xff]  ;;  %v298_v17 = vld [vmem:[%s9110_s1 + $0x738] sm:$0xff] }
  0xa6   :  { %6544 = vmatprep.subr.bf16.mxu1 %v6964_v0  ;;  %5621 = vmatprep.mubr.msk.f32.mxu0 %vm6965_vm0, %v6966_v8  ;;  %v6596_v21 = vpack.c.bf16 %v272_v19, %v271_v18  ;;  %v305_v18 = vld [vmem:[%s9110_s1 + $0x770] sm:$0xff]  ;;  %v306_v19 = vld [vmem:[%s9110_s1 + $0x778] sm:$0xff] }
  0xa7   :  { %5640 = vmatprep.mubr.msk.f32.mxu1 %vm6965_vm0, %v6966_v8 }
  0xa8   :  { %6534 = vmatpush3.bf16.msra.mxu0 %v6533_v24  ;;  %v273_v24 = vld [vmem:[%s9110_s1 + $0x670] sm:$0xff] }
  0xa9   :  { %6546 = vmatpush3.bf16.msra.mxu1 %v6545_v25  ;;  %6535 = vmatprep.subr.bf16.mxu0 %v6964_v0  ;;  %v274_v25 = vld [vmem:[%s9110_s1 + $0x678] sm:$0xff] }
  0xaa   :  { %6547 = vmatprep.subr.bf16.mxu1 %v6964_v0  ;;  %v6599_v27 = vpack.c.bf16 %v274_v25, %v273_v24  ;;  %v315_v24 = vld [vmem:[%s9110_s1 + $0x7c0] sm:$0xff]  ;;  %v316_v25 = vld [vmem:[%s9110_s1 + $0x7c8] sm:$0xff] }
  0xab   :  { %v6662_v29 = vpack.c.bf16 %v316_v25, %v315_v24  ;;  %v43_v24 = vld [vmem:[%s9111_s0 + $0x40] sm:$0x3] }
  0xac   :  { %6537 = vmatpush3.bf16.msra.mxu0 %v6536_v30  ;;  %v283_v30 = vld [vmem:[%s9110_s1 + $0x6c0] sm:$0xff] }
  0xad   :  { %6549 = vmatpush3.bf16.msra.mxu1 %v6548_v31  ;;  %6538 = vmatprep.subr.bf16.mxu0 %v6964_v0  ;;  %v284_v31 = vld [vmem:[%s9110_s1 + $0x6c8] sm:$0xff] }
  0xae   :  { %6550 = vmatprep.subr.bf16.mxu1 %v6964_v0  ;;  %v6614_v35 = vpack.c.bf16 %v284_v31, %v283_v30  ;;  %v309_v30 = vld [vmem:[%s9110_s1 + $0x790] sm:$0xff]  ;;  %v310_v31 = vld [vmem:[%s9110_s1 + $0x798] sm:$0xff] }
  0xb0   :  { %6540 = vmatpush3.bf16.msra.mxu0 %v6539_v36  ;;  %v277_v36 = vld [vmem:[%s9110_s1 + $0x690] sm:$0xff] }
  0xb1   :  { %6552 = vmatpush3.bf16.msra.mxu1 %v6551_v37  ;;  %6553 = vmatprep.subr.bf16.mxu0 %v6964_v0  ;;  %v278_v37 = vld [vmem:[%s9110_s1 + $0x698] sm:$0xff] }
  0xb2   :  { %6565 = vmatprep.subr.bf16.mxu1 %v6964_v0  ;;  %v6605_v40 = vpack.c.bf16 %v278_v37, %v277_v36  ;;  %v311_v36 = vld [vmem:[%s9110_s1 + $0x7a0] sm:$0xff]  ;;  %v312_v37 = vld [vmem:[%s9110_s1 + $0x7a8] sm:$0xff] }
  0xb3   :  { %5622 = vmatmul.mubr.msk.f32.vlgmr.msra.gmra.mrb[20].mxu0 %vm515_vm1, %v31_v42  ;;  %v279_v42 = vld [vmem:[%s9110_s1 + $0x6a0] sm:$0xff] }
  0xb4   :  { %5641 = vmatmul.mubr.msk.f32.vlgmr.msra.gmra.mrb[20].mxu1 %vm515_vm1, %v32_v44  ;;  %6555 = vmatpush3.bf16.msra.mxu0 %v6554_v43  ;;  %v280_v43 = vld [vmem:[%s9110_s1 + $0x6a8] sm:$0xff]  ;;  %v287_v44 = vld [vmem:[%s9110_s1 + $0x6e0] sm:$0xff] }
  0xb5   :  { %6567 = vmatpush3.bf16.msra.mxu1 %v6566_v45  ;;  %6556 = vmatprep.subr.bf16.mxu0 %v6964_v0  ;;  %v288_v45 = vld [vmem:[%s9110_s1 + $0x6e8] sm:$0xff]  ;;  %v6608_v46 = vpack.c.bf16 %v280_v43, %v279_v42 }
  0xb6   :  { %6568 = vmatprep.subr.bf16.mxu1 %v6964_v0  ;;  %5659 = vmatprep.mubr.msk.f32.mxu0 %vm6965_vm0, %v6966_v8  ;;  %v6620_v47 = vpack.c.bf16 %v288_v45, %v287_v44  ;;  %v6656_v44 = vpack.c.bf16 %v312_v37, %v311_v36  ;;  %v351_v37 = vld [vmem:[%s9110_s1 + $0x8e0] sm:$0xff] }
  0xb7   :  { %5678 = vmatprep.mubr.msk.f32.mxu1 %vm6965_vm0, %v6966_v8 }
  0xb8   :  { %6558 = vmatpush3.bf16.msra.mxu0 %v6557_v50  ;;  %v289_v50 = vld [vmem:[%s9110_s1 + $0x6f0] sm:$0xff] }
  0xb9   :  { %6570 = vmatpush3.bf16.msra.mxu1 %v6569_v51  ;;  %6559 = vmatprep.subr.bf16.mxu0 %v6964_v0  ;;  %v290_v51 = vld [vmem:[%s9110_s1 + $0x6f8] sm:$0xff] }
  0xba   :  { %6571 = vmatprep.subr.bf16.mxu1 %v6964_v0  ;;  %v6623_v53 = vpack.c.bf16 %v290_v51, %v289_v50  ;;  %v6671_v51 = vpack.c.bf16 %v322_v49, %v321_v48 }
  0xbc   :  { %6561 = vmatpush3.bf16.msra.mxu0 %v6560_v56  ;;  %v299_v56 = vld [vmem:[%s9110_s1 + $0x740] sm:$0xff] }
  0xbd   :  { %6573 = vmatpush3.bf16.msra.mxu1 %v6572_v57  ;;  %6562 = vmatprep.subr.bf16.mxu0 %v6964_v0  ;;  %v300_v57 = vld [vmem:[%s9110_s1 + $0x748] sm:$0xff] }
  0xbe   :  { %6574 = vmatprep.subr.bf16.mxu1 %v6964_v0  ;;  %v6638_v61 = vpack.c.bf16 %v300_v57, %v299_v56  ;;  %v41_v56 = vld [vmem:[%s9111_s0 + $0x3c] sm:$0x3] }
  0xc0   :  { %6564 = vmatpush3.bf16.msra.mxu0 %v6563_v62  ;;  %v293_v62 = vld [vmem:[%s9110_s1 + $0x710] sm:$0xff] }
  0xc1   :  { %6576 = vmatpush3.bf16.msra.mxu1 %v6575_v63  ;;  %6577 = vmatprep.subr.bf16.mxu0 %v6964_v0  ;;  %v294_v63 = vld [vmem:[%s9110_s1 + $0x718] sm:$0xff] }
  0xc2   :  { %6589 = vmatprep.subr.bf16.mxu1 %v6964_v0  ;;  %v6629_v3 = vpack.c.bf16 %v294_v63, %v293_v62  ;;  %v333_v62 = vld [vmem:[%s9110_s1 + $0x850] sm:$0xff]  ;;  %v334_v63 = vld [vmem:[%s9110_s1 + $0x858] sm:$0xff] }
  0xc3   :  { %5660 = vmatmul.mubr.msk.f32.vlgmr.msra.gmra.mrb[22].mxu0 %vm515_vm1, %v33_v5  ;;  %v295_v5 = vld [vmem:[%s9110_s1 + $0x720] sm:$0xff]  ;;  %v6689_v2 = vpack.c.bf16 %v334_v63, %v333_v62 }
  0xc4   :  { %5679 = vmatmul.mubr.msk.f32.vlgmr.msra.gmra.mrb[22].mxu1 %vm515_vm1, %v34_v7  ;;  %6579 = vmatpush3.bf16.msra.mxu0 %v6578_v6  ;;  %v296_v6 = vld [vmem:[%s9110_s1 + $0x728] sm:$0xff] }
  0xc5   :  { %6591 = vmatpush3.bf16.msra.mxu1 %v6590_v9  ;;  %6580 = vmatprep.subr.bf16.mxu0 %v6964_v0  ;;  %v303_v9 = vld [vmem:[%s9110_s1 + $0x760] sm:$0xff] }
  0xc6   :  { %6592 = vmatprep.subr.bf16.mxu1 %v6964_v0  ;;  %5697 = vmatprep.mubr.msk.f32.mxu0 %vm6965_vm0, %v6966_v8 }
  0xc7   :  { %5716 = vmatprep.mubr.msk.f32.mxu1 %vm6965_vm0, %v6966_v8 }
  0xc8   :  { %6582 = vmatpush3.bf16.msra.mxu0 %v6581_v14  ;;  %v6632_v14 = vpack.c.bf16 %v296_v6, %v295_v5  ;;  %v335_v6 = vld [vmem:[%s9110_s1 + $0x860] sm:$0xff] }
  0xc9   :  { %6594 = vmatpush3.bf16.msra.mxu1 %v6593_v15  ;;  %6583 = vmatprep.subr.bf16.mxu0 %v6964_v0  ;;  %v6644_v15 = vpack.c.bf16 %v304_v10, %v303_v9 }
  0xca   :  { %6595 = vmatprep.subr.bf16.mxu1 %v6964_v0 }
  0xcc   :  { %6585 = vmatpush3.bf16.msra.mxu0 %v6584_v20  ;;  %v6635_v20 = vpack.c.bf16 %v298_v17, %v297_v16  ;;  %v337_v16 = vld [vmem:[%s9110_s1 + $0x870] sm:$0xff]  ;;  %v338_v17 = vld [vmem:[%s9110_s1 + $0x878] sm:$0xff] }
  0xcd   :  { %6597 = vmatpush3.bf16.msra.mxu1 %v6596_v21  ;;  %6586 = vmatprep.subr.bf16.mxu0 %v6964_v0  ;;  %v6647_v21 = vpack.c.bf16 %v306_v19, %v305_v18  ;;  %v6695_v19 = vpack.c.bf16 %v338_v17, %v337_v16 }
  0xce   :  { %6598 = vmatprep.subr.bf16.mxu1 %v6964_v0 }
  0xd0   :  { %6588 = vmatpush3.bf16.msra.mxu0 %v6587_v26  ;;  %v39_v26 = vld [vmem:[%s9111_s0 + $0x38] sm:$0x3] }
  0xd1   :  { %6600 = vmatpush3.bf16.msra.mxu1 %v6599_v27  ;;  %6601 = vmatprep.subr.bf16.mxu0 %v6964_v0  ;;  %v6650_v27 = vpack.c.bf16 %v308_v23, %v307_v22  ;;  %v347_v22 = vld [vmem:[%s9110_s1 + $0x8c0] sm:$0xff]  ;;  %v348_v23 = vld [vmem:[%s9110_s1 + $0x8c8] sm:$0xff] }
  0xd2   :  { %6613 = vmatprep.subr.bf16.mxu1 %v6964_v0 }
  0xd3   :  { %5698 = vmatmul.mubr.msk.f32.vlgmr.msra.gmra.mrb[24].mxu0 %vm515_vm1, %v35_v32  ;;  %v317_v32 = vld [vmem:[%s9110_s1 + $0x7d0] sm:$0xff] }
  0xd4   :  { %5717 = vmatmul.mubr.msk.f32.vlgmr.msra.gmra.mrb[24].mxu1 %vm515_vm1, %v36_v34  ;;  %6603 = vmatpush3.bf16.msra.mxu0 %v6602_v33  ;;  %v318_v33 = vld [vmem:[%s9110_s1 + $0x7d8] sm:$0xff]  ;;  %v6653_v34 = vpack.c.bf16 %v310_v31, %v309_v30  ;;  %v349_v30 = vld [vmem:[%s9110_s1 + $0x8d0] sm:$0xff] }
  0xd5   :  { %6615 = vmatpush3.bf16.msra.mxu1 %v6614_v35  ;;  %6604 = vmatprep.subr.bf16.mxu0 %v6964_v0  ;;  %v6665_v35 = vpack.c.bf16 %v318_v33, %v317_v32  ;;  %v350_v31 = vld [vmem:[%s9110_s1 + $0x8d8] sm:$0xff] }
  0xd6   :  { %6616 = vmatprep.subr.bf16.mxu1 %v6964_v0  ;;  %5735 = vmatprep.mubr.msk.f32.mxu0 %vm6965_vm0, %v6966_v8  ;;  %v6713_v33 = vpack.c.bf16 %v350_v31, %v349_v30 }
  0xd7   :  { %5754 = vmatprep.mubr.msk.f32.mxu1 %vm6965_vm0, %v6966_v8 }
  0xd8   :  { %6606 = vmatpush3.bf16.msra.mxu0 %v6605_v40  ;;  %v320_v40 = vld [vmem:[%s9110_s1 + $0x7e8] sm:$0xff] }
  0xd9   :  { %6618 = vmatpush3.bf16.msra.mxu1 %v6617_v41  ;;  %6607 = vmatprep.subr.bf16.mxu0 %v6964_v0  ;;  %v6668_v45 = vpack.c.bf16 %v320_v40, %v319_v39 }
  0xda   :  { %6619 = vmatprep.subr.bf16.mxu1 %v6964_v0 }
  0xdc   :  { %6609 = vmatpush3.bf16.msra.mxu0 %v6608_v46  ;;  %v313_v46 = vld [vmem:[%s9110_s1 + $0x7b0] sm:$0xff] }
  0xdd   :  { %6621 = vmatpush3.bf16.msra.mxu1 %v6620_v47  ;;  %6610 = vmatprep.subr.bf16.mxu0 %v6964_v0  ;;  %v314_v47 = vld [vmem:[%s9110_s1 + $0x7b8] sm:$0xff] }
  0xde   :  { %6622 = vmatprep.subr.bf16.mxu1 %v6964_v0  ;;  %v6659_v50 = vpack.c.bf16 %v314_v47, %v313_v46  ;;  %v353_v46 = vld [vmem:[%s9110_s1 + $0x8f0] sm:$0xff]  ;;  %v354_v47 = vld [vmem:[%s9110_s1 + $0x8f8] sm:$0xff] }
  0xdf   :  { %v6719_v49 = vpack.c.bf16 %v354_v47, %v353_v46 }
  0xe0   :  { %6612 = vmatpush3.bf16.msra.mxu0 %v6611_v52  ;;  %v323_v52 = vld [vmem:[%s9110_s1 + $0x800] sm:$0xff] }
  0xe1   :  { %6624 = vmatpush3.bf16.msra.mxu1 %v6623_v53  ;;  %6625 = vmatprep.subr.bf16.mxu0 %v6964_v0  ;;  %v324_v53 = vld [vmem:[%s9110_s1 + $0x808] sm:$0xff] }
  0xe2   :  { %6637 = vmatprep.subr.bf16.mxu1 %v6964_v0  ;;  %v6674_v57 = vpack.c.bf16 %v324_v53, %v323_v52  ;;  %v363_v52 = vld [vmem:[%s9110_s1 + $0x940] sm:$0xff]  ;;  %v364_v53 = vld [vmem:[%s9110_s1 + $0x948] sm:$0xff] }
  0xe3   :  { %5736 = vmatmul.mubr.msk.f32.vlgmr.msra.gmra.mrb[26].mxu0 %vm515_vm1, %v37_v58  ;;  %v42_v58 = vld [vmem:[%s9111_s0 + $0x3e] sm:$0x3] }
  0xe4   :  { %5755 = vmatmul.mubr.msk.f32.vlgmr.msra.gmra.mrb[26].mxu1 %vm515_vm1, %v38_v60  ;;  %6627 = vmatpush3.bf16.msra.mxu0 %v6626_v59  ;;  %v6686_v59 = vpack.c.bf16 %v332_v55, %v331_v54  ;;  %v325_v60 = vld [vmem:[%s9110_s1 + $0x810] sm:$0xff]  ;;  %v45_v54 = vld [vmem:[%s9111_s0 + $0x44] sm:$0x3] }
  0xe5   :  { %6639 = vmatpush3.bf16.msra.mxu1 %v6638_v61  ;;  %6628 = vmatprep.subr.bf16.mxu0 %v6964_v0  ;;  %v326_v61 = vld [vmem:[%s9110_s1 + $0x818] sm:$0xff] }
  0xe6   :  { %v585_v7 = vpop.f32.mrb[0].mxu0  ;;  %6640 = vmatprep.subr.bf16.mxu1 %v6964_v0  ;;  %5773 = vmatprep.mubr.msk.f32.mxu0 %vm6965_vm0, %v6966_v8  ;;  %v6677_v1 = vpack.c.bf16 %v326_v61, %v325_v60  ;;  %v365_v60 = vld [vmem:[%s9110_s1 + $0x950] sm:$0xff]  ;;  %v366_v61 = vld [vmem:[%s9110_s1 + $0x958] sm:$0xff] }
  0xe7   :  { %4605 = vst.msk [vmem:[%s9112_s2] sm:$0x3] %vm4604_vm2, %v585_v7  ;;  %v658_v11 = vpop.f32.mrb[0].mxu1  ;;  %v5243_v12 = vpop.f32.mrb[1].mxu0  ;;  %5792 = vmatprep.mubr.msk.f32.mxu1 %vm6965_vm0, %v6966_v8  ;;  %v336_v7 = vld [vmem:[%s9110_s1 + $0x868] sm:$0xff]  ;;  %v6737_v63 = vpack.c.bf16 %v366_v61, %v365_v60 }
  0xe8   :  { %4606 = vst.msk [vmem:[%s9112_s2 + $0x2] sm:$0x3] %vm4604_vm2, %v658_v11  ;;  %v5262_v13 = vpop.f32.mrb[1].mxu1  ;;  %6630 = vmatpush3.bf16.msra.mxu0 %v6629_v3  ;;  %v327_v3 = vld [vmem:[%s9110_s1 + $0x820] sm:$0xff] }
  0xe9   :  { %6642 = vmatpush3.bf16.msra.mxu1 %v6641_v4  ;;  %6631 = vmatprep.subr.bf16.mxu0 %v6964_v0  ;;  %v328_v4 = vld [vmem:[%s9110_s1 + $0x828] sm:$0xff]  ;;  %v6692_v13 = vpack.c.bf16 %v336_v7, %v335_v6 }
  0xea   :  { %6643 = vmatprep.subr.bf16.mxu1 %v6964_v0  ;;  %v6680_v12 = vpack.c.bf16 %v328_v4, %v327_v3  ;;  %v367_v4 = vld [vmem:[%s9110_s1 + $0x960] sm:$0xff] }
  0xec   :  { %6633 = vmatpush3.bf16.msra.mxu0 %v6632_v14  ;;  %v329_v14 = vld [vmem:[%s9110_s1 + $0x830] sm:$0xff] }
  0xed   :  { %6645 = vmatpush3.bf16.msra.mxu1 %v6644_v15  ;;  %6634 = vmatprep.subr.bf16.mxu0 %v6964_v0  ;;  %v330_v15 = vld [vmem:[%s9110_s1 + $0x838] sm:$0xff] }
  0xee   :  { %6646 = vmatprep.subr.bf16.mxu1 %v6964_v0  ;;  %v6683_v18 = vpack.c.bf16 %v330_v15, %v329_v14  ;;  %v369_v14 = vld [vmem:[%s9110_s1 + $0x970] sm:$0xff]  ;;  %v370_v15 = vld [vmem:[%s9110_s1 + $0x978] sm:$0xff] }
  0xef   :  { %v6743_v17 = vpack.c.bf16 %v370_v15, %v369_v14 }
  0xf0   :  { %6636 = vmatpush3.bf16.msra.mxu0 %v6635_v20  ;;  %v339_v20 = vld [vmem:[%s9110_s1 + $0x880] sm:$0xff] }
  0xf1   :  { %6648 = vmatpush3.bf16.msra.mxu1 %v6647_v21  ;;  %6649 = vmatprep.subr.bf16.mxu0 %v6964_v0  ;;  %v340_v21 = vld [vmem:[%s9110_s1 + $0x888] sm:$0xff] }
  0xf2   :  { %6661 = vmatprep.subr.bf16.mxu1 %v6964_v0  ;;  %v6698_v25 = vpack.c.bf16 %v340_v21, %v339_v20  ;;  %v379_v20 = vld [vmem:[%s9110_s1 + $0x9c0] sm:$0xff]  ;;  %v380_v21 = vld [vmem:[%s9110_s1 + $0x9c8] sm:$0xff] }
  0xf3   :  { %5774 = vmatmul.mubr.msk.f32.vlgmr.msra.gmra.mrb[28].mxu0 %vm515_vm1, %v39_v26  ;;  %v44_v26 = vld [vmem:[%s9111_s0 + $0x42] sm:$0x3] }
  0xf4   :  { %5793 = vmatmul.mubr.msk.f32.vlgmr.msra.gmra.mrb[28].mxu1 %vm515_vm1, %v40_v28  ;;  %6651 = vmatpush3.bf16.msra.mxu0 %v6650_v27  ;;  %v6710_v27 = vpack.c.bf16 %v348_v23, %v347_v22  ;;  %v341_v28 = vld [vmem:[%s9110_s1 + $0x890] sm:$0xff]  ;;  %v47_v22 = vld [vmem:[%s9111_s0 + $0x48] sm:$0x3] }
  0xf5   :  { %6663 = vmatpush3.bf16.msra.mxu1 %v6662_v29  ;;  %6652 = vmatprep.subr.bf16.mxu0 %v6964_v0  ;;  %v342_v29 = vld [vmem:[%s9110_s1 + $0x898] sm:$0xff] }
  0xf6   :  { %v731_v38 = vpop.f32.mrb[2].mxu0  ;;  %6664 = vmatprep.subr.bf16.mxu1 %v6964_v0  ;;  %5811 = vmatprep.mubr.msk.f32.mxu0 %vm6965_vm0, %v6966_v8  ;;  %v6701_v32 = vpack.c.bf16 %v342_v29, %v341_v28  ;;  %v381_v28 = vld [vmem:[%s9110_s1 + $0x9d0] sm:$0xff]  ;;  %v382_v29 = vld [vmem:[%s9110_s1 + $0x9d8] sm:$0xff] }
  0xf7   :  { %4607 = vst.msk [vmem:[%s9112_s2 + $0x4] sm:$0x3] %vm4604_vm2, %v731_v38  ;;  %v804_v41 = vpop.f32.mrb[2].mxu1  ;;  %v5281_v42 = vpop.f32.mrb[3].mxu0  ;;  %5830 = vmatprep.mubr.msk.f32.mxu1 %vm6965_vm0, %v6966_v8  ;;  %v352_v38 = vld [vmem:[%s9110_s1 + $0x8e8] sm:$0xff]  ;;  %v6761_v31 = vpack.c.bf16 %v382_v29, %v381_v28 }
  0xf8   :  { %4608 = vst.msk [vmem:[%s9112_s2 + $0x6] sm:$0x3] %vm4604_vm2, %v804_v41  ;;  %v5300_v43 = vpop.f32.mrb[3].mxu1  ;;  %6654 = vmatpush3.bf16.msra.mxu0 %v6653_v34  ;;  %v343_v34 = vld [vmem:[%s9110_s1 + $0x8a0] sm:$0xff] }
  0xf9   :  { %6666 = vmatpush3.bf16.msra.mxu1 %v6665_v35  ;;  %6655 = vmatprep.subr.bf16.mxu0 %v6964_v0  ;;  %v344_v35 = vld [vmem:[%s9110_s1 + $0x8a8] sm:$0xff]  ;;  %v6716_v43 = vpack.c.bf16 %v352_v38, %v351_v37 }
  0xfa   :  { %6667 = vmatprep.subr.bf16.mxu1 %v6964_v0  ;;  %v6704_v42 = vpack.c.bf16 %v344_v35, %v343_v34  ;;  %v383_v35 = vld [vmem:[%s9110_s1 + $0x9e0] sm:$0xff] }
  0xfc   :  { %6657 = vmatpush3.bf16.msra.mxu0 %v6656_v44  ;;  %v345_v44 = vld [vmem:[%s9110_s1 + $0x8b0] sm:$0xff] }
  0xfd   :  { %6669 = vmatpush3.bf16.msra.mxu1 %v6668_v45  ;;  %6658 = vmatprep.subr.bf16.mxu0 %v6964_v0  ;;  %v346_v45 = vld [vmem:[%s9110_s1 + $0x8b8] sm:$0xff] }
  0xfe   :  { %6670 = vmatprep.subr.bf16.mxu1 %v6964_v0  ;;  %v6707_v48 = vpack.c.bf16 %v346_v45, %v345_v44  ;;  %v385_v44 = vld [vmem:[%s9110_s1 + $0x9f0] sm:$0xff]  ;;  %v386_v45 = vld [vmem:[%s9110_s1 + $0x9f8] sm:$0xff] }
  0xff   :  { %v6767_v47 = vpack.c.bf16 %v386_v45, %v385_v44 }
 0x100   :  { %6660 = vmatpush3.bf16.msra.mxu0 %v6659_v50  ;;  %v355_v50 = vld [vmem:[%s9110_s1 + $0x900] sm:$0xff] }
 0x101   :  { %6672 = vmatpush3.bf16.msra.mxu1 %v6671_v51  ;;  %6673 = vmatprep.subr.bf16.mxu0 %v6964_v0  ;;  %v356_v51 = vld [vmem:[%s9110_s1 + $0x908] sm:$0xff] }
 0x102   :  { %6685 = vmatprep.subr.bf16.mxu1 %v6964_v0  ;;  %v6722_v55 = vpack.c.bf16 %v356_v51, %v355_v50  ;;  %v395_v50 = vld [vmem:[%s9110_s1 + $0xa40] sm:$0xff]  ;;  %v396_v51 = vld [vmem:[%s9110_s1 + $0xa48] sm:$0xff] }
 0x103   :  { %5812 = vmatmul.mubr.msk.f32.vlgmr.msra.gmra.mrb[30].mxu0 %vm515_vm1, %v41_v56  ;;  %v46_v56 = vld [vmem:[%s9111_s0 + $0x46] sm:$0x3] }
 0x104   :  { %5831 = vmatmul.mubr.msk.f32.vlgmr.msra.gmra.mrb[30].mxu1 %vm515_vm1, %v42_v58  ;;  %6675 = vmatpush3.bf16.msra.mxu0 %v6674_v57  ;;  %v6734_v57 = vpack.c.bf16 %v364_v53, %v363_v52  ;;  %v357_v58 = vld [vmem:[%s9110_s1 + $0x910] sm:$0xff]  ;;  %v49_v52 = vld [vmem:[%s9111_s0 + $0x4c] sm:$0x3] }
 0x105   :  { %6687 = vmatpush3.bf16.msra.mxu1 %v6686_v59  ;;  %6676 = vmatprep.subr.bf16.mxu0 %v6964_v0  ;;  %v358_v59 = vld [vmem:[%s9110_s1 + $0x918] sm:$0xff] }
 0x106   :  { %v877_v5 = vpop.f32.mrb[4].mxu0  ;;  %6688 = vmatprep.subr.bf16.mxu1 %v6964_v0  ;;  %5849 = vmatprep.mubr.msk.f32.mxu0 %vm6965_vm0, %v6966_v8  ;;  %v6725_v62 = vpack.c.bf16 %v358_v59, %v357_v58  ;;  %v397_v58 = vld [vmem:[%s9110_s1 + $0xa50] sm:$0xff]  ;;  %v398_v59 = vld [vmem:[%s9110_s1 + $0xa58] sm:$0xff] }
 0x107   :  { %4609 = vst.msk [vmem:[%s9112_s2 + $0x8] sm:$0x3] %vm4604_vm2, %v877_v5  ;;  %v950_v9 = vpop.f32.mrb[4].mxu1  ;;  %v5319_v10 = vpop.f32.mrb[5].mxu0  ;;  %5868 = vmatprep.mubr.msk.f32.mxu1 %vm6965_vm0, %v6966_v8  ;;  %v368_v5 = vld [vmem:[%s9110_s1 + $0x968] sm:$0xff]  ;;  %v6785_v61 = vpack.c.bf16 %v398_v59, %v397_v58 }
 0x108   :  { %4610 = vst.msk [vmem:[%s9112_s2 + $0xa] sm:$0x3] %vm4604_vm2, %v950_v9  ;;  %v5338_v11 = vpop.f32.mrb[5].mxu1  ;;  %6678 = vmatpush3.bf16.msra.mxu0 %v6677_v1  ;;  %v359_v1 = vld [vmem:[%s9110_s1 + $0x920] sm:$0xff] }
 0x109   :  { %6690 = vmatpush3.bf16.msra.mxu1 %v6689_v2  ;;  %6679 = vmatprep.subr.bf16.mxu0 %v6964_v0  ;;  %v360_v2 = vld [vmem:[%s9110_s1 + $0x928] sm:$0xff]  ;;  %v6740_v11 = vpack.c.bf16 %v368_v5, %v367_v4 }
 0x10a   :  { %6691 = vmatprep.subr.bf16.mxu1 %v6964_v0  ;;  %v6728_v10 = vpack.c.bf16 %v360_v2, %v359_v1  ;;  %v399_v2 = vld [vmem:[%s9110_s1 + $0xa60] sm:$0xff] }
 0x10c   :  { %6681 = vmatpush3.bf16.msra.mxu0 %v6680_v12  ;;  %v361_v12 = vld [vmem:[%s9110_s1 + $0x930] sm:$0xff] }
 0x10d   :  { %6693 = vmatpush3.bf16.msra.mxu1 %v6692_v13  ;;  %6682 = vmatprep.subr.bf16.mxu0 %v6964_v0  ;;  %v362_v13 = vld [vmem:[%s9110_s1 + $0x938] sm:$0xff] }
 0x10e   :  { %6694 = vmatprep.subr.bf16.mxu1 %v6964_v0  ;;  %v6731_v16 = vpack.c.bf16 %v362_v13, %v361_v12  ;;  %v401_v12 = vld [vmem:[%s9110_s1 + $0xa70] sm:$0xff]  ;;  %v402_v13 = vld [vmem:[%s9110_s1 + $0xa78] sm:$0xff] }
 0x10f   :  { %v6791_v15 = vpack.c.bf16 %v402_v13, %v401_v12 }
 0x110   :  { %6684 = vmatpush3.bf16.msra.mxu0 %v6683_v18  ;;  %v371_v18 = vld [vmem:[%s9110_s1 + $0x980] sm:$0xff] }
 0x111   :  { %6696 = vmatpush3.bf16.msra.mxu1 %v6695_v19  ;;  %6697 = vmatprep.subr.bf16.mxu0 %v6964_v0  ;;  %v372_v19 = vld [vmem:[%s9110_s1 + $0x988] sm:$0xff] }
 0x112   :  { %6709 = vmatprep.subr.bf16.mxu1 %v6964_v0  ;;  %v6746_v23 = vpack.c.bf16 %v372_v19, %v371_v18  ;;  %v411_v18 = vld [vmem:[%s9110_s1 + $0xac0] sm:$0xff]  ;;  %v412_v19 = vld [vmem:[%s9110_s1 + $0xac8] sm:$0xff] }
 0x113   :  { %5850 = vmatmul.mubr.msk.f32.vlgmr.msra.gmra.mrb[32].mxu0 %vm515_vm1, %v43_v24  ;;  %v48_v24 = vld [vmem:[%s9111_s0 + $0x4a] sm:$0x3] }
 0x114   :  { %5869 = vmatmul.mubr.msk.f32.vlgmr.msra.gmra.mrb[32].mxu1 %vm515_vm1, %v44_v26  ;;  %6699 = vmatpush3.bf16.msra.mxu0 %v6698_v25  ;;  %v6758_v25 = vpack.c.bf16 %v380_v21, %v379_v20  ;;  %v373_v26 = vld [vmem:[%s9110_s1 + $0x990] sm:$0xff] }
 0x115   :  { %6711 = vmatpush3.bf16.msra.mxu1 %v6710_v27  ;;  %6700 = vmatprep.subr.bf16.mxu0 %v6964_v0  ;;  %v374_v27 = vld [vmem:[%s9110_s1 + $0x998] sm:$0xff]  ;;  %v51_v20 = vld [vmem:[%s9111_s0 + $0x50] sm:$0x3] }
 0x116   :  { %v1023_v36 = vpop.f32.mrb[6].mxu0  ;;  %6712 = vmatprep.subr.bf16.mxu1 %v6964_v0  ;;  %5887 = vmatprep.mubr.msk.f32.mxu0 %vm6965_vm0, %v6966_v8  ;;  %v6749_v30 = vpack.c.bf16 %v374_v27, %v373_v26  ;;  %v413_v26 = vld [vmem:[%s9110_s1 + $0xad0] sm:$0xff]  ;;  %v414_v27 = vld [vmem:[%s9110_s1 + $0xad8] sm:$0xff] }
 0x117   :  { %4611 = vst.msk [vmem:[%s9112_s2 + $0xc] sm:$0x3] %vm4604_vm2, %v1023_v36  ;;  %v1096_v39 = vpop.f32.mrb[6].mxu1  ;;  %v5357_v40 = vpop.f32.mrb[7].mxu0  ;;  %5906 = vmatprep.mubr.msk.f32.mxu1 %vm6965_vm0, %v6966_v8  ;;  %v384_v36 = vld [vmem:[%s9110_s1 + $0x9e8] sm:$0xff]  ;;  %v6809_v29 = vpack.c.bf16 %v414_v27, %v413_v26 }
 0x118   :  { %4612 = vst.msk [vmem:[%s9112_s2 + $0xe] sm:$0x3] %vm4604_vm2, %v1096_v39  ;;  %v5376_v41 = vpop.f32.mrb[7].mxu1  ;;  %6702 = vmatpush3.bf16.msra.mxu0 %v6701_v32  ;;  %v375_v32 = vld [vmem:[%s9110_s1 + $0x9a0] sm:$0xff] }
 0x119   :  { %6714 = vmatpush3.bf16.msra.mxu1 %v6713_v33  ;;  %6703 = vmatprep.subr.bf16.mxu0 %v6964_v0  ;;  %v376_v33 = vld [vmem:[%s9110_s1 + $0x9a8] sm:$0xff]  ;;  %v6764_v41 = vpack.c.bf16 %v384_v36, %v383_v35 }
 0x11a   :  { %6715 = vmatprep.subr.bf16.mxu1 %v6964_v0  ;;  %v6752_v40 = vpack.c.bf16 %v376_v33, %v375_v32  ;;  %v415_v33 = vld [vmem:[%s9110_s1 + $0xae0] sm:$0xff] }
 0x11c   :  { %6705 = vmatpush3.bf16.msra.mxu0 %v6704_v42  ;;  %v377_v42 = vld [vmem:[%s9110_s1 + $0x9b0] sm:$0xff] }
 0x11d   :  { %6717 = vmatpush3.bf16.msra.mxu1 %v6716_v43  ;;  %6706 = vmatprep.subr.bf16.mxu0 %v6964_v0  ;;  %v378_v43 = vld [vmem:[%s9110_s1 + $0x9b8] sm:$0xff] }
 0x11e   :  { %6718 = vmatprep.subr.bf16.mxu1 %v6964_v0  ;;  %v6755_v46 = vpack.c.bf16 %v378_v43, %v377_v42  ;;  %v417_v42 = vld [vmem:[%s9110_s1 + $0xaf0] sm:$0xff]  ;;  %v418_v43 = vld [vmem:[%s9110_s1 + $0xaf8] sm:$0xff] }
 0x11f   :  { %v6815_v45 = vpack.c.bf16 %v418_v43, %v417_v42 }
 0x120   :  { %6708 = vmatpush3.bf16.msra.mxu0 %v6707_v48  ;;  %v387_v48 = vld [vmem:[%s9110_s1 + $0xa00] sm:$0xff] }
 0x121   :  { %6720 = vmatpush3.bf16.msra.mxu1 %v6719_v49  ;;  %6721 = vmatprep.subr.bf16.mxu0 %v6964_v0  ;;  %v388_v49 = vld [vmem:[%s9110_s1 + $0xa08] sm:$0xff] }
 0x122   :  { %6733 = vmatprep.subr.bf16.mxu1 %v6964_v0  ;;  %v6770_v53 = vpack.c.bf16 %v388_v49, %v387_v48  ;;  %v427_v48 = vld [vmem:[%s9110_s1 + $0xb40] sm:$0xff]  ;;  %v428_v49 = vld [vmem:[%s9110_s1 + $0xb48] sm:$0xff] }
 0x123   :  { %5888 = vmatmul.mubr.msk.f32.vlgmr.msra.gmra.mrb[34].mxu0 %vm515_vm1, %v45_v54  ;;  %v50_v54 = vld [vmem:[%s9111_s0 + $0x4e] sm:$0x3] }
 0x124   :  { %5907 = vmatmul.mubr.msk.f32.vlgmr.msra.gmra.mrb[34].mxu1 %vm515_vm1, %v46_v56  ;;  %6723 = vmatpush3.bf16.msra.mxu0 %v6722_v55  ;;  %v6782_v55 = vpack.c.bf16 %v396_v51, %v395_v50  ;;  %v389_v56 = vld [vmem:[%s9110_s1 + $0xa10] sm:$0xff] }
 0x125   :  { %6735 = vmatpush3.bf16.msra.mxu1 %v6734_v57  ;;  %6724 = vmatprep.subr.bf16.mxu0 %v6964_v0  ;;  %v390_v57 = vld [vmem:[%s9110_s1 + $0xa18] sm:$0xff]  ;;  %v53_v50 = vld [vmem:[%s9111_s0 + $0x54] sm:$0x3] }
 0x126   :  { %v1169_v3 = vpop.f32.mrb[8].mxu0  ;;  %6736 = vmatprep.subr.bf16.mxu1 %v6964_v0  ;;  %5925 = vmatprep.mubr.msk.f32.mxu0 %vm6965_vm0, %v6966_v8  ;;  %v6773_v60 = vpack.c.bf16 %v390_v57, %v389_v56  ;;  %v429_v56 = vld [vmem:[%s9110_s1 + $0xb50] sm:$0xff]  ;;  %v430_v57 = vld [vmem:[%s9110_s1 + $0xb58] sm:$0xff] }
 0x127   :  { %4613 = vst.msk [vmem:[%s9112_s2 + $0x10] sm:$0x3] %vm4604_vm2, %v1169_v3  ;;  %v1242_v6 = vpop.f32.mrb[8].mxu1  ;;  %v5395_v7 = vpop.f32.mrb[9].mxu0  ;;  %5944 = vmatprep.mubr.msk.f32.mxu1 %vm6965_vm0, %v6966_v8  ;;  %v400_v3 = vld [vmem:[%s9110_s1 + $0xa68] sm:$0xff]  ;;  %v6833_v59 = vpack.c.bf16 %v430_v57, %v429_v56 }
 0x128   :  { %4614 = vst.msk [vmem:[%s9112_s2 + $0x12] sm:$0x3] %vm4604_vm2, %v1242_v6  ;;  %v5414_v9 = vpop.f32.mrb[9].mxu1  ;;  %6726 = vmatpush3.bf16.msra.mxu0 %v6725_v62  ;;  %v391_v62 = vld [vmem:[%s9110_s1 + $0xa20] sm:$0xff] }
 0x129   :  { %6738 = vmatpush3.bf16.msra.mxu1 %v6737_v63  ;;  %6727 = vmatprep.subr.bf16.mxu0 %v6964_v0  ;;  %v392_v63 = vld [vmem:[%s9110_s1 + $0xa28] sm:$0xff]  ;;  %v6788_v9 = vpack.c.bf16 %v400_v3, %v399_v2 }
 0x12a   :  { %6739 = vmatprep.subr.bf16.mxu1 %v6964_v0  ;;  %v6776_v7 = vpack.c.bf16 %v392_v63, %v391_v62  ;;  %v431_v63 = vld [vmem:[%s9110_s1 + $0xb60] sm:$0xff] }
 0x12c   :  { %6729 = vmatpush3.bf16.msra.mxu0 %v6728_v10  ;;  %v393_v10 = vld [vmem:[%s9110_s1 + $0xa30] sm:$0xff] }
 0x12d   :  { %6741 = vmatpush3.bf16.msra.mxu1 %v6740_v11  ;;  %6730 = vmatprep.subr.bf16.mxu0 %v6964_v0  ;;  %v394_v11 = vld [vmem:[%s9110_s1 + $0xa38] sm:$0xff] }
 0x12e   :  { %6742 = vmatprep.subr.bf16.mxu1 %v6964_v0  ;;  %v6779_v14 = vpack.c.bf16 %v394_v11, %v393_v10  ;;  %v433_v10 = vld [vmem:[%s9110_s1 + $0xb70] sm:$0xff]  ;;  %v434_v11 = vld [vmem:[%s9110_s1 + $0xb78] sm:$0xff] }
 0x12f   :  { %v6839_v13 = vpack.c.bf16 %v434_v11, %v433_v10 }
 0x130   :  { %6732 = vmatpush3.bf16.msra.mxu0 %v6731_v16  ;;  %v403_v16 = vld [vmem:[%s9110_s1 + $0xa80] sm:$0xff] }
 0x131   :  { %6744 = vmatpush3.bf16.msra.mxu1 %v6743_v17  ;;  %6745 = vmatprep.subr.bf16.mxu0 %v6964_v0  ;;  %v404_v17 = vld [vmem:[%s9110_s1 + $0xa88] sm:$0xff] }
 0x132   :  { %6757 = vmatprep.subr.bf16.mxu1 %v6964_v0  ;;  %v6794_v21 = vpack.c.bf16 %v404_v17, %v403_v16  ;;  %v443_v16 = vld [vmem:[%s9110_s1 + $0xbc0] sm:$0xff]  ;;  %v444_v17 = vld [vmem:[%s9110_s1 + $0xbc8] sm:$0xff] }
 0x133   :  { %5926 = vmatmul.mubr.msk.f32.vlgmr.msra.gmra.mrb[36].mxu0 %vm515_vm1, %v47_v22  ;;  %v52_v22 = vld [vmem:[%s9111_s0 + $0x52] sm:$0x3] }
 0x134   :  { %5945 = vmatmul.mubr.msk.f32.vlgmr.msra.gmra.mrb[36].mxu1 %vm515_vm1, %v48_v24  ;;  %6747 = vmatpush3.bf16.msra.mxu0 %v6746_v23  ;;  %v6806_v23 = vpack.c.bf16 %v412_v19, %v411_v18  ;;  %v405_v24 = vld [vmem:[%s9110_s1 + $0xa90] sm:$0xff]  ;;  %v55_v18 = vld [vmem:[%s9111_s0 + $0x58] sm:$0x3] }
 0x135   :  { %6759 = vmatpush3.bf16.msra.mxu1 %v6758_v25  ;;  %6748 = vmatprep.subr.bf16.mxu0 %v6964_v0  ;;  %v406_v25 = vld [vmem:[%s9110_s1 + $0xa98] sm:$0xff] }
 0x136   :  { %v1315_v34 = vpop.f32.mrb[10].mxu0  ;;  %6760 = vmatprep.subr.bf16.mxu1 %v6964_v0  ;;  %5963 = vmatprep.mubr.msk.f32.mxu0 %vm6965_vm0, %v6966_v8  ;;  %v6797_v28 = vpack.c.bf16 %v406_v25, %v405_v24  ;;  %v445_v24 = vld [vmem:[%s9110_s1 + $0xbd0] sm:$0xff]  ;;  %v446_v25 = vld [vmem:[%s9110_s1 + $0xbd8] sm:$0xff] }
 0x137   :  { %4615 = vst.msk [vmem:[%s9112_s2 + $0x14] sm:$0x3] %vm4604_vm2, %v1315_v34  ;;  %v1388_v37 = vpop.f32.mrb[10].mxu1  ;;  %v5433_v38 = vpop.f32.mrb[11].mxu0  ;;  %5982 = vmatprep.mubr.msk.f32.mxu1 %vm6965_vm0, %v6966_v8  ;;  %v416_v34 = vld [vmem:[%s9110_s1 + $0xae8] sm:$0xff]  ;;  %v6857_v27 = vpack.c.bf16 %v446_v25, %v445_v24 }
 0x138   :  { %4616 = vst.msk [vmem:[%s9112_s2 + $0x16] sm:$0x3] %vm4604_vm2, %v1388_v37  ;;  %v5452_v39 = vpop.f32.mrb[11].mxu1  ;;  %6750 = vmatpush3.bf16.msra.mxu0 %v6749_v30  ;;  %v407_v30 = vld [vmem:[%s9110_s1 + $0xaa0] sm:$0xff] }
 0x139   :  { %6762 = vmatpush3.bf16.msra.mxu1 %v6761_v31  ;;  %6751 = vmatprep.subr.bf16.mxu0 %v6964_v0  ;;  %v408_v31 = vld [vmem:[%s9110_s1 + $0xaa8] sm:$0xff]  ;;  %v6812_v39 = vpack.c.bf16 %v416_v34, %v415_v33 }
 0x13a   :  { %6763 = vmatprep.subr.bf16.mxu1 %v6964_v0  ;;  %v6800_v38 = vpack.c.bf16 %v408_v31, %v407_v30  ;;  %v447_v31 = vld [vmem:[%s9110_s1 + $0xbe0] sm:$0xff] }
 0x13c   :  { %6753 = vmatpush3.bf16.msra.mxu0 %v6752_v40  ;;  %v409_v40 = vld [vmem:[%s9110_s1 + $0xab0] sm:$0xff] }
 0x13d   :  { %6765 = vmatpush3.bf16.msra.mxu1 %v6764_v41  ;;  %6754 = vmatprep.subr.bf16.mxu0 %v6964_v0  ;;  %v410_v41 = vld [vmem:[%s9110_s1 + $0xab8] sm:$0xff] }
 0x13e   :  { %6766 = vmatprep.subr.bf16.mxu1 %v6964_v0  ;;  %v6803_v44 = vpack.c.bf16 %v410_v41, %v409_v40  ;;  %v449_v40 = vld [vmem:[%s9110_s1 + $0xbf0] sm:$0xff]  ;;  %v450_v41 = vld [vmem:[%s9110_s1 + $0xbf8] sm:$0xff] }
 0x13f   :  { %v6863_v43 = vpack.c.bf16 %v450_v41, %v449_v40 }
 0x140   :  { %6756 = vmatpush3.bf16.msra.mxu0 %v6755_v46  ;;  %v419_v46 = vld [vmem:[%s9110_s1 + $0xb00] sm:$0xff] }
 0x141   :  { %6768 = vmatpush3.bf16.msra.mxu1 %v6767_v47  ;;  %6769 = vmatprep.subr.bf16.mxu0 %v6964_v0  ;;  %v420_v47 = vld [vmem:[%s9110_s1 + $0xb08] sm:$0xff] }
 0x142   :  { %6781 = vmatprep.subr.bf16.mxu1 %v6964_v0  ;;  %v6818_v51 = vpack.c.bf16 %v420_v47, %v419_v46  ;;  %v459_v46 = vld [vmem:[%s9110_s1 + $0xc40] sm:$0xff]  ;;  %v460_v47 = vld [vmem:[%s9110_s1 + $0xc48] sm:$0xff] }
 0x143   :  { %5964 = vmatmul.mubr.msk.f32.vlgmr.msra.gmra.mrb[38].mxu0 %vm515_vm1, %v49_v52  ;;  %v54_v52 = vld [vmem:[%s9111_s0 + $0x56] sm:$0x3] }
 0x144   :  { %5983 = vmatmul.mubr.msk.f32.vlgmr.msra.gmra.mrb[38].mxu1 %vm515_vm1, %v50_v54  ;;  %6771 = vmatpush3.bf16.msra.mxu0 %v6770_v53  ;;  %v6830_v53 = vpack.c.bf16 %v428_v49, %v427_v48  ;;  %v421_v54 = vld [vmem:[%s9110_s1 + $0xb10] sm:$0xff]  ;;  %v57_v48 = vld [vmem:[%s9111_s0 + $0x5c] sm:$0x3] }
 0x145   :  { %6783 = vmatpush3.bf16.msra.mxu1 %v6782_v55  ;;  %6772 = vmatprep.subr.bf16.mxu0 %v6964_v0  ;;  %v422_v55 = vld [vmem:[%s9110_s1 + $0xb18] sm:$0xff] }
 0x146   :  { %v1461_v1 = vpop.f32.mrb[12].mxu0  ;;  %6784 = vmatprep.subr.bf16.mxu1 %v6964_v0  ;;  %6001 = vmatprep.mubr.msk.f32.mxu0 %vm6965_vm0, %v6966_v8  ;;  %v6821_v58 = vpack.c.bf16 %v422_v55, %v421_v54  ;;  %v461_v54 = vld [vmem:[%s9110_s1 + $0xc50] sm:$0xff]  ;;  %v462_v55 = vld [vmem:[%s9110_s1 + $0xc58] sm:$0xff] }
 0x147   :  { %4617 = vst.msk [vmem:[%s9112_s2 + $0x18] sm:$0x3] %vm4604_vm2, %v1461_v1  ;;  %v1534_v4 = vpop.f32.mrb[12].mxu1  ;;  %v5471_v5 = vpop.f32.mrb[13].mxu0  ;;  %6020 = vmatprep.mubr.msk.f32.mxu1 %vm6965_vm0, %v6966_v8  ;;  %v432_v1 = vld [vmem:[%s9110_s1 + $0xb68] sm:$0xff]  ;;  %v6881_v57 = vpack.c.bf16 %v462_v55, %v461_v54 }
 0x148   :  { %4618 = vst.msk [vmem:[%s9112_s2 + $0x1a] sm:$0x3] %vm4604_vm2, %v1534_v4  ;;  %v5490_v6 = vpop.f32.mrb[13].mxu1  ;;  %6774 = vmatpush3.bf16.msra.mxu0 %v6773_v60  ;;  %v423_v60 = vld [vmem:[%s9110_s1 + $0xb20] sm:$0xff] }
 0x149   :  { %6786 = vmatpush3.bf16.msra.mxu1 %v6785_v61  ;;  %6775 = vmatprep.subr.bf16.mxu0 %v6964_v0  ;;  %v424_v61 = vld [vmem:[%s9110_s1 + $0xb28] sm:$0xff]  ;;  %v6836_v6 = vpack.c.bf16 %v432_v1, %v431_v63 }
 0x14a   :  { %6787 = vmatprep.subr.bf16.mxu1 %v6964_v0  ;;  %v6824_v5 = vpack.c.bf16 %v424_v61, %v423_v60  ;;  %v463_v61 = vld [vmem:[%s9110_s1 + $0xc60] sm:$0xff] }
 0x14c   :  { %6777 = vmatpush3.bf16.msra.mxu0 %v6776_v7  ;;  %v425_v7 = vld [vmem:[%s9110_s1 + $0xb30] sm:$0xff] }
 0x14d   :  { %6789 = vmatpush3.bf16.msra.mxu1 %v6788_v9  ;;  %6778 = vmatprep.subr.bf16.mxu0 %v6964_v0  ;;  %v426_v9 = vld [vmem:[%s9110_s1 + $0xb38] sm:$0xff] }
 0x14e   :  { %6790 = vmatprep.subr.bf16.mxu1 %v6964_v0  ;;  %v6827_v12 = vpack.c.bf16 %v426_v9, %v425_v7  ;;  %v465_v7 = vld [vmem:[%s9110_s1 + $0xc70] sm:$0xff]  ;;  %v466_v9 = vld [vmem:[%s9110_s1 + $0xc78] sm:$0xff] }
 0x14f   :  { %v6887_v11 = vpack.c.bf16 %v466_v9, %v465_v7 }
 0x150   :  { %6780 = vmatpush3.bf16.msra.mxu0 %v6779_v14  ;;  %v435_v14 = vld [vmem:[%s9110_s1 + $0xb80] sm:$0xff] }
 0x151   :  { %6792 = vmatpush3.bf16.msra.mxu1 %v6791_v15  ;;  %6793 = vmatprep.subr.bf16.mxu0 %v6964_v0  ;;  %v436_v15 = vld [vmem:[%s9110_s1 + $0xb88] sm:$0xff] }
 0x152   :  { %6805 = vmatprep.subr.bf16.mxu1 %v6964_v0  ;;  %v6842_v19 = vpack.c.bf16 %v436_v15, %v435_v14  ;;  %v475_v14 = vld [vmem:[%s9110_s1 + $0xcc0] sm:$0xff]  ;;  %v476_v15 = vld [vmem:[%s9110_s1 + $0xcc8] sm:$0xff] }
 0x153   :  { %6002 = vmatmul.mubr.msk.f32.vlgmr.msra.gmra.mrb[40].mxu0 %vm515_vm1, %v51_v20  ;;  %v56_v20 = vld [vmem:[%s9111_s0 + $0x5a] sm:$0x3] }
 0x154   :  { %6021 = vmatmul.mubr.msk.f32.vlgmr.msra.gmra.mrb[40].mxu1 %vm515_vm1, %v52_v22  ;;  %6795 = vmatpush3.bf16.msra.mxu0 %v6794_v21  ;;  %v6854_v21 = vpack.c.bf16 %v444_v17, %v443_v16  ;;  %v437_v22 = vld [vmem:[%s9110_s1 + $0xb90] sm:$0xff]  ;;  %v59_v16 = vld [vmem:[%s9111_s0 + $0x60] sm:$0x3] }
 0x155   :  { %6807 = vmatpush3.bf16.msra.mxu1 %v6806_v23  ;;  %6796 = vmatprep.subr.bf16.mxu0 %v6964_v0  ;;  %v438_v23 = vld [vmem:[%s9110_s1 + $0xb98] sm:$0xff] }
 0x156   :  { %v1607_v32 = vpop.f32.mrb[14].mxu0  ;;  %6808 = vmatprep.subr.bf16.mxu1 %v6964_v0  ;;  %6039 = vmatprep.mubr.msk.f32.mxu0 %vm6965_vm0, %v6966_v8  ;;  %v6845_v26 = vpack.c.bf16 %v438_v23, %v437_v22  ;;  %v477_v22 = vld [vmem:[%s9110_s1 + $0xcd0] sm:$0xff]  ;;  %v478_v23 = vld [vmem:[%s9110_s1 + $0xcd8] sm:$0xff] }
 0x157   :  { %4619 = vst.msk [vmem:[%s9112_s2 + $0x1c] sm:$0x3] %vm4604_vm2, %v1607_v32  ;;  %v1680_v35 = vpop.f32.mrb[14].mxu1  ;;  %v5509_v36 = vpop.f32.mrb[15].mxu0  ;;  %6058 = vmatprep.mubr.msk.f32.mxu1 %vm6965_vm0, %v6966_v8  ;;  %v448_v32 = vld [vmem:[%s9110_s1 + $0xbe8] sm:$0xff]  ;;  %v6905_v25 = vpack.c.bf16 %v478_v23, %v477_v22 }
 0x158   :  { %4620 = vst.msk [vmem:[%s9112_s2 + $0x1e] sm:$0x3] %vm4604_vm2, %v1680_v35  ;;  %v5528_v37 = vpop.f32.mrb[15].mxu1  ;;  %6798 = vmatpush3.bf16.msra.mxu0 %v6797_v28  ;;  %v439_v28 = vld [vmem:[%s9110_s1 + $0xba0] sm:$0xff] }
 0x159   :  { %6810 = vmatpush3.bf16.msra.mxu1 %v6809_v29  ;;  %6799 = vmatprep.subr.bf16.mxu0 %v6964_v0  ;;  %v440_v29 = vld [vmem:[%s9110_s1 + $0xba8] sm:$0xff]  ;;  %v6860_v37 = vpack.c.bf16 %v448_v32, %v447_v31 }
 0x15a   :  { %6811 = vmatprep.subr.bf16.mxu1 %v6964_v0  ;;  %v6848_v36 = vpack.c.bf16 %v440_v29, %v439_v28  ;;  %v479_v29 = vld [vmem:[%s9110_s1 + $0xce0] sm:$0xff] }
 0x15c   :  { %6801 = vmatpush3.bf16.msra.mxu0 %v6800_v38  ;;  %v441_v38 = vld [vmem:[%s9110_s1 + $0xbb0] sm:$0xff] }
 0x15d   :  { %6813 = vmatpush3.bf16.msra.mxu1 %v6812_v39  ;;  %6802 = vmatprep.subr.bf16.mxu0 %v6964_v0  ;;  %v442_v39 = vld [vmem:[%s9110_s1 + $0xbb8] sm:$0xff] }
 0x15e   :  { %6814 = vmatprep.subr.bf16.mxu1 %v6964_v0  ;;  %v6851_v42 = vpack.c.bf16 %v442_v39, %v441_v38  ;;  %v481_v38 = vld [vmem:[%s9110_s1 + $0xcf0] sm:$0xff]  ;;  %v482_v39 = vld [vmem:[%s9110_s1 + $0xcf8] sm:$0xff] }
 0x15f   :  { %v6911_v41 = vpack.c.bf16 %v482_v39, %v481_v38  ;;  %v65_v39 = vld [vmem:[%s9111_s0 + $0x6c] sm:$0x3] }
 0x160   :  { %6804 = vmatpush3.bf16.msra.mxu0 %v6803_v44  ;;  %v451_v44 = vld [vmem:[%s9110_s1 + $0xc00] sm:$0xff] }
 0x161   :  { %6816 = vmatpush3.bf16.msra.mxu1 %v6815_v45  ;;  %6817 = vmatprep.subr.bf16.mxu0 %v6964_v0  ;;  %v452_v45 = vld [vmem:[%s9110_s1 + $0xc08] sm:$0xff] }
 0x162   :  { %6829 = vmatprep.subr.bf16.mxu1 %v6964_v0  ;;  %v6866_v49 = vpack.c.bf16 %v452_v45, %v451_v44  ;;  %v491_v44 = vld [vmem:[%s9110_s1 + $0xd40] sm:$0xff]  ;;  %v492_v45 = vld [vmem:[%s9110_s1 + $0xd48] sm:$0xff] }
 0x163   :  { %6040 = vmatmul.mubr.msk.f32.vlgmr.msra.gmra.mrb[42].mxu0 %vm515_vm1, %v53_v50  ;;  %v58_v50 = vld [vmem:[%s9111_s0 + $0x5e] sm:$0x3] }
 0x164   :  { %6059 = vmatmul.mubr.msk.f32.vlgmr.msra.gmra.mrb[42].mxu1 %vm515_vm1, %v54_v52  ;;  %6819 = vmatpush3.bf16.msra.mxu0 %v6818_v51  ;;  %v6878_v51 = vpack.c.bf16 %v460_v47, %v459_v46  ;;  %v453_v52 = vld [vmem:[%s9110_s1 + $0xc10] sm:$0xff]  ;;  %v61_v46 = vld [vmem:[%s9111_s0 + $0x64] sm:$0x3] }
 0x165   :  { %6831 = vmatpush3.bf16.msra.mxu1 %v6830_v53  ;;  %6820 = vmatprep.subr.bf16.mxu0 %v6964_v0  ;;  %v454_v53 = vld [vmem:[%s9110_s1 + $0xc18] sm:$0xff] }
 0x166   :  { %v1753_v62 = vpop.f32.mrb[16].mxu0  ;;  %6832 = vmatprep.subr.bf16.mxu1 %v6964_v0  ;;  %6077 = vmatprep.mubr.msk.f32.mxu0 %vm6965_vm0, %v6966_v8  ;;  %v6869_v56 = vpack.c.bf16 %v454_v53, %v453_v52  ;;  %v493_v52 = vld [vmem:[%s9110_s1 + $0xd50] sm:$0xff]  ;;  %v494_v53 = vld [vmem:[%s9110_s1 + $0xd58] sm:$0xff] }
 0x167   :  { %4621 = vst.msk [vmem:[%s9112_s2 + $0x20] sm:$0x3] %vm4604_vm2, %v1753_v62  ;;  %v1826_v2 = vpop.f32.mrb[16].mxu1  ;;  %v5547_v3 = vpop.f32.mrb[17].mxu0  ;;  %6096 = vmatprep.mubr.msk.f32.mxu1 %vm6965_vm0, %v6966_v8  ;;  %v464_v62 = vld [vmem:[%s9110_s1 + $0xc68] sm:$0xff]  ;;  %v6929_v55 = vpack.c.bf16 %v494_v53, %v493_v52 }
 0x168   :  { %4622 = vst.msk [vmem:[%s9112_s2 + $0x22] sm:$0x3] %vm4604_vm2, %v1826_v2  ;;  %v5566_v4 = vpop.f32.mrb[17].mxu1  ;;  %6822 = vmatpush3.bf16.msra.mxu0 %v6821_v58  ;;  %v455_v58 = vld [vmem:[%s9110_s1 + $0xc20] sm:$0xff] }
 0x169   :  { %6834 = vmatpush3.bf16.msra.mxu1 %v6833_v59  ;;  %6823 = vmatprep.subr.bf16.mxu0 %v6964_v0  ;;  %v456_v59 = vld [vmem:[%s9110_s1 + $0xc28] sm:$0xff]  ;;  %v6884_v4 = vpack.c.bf16 %v464_v62, %v463_v61 }
 0x16a   :  { %6835 = vmatprep.subr.bf16.mxu1 %v6964_v0  ;;  %v6872_v3 = vpack.c.bf16 %v456_v59, %v455_v58  ;;  %v495_v59 = vld [vmem:[%s9110_s1 + $0xd60] sm:$0xff] }
 0x16c   :  { %6825 = vmatpush3.bf16.msra.mxu0 %v6824_v5  ;;  %v457_v5 = vld [vmem:[%s9110_s1 + $0xc30] sm:$0xff] }
 0x16d   :  { %6837 = vmatpush3.bf16.msra.mxu1 %v6836_v6  ;;  %6826 = vmatprep.subr.bf16.mxu0 %v6964_v0  ;;  %v458_v6 = vld [vmem:[%s9110_s1 + $0xc38] sm:$0xff] }
 0x16e   :  { %6838 = vmatprep.subr.bf16.mxu1 %v6964_v0  ;;  %v6875_v10 = vpack.c.bf16 %v458_v6, %v457_v5  ;;  %v497_v5 = vld [vmem:[%s9110_s1 + $0xd70] sm:$0xff]  ;;  %v498_v6 = vld [vmem:[%s9110_s1 + $0xd78] sm:$0xff] }
 0x16f   :  { %v6935_v9 = vpack.c.bf16 %v498_v6, %v497_v5 }
 0x170   :  { %6828 = vmatpush3.bf16.msra.mxu0 %v6827_v12  ;;  %v467_v12 = vld [vmem:[%s9110_s1 + $0xc80] sm:$0xff] }
 0x171   :  { %6840 = vmatpush3.bf16.msra.mxu1 %v6839_v13  ;;  %6841 = vmatprep.subr.bf16.mxu0 %v6964_v0  ;;  %v468_v13 = vld [vmem:[%s9110_s1 + $0xc88] sm:$0xff] }
 0x172   :  { %6853 = vmatprep.subr.bf16.mxu1 %v6964_v0  ;;  %v6890_v17 = vpack.c.bf16 %v468_v13, %v467_v12  ;;  %v507_v12 = vld [vmem:[%s9110_s1 + $0xdc0] sm:$0xff]  ;;  %v508_v13 = vld [vmem:[%s9110_s1 + $0xdc8] sm:$0xff] }
 0x173   :  { %6078 = vmatmul.mubr.msk.f32.vlgmr.msra.gmra.mrb[44].mxu0 %vm515_vm1, %v55_v18  ;;  %v60_v18 = vld [vmem:[%s9111_s0 + $0x62] sm:$0x3] }
 0x174   :  { %6097 = vmatmul.mubr.msk.f32.vlgmr.msra.gmra.mrb[44].mxu1 %vm515_vm1, %v56_v20  ;;  %6843 = vmatpush3.bf16.msra.mxu0 %v6842_v19  ;;  %v6902_v19 = vpack.c.bf16 %v476_v15, %v475_v14  ;;  %v469_v20 = vld [vmem:[%s9110_s1 + $0xc90] sm:$0xff]  ;;  %v63_v14 = vld [vmem:[%s9111_s0 + $0x68] sm:$0x3] }
 0x175   :  { %6855 = vmatpush3.bf16.msra.mxu1 %v6854_v21  ;;  %6844 = vmatprep.subr.bf16.mxu0 %v6964_v0  ;;  %v470_v21 = vld [vmem:[%s9110_s1 + $0xc98] sm:$0xff] }
 0x176   :  { %v1899_v30 = vpop.f32.mrb[18].mxu0  ;;  %6856 = vmatprep.subr.bf16.mxu1 %v6964_v0  ;;  %6115 = vmatprep.mubr.msk.f32.mxu0 %vm6965_vm0, %v6966_v8  ;;  %v6893_v24 = vpack.c.bf16 %v470_v21, %v469_v20  ;;  %v509_v20 = vld [vmem:[%s9110_s1 + $0xdd0] sm:$0xff]  ;;  %v510_v21 = vld [vmem:[%s9110_s1 + $0xdd8] sm:$0xff] }
 0x177   :  { %4623 = vst.msk [vmem:[%s9112_s2 + $0x24] sm:$0x3] %vm4604_vm2, %v1899_v30  ;;  %v1972_v33 = vpop.f32.mrb[18].mxu1  ;;  %v5585_v34 = vpop.f32.mrb[19].mxu0  ;;  %6134 = vmatprep.mubr.msk.f32.mxu1 %vm6965_vm0, %v6966_v8  ;;  %v480_v30 = vld [vmem:[%s9110_s1 + $0xce8] sm:$0xff]  ;;  %v6953_v23 = vpack.c.bf16 %v510_v21, %v509_v20 }
 0x178   :  { %4624 = vst.msk [vmem:[%s9112_s2 + $0x26] sm:$0x3] %vm4604_vm2, %v1972_v33  ;;  %v5604_v35 = vpop.f32.mrb[19].mxu1  ;;  %6846 = vmatpush3.bf16.msra.mxu0 %v6845_v26  ;;  %v471_v26 = vld [vmem:[%s9110_s1 + $0xca0] sm:$0xff] }
 0x179   :  { %6858 = vmatpush3.bf16.msra.mxu1 %v6857_v27  ;;  %6847 = vmatprep.subr.bf16.mxu0 %v6964_v0  ;;  %v472_v27 = vld [vmem:[%s9110_s1 + $0xca8] sm:$0xff]  ;;  %v6908_v35 = vpack.c.bf16 %v480_v30, %v479_v29 }
 0x17a   :  { %6859 = vmatprep.subr.bf16.mxu1 %v6964_v0  ;;  %v6896_v34 = vpack.c.bf16 %v472_v27, %v471_v26  ;;  %v511_v27 = vld [vmem:[%s9110_s1 + $0xde0] sm:$0xff] }
 0x17c   :  { %6849 = vmatpush3.bf16.msra.mxu0 %v6848_v36  ;;  %v473_v36 = vld [vmem:[%s9110_s1 + $0xcb0] sm:$0xff] }
 0x17d   :  { %6861 = vmatpush3.bf16.msra.mxu1 %v6860_v37  ;;  %6850 = vmatprep.subr.bf16.mxu0 %v6964_v0  ;;  %v474_v37 = vld [vmem:[%s9110_s1 + $0xcb8] sm:$0xff] }
 0x17e   :  { %6862 = vmatprep.subr.bf16.mxu1 %v6964_v0  ;;  %v6899_v40 = vpack.c.bf16 %v474_v37, %v473_v36  ;;  %v514_v36 = vld [vmem:[%s9110_s1 + $0xdf8] sm:$0xff] }
 0x180   :  { %6852 = vmatpush3.bf16.msra.mxu0 %v6851_v42  ;;  %v483_v42 = vld [vmem:[%s9110_s1 + $0xd00] sm:$0xff] }
 0x181   :  { %6864 = vmatpush3.bf16.msra.mxu1 %v6863_v43  ;;  %6865 = vmatprep.subr.bf16.mxu0 %v6964_v0  ;;  %v484_v43 = vld [vmem:[%s9110_s1 + $0xd08] sm:$0xff] }
 0x182   :  { %6877 = vmatprep.subr.bf16.mxu1 %v6964_v0  ;;  %v6914_v47 = vpack.c.bf16 %v484_v43, %v483_v42 }
 0x183   :  { %6116 = vmatmul.mubr.msk.f32.vlgmr.msra.gmra.mrb[46].mxu0 %vm515_vm1, %v57_v48  ;;  %v62_v48 = vld [vmem:[%s9111_s0 + $0x66] sm:$0x3] }
 0x184   :  { %6135 = vmatmul.mubr.msk.f32.vlgmr.msra.gmra.mrb[46].mxu1 %vm515_vm1, %v58_v50  ;;  %6867 = vmatpush3.bf16.msra.mxu0 %v6866_v49  ;;  %v6926_v49 = vpack.c.bf16 %v492_v45, %v491_v44  ;;  %v485_v50 = vld [vmem:[%s9110_s1 + $0xd10] sm:$0xff] }
 0x185   :  { %6879 = vmatpush3.bf16.msra.mxu1 %v6878_v51  ;;  %6868 = vmatprep.subr.bf16.mxu0 %v6964_v0  ;;  %v486_v51 = vld [vmem:[%s9110_s1 + $0xd18] sm:$0xff] }
 0x186   :  { %v2045_v60 = vpop.f32.mrb[20].mxu0  ;;  %6880 = vmatprep.subr.bf16.mxu1 %v6964_v0  ;;  %6153 = vmatprep.mubr.msk.f32.mxu0 %vm6965_vm0, %v6966_v8  ;;  %v6917_v54 = vpack.c.bf16 %v486_v51, %v485_v50 }
 0x187   :  { %4625 = vst.msk [vmem:[%s9112_s2 + $0x28] sm:$0x3] %vm4604_vm2, %v2045_v60  ;;  %v2118_v63 = vpop.f32.mrb[20].mxu1  ;;  %v5623_v1 = vpop.f32.mrb[21].mxu0  ;;  %6172 = vmatprep.mubr.msk.f32.mxu1 %vm6965_vm0, %v6966_v8  ;;  %v496_v60 = vld [vmem:[%s9110_s1 + $0xd68] sm:$0xff] }
 0x188   :  { %4626 = vst.msk [vmem:[%s9112_s2 + $0x2a] sm:$0x3] %vm4604_vm2, %v2118_v63  ;;  %v5642_v2 = vpop.f32.mrb[21].mxu1  ;;  %6870 = vmatpush3.bf16.msra.mxu0 %v6869_v56  ;;  %v487_v56 = vld [vmem:[%s9110_s1 + $0xd20] sm:$0xff] }
 0x189   :  { %6882 = vmatpush3.bf16.msra.mxu1 %v6881_v57  ;;  %6871 = vmatprep.subr.bf16.mxu0 %v6964_v0  ;;  %v488_v57 = vld [vmem:[%s9110_s1 + $0xd28] sm:$0xff]  ;;  %v6932_v2 = vpack.c.bf16 %v496_v60, %v495_v59 }
 0x18a   :  { %6883 = vmatprep.subr.bf16.mxu1 %v6964_v0  ;;  %v6920_v1 = vpack.c.bf16 %v488_v57, %v487_v56 }
 0x18c   :  { %6873 = vmatpush3.bf16.msra.mxu0 %v6872_v3  ;;  %v489_v3 = vld [vmem:[%s9110_s1 + $0xd30] sm:$0xff] }
 0x18d   :  { %6885 = vmatpush3.bf16.msra.mxu1 %v6884_v4  ;;  %6874 = vmatprep.subr.bf16.mxu0 %v6964_v0  ;;  %v490_v4 = vld [vmem:[%s9110_s1 + $0xd38] sm:$0xff] }
 0x18e   :  { %6886 = vmatprep.subr.bf16.mxu1 %v6964_v0  ;;  %v6923_v7 = vpack.c.bf16 %v490_v4, %v489_v3 }
 0x190   :  { %6876 = vmatpush3.bf16.msra.mxu0 %v6875_v10  ;;  %v499_v10 = vld [vmem:[%s9110_s1 + $0xd80] sm:$0xff] }
 0x191   :  { %6888 = vmatpush3.bf16.msra.mxu1 %v6887_v11  ;;  %6889 = vmatprep.subr.bf16.mxu0 %v6964_v0  ;;  %v500_v11 = vld [vmem:[%s9110_s1 + $0xd88] sm:$0xff] }
 0x192   :  { %6901 = vmatprep.subr.bf16.mxu1 %v6964_v0  ;;  %v6938_v15 = vpack.c.bf16 %v500_v11, %v499_v10 }
 0x193   :  { %6154 = vmatmul.mubr.msk.f32.vlgmr.msra.gmra.mrb[48].mxu0 %vm515_vm1, %v59_v16  ;;  %v64_v16 = vld [vmem:[%s9111_s0 + $0x6a] sm:$0x3] }
 0x194   :  { %6173 = vmatmul.mubr.msk.f32.vlgmr.msra.gmra.mrb[48].mxu1 %vm515_vm1, %v60_v18  ;;  %6891 = vmatpush3.bf16.msra.mxu0 %v6890_v17  ;;  %v6950_v17 = vpack.c.bf16 %v508_v13, %v507_v12  ;;  %v501_v18 = vld [vmem:[%s9110_s1 + $0xd90] sm:$0xff] }
 0x195   :  { %6903 = vmatpush3.bf16.msra.mxu1 %v6902_v19  ;;  %6892 = vmatprep.subr.bf16.mxu0 %v6964_v0  ;;  %v502_v19 = vld [vmem:[%s9110_s1 + $0xd98] sm:$0xff] }
 0x196   :  { %v2191_v28 = vpop.f32.mrb[22].mxu0  ;;  %6904 = vmatprep.subr.bf16.mxu1 %v6964_v0  ;;  %6191 = vmatprep.mubr.msk.f32.mxu0 %vm6965_vm0, %v6966_v8  ;;  %v6941_v22 = vpack.c.bf16 %v502_v19, %v501_v18 }
 0x197   :  { %4627 = vst.msk [vmem:[%s9112_s2 + $0x2c] sm:$0x3] %vm4604_vm2, %v2191_v28  ;;  %v2264_v31 = vpop.f32.mrb[22].mxu1  ;;  %v5661_v32 = vpop.f32.mrb[23].mxu0  ;;  %6210 = vmatprep.mubr.msk.f32.mxu1 %vm6965_vm0, %v6966_v8  ;;  %v512_v28 = vld [vmem:[%s9110_s1 + $0xde8] sm:$0xff] }
 0x198   :  { %4628 = vst.msk [vmem:[%s9112_s2 + $0x2e] sm:$0x3] %vm4604_vm2, %v2264_v31  ;;  %v5680_v33 = vpop.f32.mrb[23].mxu1  ;;  %6894 = vmatpush3.bf16.msra.mxu0 %v6893_v24  ;;  %v503_v24 = vld [vmem:[%s9110_s1 + $0xda0] sm:$0xff] }
 0x199   :  { %6906 = vmatpush3.bf16.msra.mxu1 %v6905_v25  ;;  %6895 = vmatprep.subr.bf16.mxu0 %v6964_v0  ;;  %v504_v25 = vld [vmem:[%s9110_s1 + $0xda8] sm:$0xff]  ;;  %v6956_v33 = vpack.c.bf16 %v512_v28, %v511_v27 }
 0x19a   :  { %6907 = vmatprep.subr.bf16.mxu1 %v6964_v0  ;;  %v6944_v32 = vpack.c.bf16 %v504_v25, %v503_v24 }
 0x19c   :  { %6897 = vmatpush3.bf16.msra.mxu0 %v6896_v34  ;;  %v505_v34 = vld [vmem:[%s9110_s1 + $0xdb0] sm:$0xff] }
 0x19d   :  { %6909 = vmatpush3.bf16.msra.mxu1 %v6908_v35  ;;  %6898 = vmatprep.subr.bf16.mxu0 %v6964_v0  ;;  %v513_v35 = vld [vmem:[%s9110_s1 + $0xdf0] sm:$0xff] }
 0x19e   :  { %6910 = vmatprep.subr.bf16.mxu1 %v6964_v0  ;;  %v6959_v38 = vpack.c.bf16 %v514_v36, %v513_v35 }
 0x1a0   :  { %6900 = vmatpush3.bf16.msra.mxu0 %v6899_v40  ;;  %v66_v40 = vld [vmem:[%s9111_s0 + $0x6e] sm:$0x3] }
 0x1a1   :  { %6912 = vmatpush3.bf16.msra.mxu1 %v6911_v41  ;;  %6913 = vmatprep.subr.bf16.mxu0 %v6964_v0 }
 0x1a2   :  { %6925 = vmatprep.subr.bf16.mxu1 %v6964_v0 }
 0x1a3   :  { %6192 = vmatmul.mubr.msk.f32.vlgmr.msra.gmra.mrb[50].mxu0 %vm515_vm1, %v61_v46 }
 0x1a4   :  { %6211 = vmatmul.mubr.msk.f32.vlgmr.msra.gmra.mrb[50].mxu1 %vm515_vm1, %v62_v48  ;;  %6915 = vmatpush3.bf16.msra.mxu0 %v6914_v47 }
 0x1a5   :  { %6927 = vmatpush3.bf16.msra.mxu1 %v6926_v49  ;;  %6916 = vmatprep.subr.bf16.mxu0 %v6964_v0 }
 0x1a6   :  { %v2337_v58 = vpop.f32.mrb[24].mxu0  ;;  %6928 = vmatprep.subr.bf16.mxu1 %v6964_v0  ;;  %6229 = vmatprep.mubr.msk.f32.mxu0 %vm6965_vm0, %v6966_v8 }
 0x1a7   :  { %4629 = vst.msk [vmem:[%s9112_s2 + $0x30] sm:$0x3] %vm4604_vm2, %v2337_v58  ;;  %v2410_v61 = vpop.f32.mrb[24].mxu1  ;;  %v5699_v62 = vpop.f32.mrb[25].mxu0  ;;  %6248 = vmatprep.mubr.msk.f32.mxu1 %vm6965_vm0, %v6966_v8 }
 0x1a8   :  { %4630 = vst.msk [vmem:[%s9112_s2 + $0x32] sm:$0x3] %vm4604_vm2, %v2410_v61  ;;  %v5718_v63 = vpop.f32.mrb[25].mxu1  ;;  %6918 = vmatpush3.bf16.msra.mxu0 %v6917_v54 }
 0x1a9   :  { %6930 = vmatpush3.bf16.msra.mxu1 %v6929_v55  ;;  %6919 = vmatprep.subr.bf16.mxu0 %v6964_v0 }
 0x1aa   :  { %6931 = vmatprep.subr.bf16.mxu1 %v6964_v0 }
 0x1ac   :  { %6921 = vmatpush3.bf16.msra.mxu0 %v6920_v1 }
 0x1ad   :  { %6933 = vmatpush3.bf16.msra.mxu1 %v6932_v2  ;;  %6922 = vmatprep.subr.bf16.mxu0 %v6964_v0 }
 0x1ae   :  { %6934 = vmatprep.subr.bf16.mxu1 %v6964_v0 }
 0x1b0   :  { %6924 = vmatpush3.bf16.msra.mxu0 %v6923_v7 }
 0x1b1   :  { %6936 = vmatpush3.bf16.msra.mxu1 %v6935_v9  ;;  %6937 = vmatprep.subr.bf16.mxu0 %v6964_v0 }
 0x1b2   :  { %6949 = vmatprep.subr.bf16.mxu1 %v6964_v0 }
 0x1b3   :  { %6230 = vmatmul.mubr.msk.f32.vlgmr.msra.gmra.mrb[52].mxu0 %vm515_vm1, %v63_v14 }
 0x1b4   :  { %6249 = vmatmul.mubr.msk.f32.vlgmr.msra.gmra.mrb[52].mxu1 %vm515_vm1, %v64_v16  ;;  %6939 = vmatpush3.bf16.msra.mxu0 %v6938_v15 }
 0x1b5   :  { %6951 = vmatpush3.bf16.msra.mxu1 %v6950_v17  ;;  %6940 = vmatprep.subr.bf16.mxu0 %v6964_v0 }
 0x1b6   :  { %v2483_v26 = vpop.f32.mrb[26].mxu0  ;;  %6952 = vmatprep.subr.bf16.mxu1 %v6964_v0  ;;  %6267 = vmatprep.mubr.msk.f32.mxu0 %vm6965_vm0, %v6966_v8 }
 0x1b7   :  { %4631 = vst.msk [vmem:[%s9112_s2 + $0x34] sm:$0x3] %vm4604_vm2, %v2483_v26  ;;  %v2556_v29 = vpop.f32.mrb[26].mxu1  ;;  %v5737_v30 = vpop.f32.mrb[27].mxu0  ;;  %6286 = vmatprep.mubr.msk.f32.mxu1 %vm6965_vm0, %v6966_v8  ;;  %v506_v8 = vld [vmem:[%s9110_s1 + $0xdb8] sm:$0xff] }
 0x1b8   :  { %4632 = vst.msk [vmem:[%s9112_s2 + $0x36] sm:$0x3] %vm4604_vm2, %v2556_v29  ;;  %v5756_v31 = vpop.f32.mrb[27].mxu1  ;;  %6942 = vmatpush3.bf16.msra.mxu0 %v6941_v22  ;;  %v6947_v37 = vpack.c.bf16 %v506_v8, %v505_v34 }
 0x1b9   :  { %6954 = vmatpush3.bf16.msra.mxu1 %v6953_v23  ;;  %6943 = vmatprep.subr.bf16.mxu0 %v6964_v0 }
 0x1ba   :  { %6955 = vmatprep.subr.bf16.mxu1 %v6964_v0 }
 0x1bc   :  { %6945 = vmatpush3.bf16.msra.mxu0 %v6944_v32 }
 0x1bd   :  { %6957 = vmatpush3.bf16.msra.mxu1 %v6956_v33  ;;  %6946 = vmatprep.subr.bf16.mxu0 %v6964_v0 }
 0x1be   :  { %6958 = vmatprep.subr.bf16.mxu1 %v6964_v0 }
 0x1c0   :  { %6948 = vmatpush3.bf16.msra.mxu0 %v6947_v37 }
 0x1c1   :  { %6960 = vmatpush3.bf16.msra.mxu1 %v6959_v38 }
 0x1c3   :  { %6268 = vmatmul.mubr.msk.f32.vlgmr.msra.gmra.mrb[54].mxu0 %vm515_vm1, %v65_v39 }
 0x1c4   :  { %6287 = vmatmul.mubr.msk.f32.vlgmr.msra.gmra.mrb[54].mxu1 %vm515_vm1, %v66_v40 }
 0x1c6   :  { %v2629_v41 = vpop.f32.mrb[28].mxu0 }
 0x1c7   :  { %4633 = vst.msk [vmem:[%s9112_s2 + $0x38] sm:$0x3] %vm4604_vm2, %v2629_v41  ;;  %v2702_v0 = vpop.f32.mrb[28].mxu1  ;;  %v5775_v42 = vpop.f32.mrb[29].mxu0 }
 0x1c8   :  { %4634 = vst.msk [vmem:[%s9112_s2 + $0x3a] sm:$0x3] %vm4604_vm2, %v2702_v0  ;;  %v5794_v43 = vpop.f32.mrb[29].mxu1 }
 0x1d6   :  { %v2775_v44 = vpop.f32.mrb[30].mxu0 }
 0x1d7   :  { %4635 = vst.msk [vmem:[%s9112_s2 + $0x3c] sm:$0x3] %vm4604_vm2, %v2775_v44  ;;  %v2848_v45 = vpop.f32.mrb[30].mxu1  ;;  %v5813_v46 = vpop.f32.mrb[31].mxu0 }
 0x1d8   :  { %4636 = vst.msk [vmem:[%s9112_s2 + $0x3e] sm:$0x3] %vm4604_vm2, %v2848_v45  ;;  %v5832_v47 = vpop.f32.mrb[31].mxu1 }
 0x1e6   :  { %v2921_v48 = vpop.f32.mrb[32].mxu0 }
 0x1e7   :  { %4637 = vst.msk [vmem:[%s9112_s2 + $0x40] sm:$0x3] %vm4604_vm2, %v2921_v48  ;;  %v2994_v49 = vpop.f32.mrb[32].mxu1  ;;  %v5851_v50 = vpop.f32.mrb[33].mxu0 }
 0x1e8   :  { %4638 = vst.msk [vmem:[%s9112_s2 + $0x42] sm:$0x3] %vm4604_vm2, %v2994_v49  ;;  %v5870_v51 = vpop.f32.mrb[33].mxu1 }
 0x1f6   :  { %v3067_v52 = vpop.f32.mrb[34].mxu0 }
 0x1f7   :  { %4639 = vst.msk [vmem:[%s9112_s2 + $0x44] sm:$0x3] %vm4604_vm2, %v3067_v52  ;;  %v3140_v53 = vpop.f32.mrb[34].mxu1  ;;  %v5889_v54 = vpop.f32.mrb[35].mxu0 }
 0x1f8   :  { %4640 = vst.msk [vmem:[%s9112_s2 + $0x46] sm:$0x3] %vm4604_vm2, %v3140_v53  ;;  %v5908_v55 = vpop.f32.mrb[35].mxu1 }
 0x206   :  { %v3213_v56 = vpop.f32.mrb[36].mxu0 }
 0x207   :  { %4641 = vst.msk [vmem:[%s9112_s2 + $0x48] sm:$0x3] %vm4604_vm2, %v3213_v56  ;;  %v3286_v57 = vpop.f32.mrb[36].mxu1  ;;  %v5927_v58 = vpop.f32.mrb[37].mxu0 }
 0x208   :  { %4642 = vst.msk [vmem:[%s9112_s2 + $0x4a] sm:$0x3] %vm4604_vm2, %v3286_v57  ;;  %v5946_v59 = vpop.f32.mrb[37].mxu1 }
 0x216   :  { %v3359_v60 = vpop.f32.mrb[38].mxu0 }
 0x217   :  { %4643 = vst.msk [vmem:[%s9112_s2 + $0x4c] sm:$0x3] %vm4604_vm2, %v3359_v60  ;;  %v3432_v61 = vpop.f32.mrb[38].mxu1  ;;  %v5965_v62 = vpop.f32.mrb[39].mxu0 }
 0x218   :  { %4644 = vst.msk [vmem:[%s9112_s2 + $0x4e] sm:$0x3] %vm4604_vm2, %v3432_v61  ;;  %v5984_v63 = vpop.f32.mrb[39].mxu1 }
 0x226   :  { %v3505_v1 = vpop.f32.mrb[40].mxu0 }
 0x227   :  { %4645 = vst.msk [vmem:[%s9112_s2 + $0x50] sm:$0x3] %vm4604_vm2, %v3505_v1  ;;  %v3578_v2 = vpop.f32.mrb[40].mxu1  ;;  %v6003_v3 = vpop.f32.mrb[41].mxu0 }
 0x228   :  { %4646 = vst.msk [vmem:[%s9112_s2 + $0x52] sm:$0x3] %vm4604_vm2, %v3578_v2  ;;  %v6022_v4 = vpop.f32.mrb[41].mxu1 }
 0x236   :  { %v3651_v5 = vpop.f32.mrb[42].mxu0 }
 0x237   :  { %4647 = vst.msk [vmem:[%s9112_s2 + $0x54] sm:$0x3] %vm4604_vm2, %v3651_v5  ;;  %v3724_v6 = vpop.f32.mrb[42].mxu1  ;;  %v6041_v7 = vpop.f32.mrb[43].mxu0 }
 0x238   :  { %4648 = vst.msk [vmem:[%s9112_s2 + $0x56] sm:$0x3] %vm4604_vm2, %v3724_v6  ;;  %v6060_v9 = vpop.f32.mrb[43].mxu1 }
 0x246   :  { %v3797_v10 = vpop.f32.mrb[44].mxu0 }
 0x247   :  { %4649 = vst.msk [vmem:[%s9112_s2 + $0x58] sm:$0x3] %vm4604_vm2, %v3797_v10  ;;  %v3870_v11 = vpop.f32.mrb[44].mxu1  ;;  %v6079_v12 = vpop.f32.mrb[45].mxu0 }
 0x248   :  { %4650 = vst.msk [vmem:[%s9112_s2 + $0x5a] sm:$0x3] %vm4604_vm2, %v3870_v11  ;;  %v6098_v13 = vpop.f32.mrb[45].mxu1 }
 0x256   :  { %v3943_v14 = vpop.f32.mrb[46].mxu0 }
 0x257   :  { %4651 = vst.msk [vmem:[%s9112_s2 + $0x5c] sm:$0x3] %vm4604_vm2, %v3943_v14  ;;  %v4016_v15 = vpop.f32.mrb[46].mxu1  ;;  %v6117_v16 = vpop.f32.mrb[47].mxu0 }
 0x258   :  { %4652 = vst.msk [vmem:[%s9112_s2 + $0x5e] sm:$0x3] %vm4604_vm2, %v4016_v15  ;;  %v6136_v17 = vpop.f32.mrb[47].mxu1 }
 0x266   :  { %v4089_v18 = vpop.f32.mrb[48].mxu0 }
 0x267   :  { %4653 = vst.msk [vmem:[%s9112_s2 + $0x60] sm:$0x3] %vm4604_vm2, %v4089_v18  ;;  %v4162_v19 = vpop.f32.mrb[48].mxu1  ;;  %v6155_v20 = vpop.f32.mrb[49].mxu0 }
 0x268   :  { %4654 = vst.msk [vmem:[%s9112_s2 + $0x62] sm:$0x3] %vm4604_vm2, %v4162_v19  ;;  %v6174_v21 = vpop.f32.mrb[49].mxu1 }
 0x276   :  { %v4235_v22 = vpop.f32.mrb[50].mxu0 }
 0x277   :  { %4655 = vst.msk [vmem:[%s9112_s2 + $0x64] sm:$0x3] %vm4604_vm2, %v4235_v22  ;;  %v4308_v23 = vpop.f32.mrb[50].mxu1  ;;  %v6193_v24 = vpop.f32.mrb[51].mxu0 }
 0x278   :  { %4656 = vst.msk [vmem:[%s9112_s2 + $0x66] sm:$0x3] %vm4604_vm2, %v4308_v23  ;;  %v6212_v25 = vpop.f32.mrb[51].mxu1 }
 0x286   :  { %v4381_v26 = vpop.f32.mrb[52].mxu0 }
 0x287   :  { %4657 = vst.msk [vmem:[%s9112_s2 + $0x68] sm:$0x3] %vm4604_vm2, %v4381_v26  ;;  %v4454_v27 = vpop.f32.mrb[52].mxu1  ;;  %v6231_v28 = vpop.f32.mrb[53].mxu0 }
 0x288   :  { %4658 = vst.msk [vmem:[%s9112_s2 + $0x6a] sm:$0x3] %vm4604_vm2, %v4454_v27  ;;  %v6250_v29 = vpop.f32.mrb[53].mxu1 }
 0x296   :  { %v4527_v30 = vpop.f32.mrb[54].mxu0 }
 0x297   :  { %4659 = vst.msk [vmem:[%s9112_s2 + $0x6c] sm:$0x3] %vm4604_vm2, %v4527_v30  ;;  %v4600_v31 = vpop.f32.mrb[54].mxu1  ;;  %v6269_v32 = vpop.f32.mrb[55].mxu0 }
 0x298   :  { %4660 = vst.msk [vmem:[%s9112_s2 + $0x6e] sm:$0x3] %vm4604_vm2, %v4600_v31  ;;  %v6288_v33 = vpop.f32.mrb[55].mxu1 }

// kernel: fno_dse_forward.15
= control target key start
LH: loop header
LB: loop body
LE: loop exit
PB: predicated region body
PF: predicated region fallthrough
CT: control target
= control target key end

     0   :  { %s1666_s11 = smov 0   ;;  %s1668_s12 = smov 0   ;;  %s2275_s0 = inlined_call_operand.vmem [shape: f32[2,32,128], index: 0, kind: input, shape index: {}]   ;;  %s2276_s1 = inlined_call_operand.vmem [shape: f32[2,3,128], index: 1, kind: input, shape index: {}]   ;;  %s2277_s2 = inlined_call_operand.vmem [shape: f32[128,32], index: 2, kind: input, shape index: {}]   ;;  %s2278_s3 = inlined_call_operand.vmem [shape: f32[128,3], index: 3, kind: input, shape index: {}]   ;;  %s2279_s4 = inlined_call_operand.vmem [shape: f32[128,1], index: 4, kind: input, shape index: {}]   ;;  %s2280_s5 = inlined_call_operand.vmem [shape: f32[128,1], index: 5, kind: input, shape index: {}]   ;;  %s2281_s6 = inlined_call_operand.<no memory space> [shape: f32[1,1], index: 6, kind: input, shape index: {}]   ;;  %s2282_s7 = inlined_call_operand.vmem [shape: f32[32,1], index: 7, kind: input, shape index: {}]   ;;  %s2283_s8 = inlined_call_operand.vmem [shape: f32[32,1], index: 8, kind: input, shape index: {}]   ;;  %s2284_s9 = inlined_call_operand.vmem [shape: f32[2,1,128], index: 9, kind: output, shape index: {}]  }
   0x1   :  { %v14_v0 = vstv %s2281_s6  ;;  %s1670_s13 = smov 0  }
   0x2   :  { %15 = vst [vmem:[#allocation2] sm:$0x1] %v14_v0 }
   0x3 LB: > { %s33_s6 = sadd.s32 1, %s1604_s12  ;;  %p1448_p0 = scmp.ge.s32.totalorder %s1608_s13, 1  ;;  %s1608_s13 = sphi %s1670_s13, %s21_s13   ;;  %s1604_s12 = sphi %s1668_s12, %s2327_s12   ;;  %s1600_s11 = sphi %s1666_s11, %s2326_s11  }
   0x4   : > { %p35_p1 = scmp.ge.s32.totalorder %s33_s6, 2  ;;  %p322_p2 = scmp.lt.s32.totalorder %s1608_s13, 3 }
   0x6   : > { %s2329_s6 = smov (%p35_p1, %s33_s6), 0  ;;  %p323_p3 = pnand %p1448_p0, %p322_p2 }
   0x8   : > { %326 = sbr.rel (%p323_p3) target bundleno = 489 (0x1e9), region = 56 }
   0xf   : > { %v422_v1 = vld [vmem:[%s2283_s8] sm:$0xff]  ;;  %v1610_v3 = vmov 0   ;;  %v423_v4 = vld [vmem:[%s2283_s8 + $0x8] sm:$0xff]  ;;  %v397_v6 = vld [vmem:[%s2282_s7 + $0x18] sm:$0xff]  ;;  %v1611_v12 = vmov 1   ;;  %v1612_v20 = vmov 2   ;;  %v671_v41 = vlaneseq }
  0x10   : > { %v394_v2 = vld [vmem:[%s2282_s7] sm:$0xff]  ;;  %1563 = vset.pattern.permute.xlu1 %v1610_v3  ;;  %1562 = vset.pattern.permute.xlu0 %v1610_v3  ;;  %v395_v5 = vld [vmem:[%s2282_s7 + $0x8] sm:$0xff]  ;;  %v396_v7 = vld [vmem:[%s2282_s7 + $0x10] sm:$0xff]  ;;  %vm691_vm0 = vcmask 261120   ;;  %p369_p4 = scmp.lt.s32.totalorder %s1600_s11, 1 }
  0x11   : > { %428 = vperm.xlu1 %1563, %v422_v1   ;;  %400 = vperm.xlu0 %1562, %v394_v2   ;;  %v425_v8 = vld [vmem:[%s2283_s8 + $0x18] sm:$0xff]  ;;  %v424_v9 = vld [vmem:[%s2283_s8 + $0x10] sm:$0xff]  ;;  %v560_v10 = vld [vmem:[%s2278_s3 + $0x8] sm:$0xff]  ;;  %v1815_v49 = vshrl.u32 %v671_v41, 7 }
  0x12   : > { %v559_v11 = vld [vmem:[%s2278_s3] sm:$0xff]  ;;  %v562_v13 = vld [vmem:[%s2278_s3 + $0x18] sm:$0xff]  ;;  %v564_v14 = vld [vmem:[%s2278_s3 + $0x28] sm:$0xff]  ;;  %s2331_s11 = smov (!%p369_p4, %s1600_s11), 1 }
  0x13   : > { %v566_v15 = vld [vmem:[%s2278_s3 + $0x38] sm:$0xff]  ;;  %v568_v16 = vld [vmem:[%s2278_s3 + $0x48] sm:$0xff]  ;;  %v561_v21 = vld [vmem:[%s2278_s3 + $0x10] sm:$0xff]  ;;  %s1470_s20 = sshll.u32 %s2331_s11, 5  ;;  %s1451_s18 = sshll.u32 %s2331_s11, 2  ;;  %2287 = vst [vmem:[#allocation3_spill] sm:$0xff] %v1815_v49 }
  0x14   : > { %v570_v17 = vld [vmem:[%s2278_s3 + $0x58] sm:$0xff]  ;;  %v572_v18 = vld [vmem:[%s2278_s3 + $0x68] sm:$0xff]  ;;  %v563_v22 = vld [vmem:[%s2278_s3 + $0x20] sm:$0xff]  ;;  %s1796_s27 = scalar_lea.vmem %s2275_s0, %s1470_s20  ;;  %s383_s25 = scalar_lea.vmem %s2276_s1, %s1451_s18  ;;  %v2285_v60 = vsub.s32 0, %v1815_v49 }
  0x15   : > { %433 = vperm.xlu1 %1563, %v423_v4   ;;  %405 = vperm.xlu0 %1562, %v395_v5   ;;  %v574_v19 = vld [vmem:[%s2278_s3 + $0x78] sm:$0xff]  ;;  %v565_v23 = vld [vmem:[%s2278_s3 + $0x30] sm:$0xff]  ;;  %v567_v24 = vld [vmem:[%s2278_s3 + $0x40] sm:$0xff]  ;;  %v951_v4 = vsub.s32 1, %v1815_v49  ;;  %s389_s24 = scalar_lea.vmem %s2284_s9, %s2331_s11 }
  0x16   : > { %v569_v25 = vld [vmem:[%s2278_s3 + $0x50] sm:$0xff]  ;;  %v571_v26 = vld [vmem:[%s2278_s3 + $0x60] sm:$0xff]  ;;  %v1088_v31 = vld [vmem:[%s2279_s4 + $0x18] sm:$0xff] }
  0x17   : > { %v575_v27 = vld [vmem:[%s2277_s2] sm:$0xff]  ;;  %v573_v29 = vld [vmem:[%s2278_s3 + $0x70] sm:$0xff]  ;;  %v1090_v32 = vld [vmem:[%s2279_s4 + $0x28] sm:$0xff] }
  0x18   : > { %v583_v28 = vld [vmem:[%s2277_s2 + $0x40] sm:$0xff]  ;;  %1499 = vmatprep.mubr.msk.f32.mxu0 %vm691_vm0, %v575_v27  ;;  %v1086_v33 = vld [vmem:[%s2279_s4 + $0x8] sm:$0xff]  ;;  %v1087_v35 = vld [vmem:[%s2279_s4 + $0x10] sm:$0xff] }
  0x19   : > { %415 = vperm.xlu1 %1563, %v397_v6   ;;  %410 = vperm.xlu0 %1562, %v396_v7   ;;  %v1085_v30 = vld [vmem:[%s2279_s4] sm:$0xff]  ;;  %v1214_v34 = vld [vmem:[%s2280_s5 + $0x8] sm:$0xff]  ;;  %v1216_v36 = vld [vmem:[%s2280_s5 + $0x18] sm:$0xff] }
  0x1a   : > { %1511 = vmatprep.mubr.msk.f32.mxu1 %vm691_vm0, %v583_v28  ;;  %v1089_v37 = vld [vmem:[%s2279_s4 + $0x20] sm:$0xff]  ;;  %v391_v45 = vld [vmem:[%s1796_s27 + $0x8] sm:$0xff]  ;;  %v1215_v53 = vld [vmem:[%s2280_s5 + $0x10] sm:$0xff] }
  0x1b   : > { %v390_v38 = vld [vmem:[%s1796_s27] sm:$0xff]  ;;  %v1218_v52 = vld [vmem:[%s2280_s5 + $0x28] sm:$0xff]  ;;  %v393_v57 = vld [vmem:[%s1796_s27 + $0x18] sm:$0xff] }
  0x1c   : > { %v1217_v43 = vld [vmem:[%s2280_s5 + $0x20] sm:$0xff]  ;;  %v392_v59 = vld [vmem:[%s1796_s27 + $0x10] sm:$0xff] }
  0x1d   : > { %443 = vperm.xlu1 %1563, %v425_v8   ;;  %438 = vperm.xlu0 %1562, %v424_v9   ;;  %v1213_v44 = vld [vmem:[%s2280_s5] sm:$0xff]  ;;  %v1219_v63 = vld [vmem:[%s2280_s5 + $0x30] sm:$0xff] }
  0x1e   : > { %v1091_v0 = vld [vmem:[%s2279_s4 + $0x30] sm:$0xff]  ;;  %v1844_v1 = vld [vmem:[%s383_s25] sm:$0x7] }
  0x21   : > { %598 = vperm.xlu1 %1563, %v560_v10   ;;  %1564 = vset.pattern.permute.xlu0 %v1611_v12 }
  0x22   : > { %886 = vperm.xlu0 %1564, %v559_v11  }
  0x25   : > { %608 = vperm.xlu1 %1563, %v562_v13  }
  0x26   : > { %898 = vperm.xlu0 %1564, %v562_v13  }
  0x29   : > { %618 = vperm.xlu1 %1563, %v564_v14  }
  0x2a   : > { %906 = vperm.xlu0 %1564, %v564_v14  }
  0x2d   : > { %628 = vperm.xlu1 %1563, %v566_v15  }
  0x2e   : > { %914 = vperm.xlu0 %1564, %v566_v15  }
  0x31   : > { %638 = vperm.xlu1 %1563, %v568_v16  }
  0x32   : > { %922 = vperm.xlu0 %1564, %v568_v16  }
  0x35   : > { %648 = vperm.xlu1 %1563, %v570_v17  }
  0x36   : > { %930 = vperm.xlu0 %1564, %v570_v17  }
  0x39   : > { %658 = vperm.xlu1 %1563, %v572_v18  }
  0x3a   : > { %938 = vperm.xlu0 %1564, %v572_v18  }
  0x3d   : > { %668 = vperm.xlu1 %1563, %v574_v19  }
  0x3e   : > { %946 = vperm.xlu0 %1564, %v574_v19  }
  0x41   : > { %1565 = vset.pattern.permute.xlu1 %v1611_v12  ;;  %v1092_v12 = vld [vmem:[%s2279_s4 + $0x38] sm:$0xff] }
  0x42   : > { %1567 = vset.pattern.permute.xlu0 %v1612_v20  ;;  %890 = vperm.xlu1 %1565, %v560_v10  }
  0x43   : > { %990 = vperm.xlu0 %1567, %v560_v10   ;;  %v1851_v10 = vrot.slane %v1844_v1, %v2285_v60 }
  0x46   : > { %894 = vperm.xlu1 %1565, %v561_v21  }
  0x47   : > { %1002 = vperm.xlu0 %1567, %v563_v22  }
  0x4a   : > { %902 = vperm.xlu1 %1565, %v563_v22  }
  0x4b   : > { %1010 = vperm.xlu0 %1567, %v565_v23  }
  0x4e   : > { %910 = vperm.xlu1 %1565, %v565_v23  }
  0x4f   : > { %1018 = vperm.xlu0 %1567, %v567_v24  }
  0x52   : > { %918 = vperm.xlu1 %1565, %v567_v24  }
  0x53   : > { %1026 = vperm.xlu0 %1567, %v569_v25  }
  0x56   : > { %926 = vperm.xlu1 %1565, %v569_v25  }
  0x57   : > { %1034 = vperm.xlu0 %1567, %v571_v26  }
  0x5a   : > { %934 = vperm.xlu1 %1565, %v571_v26  }
  0x5b   : > { %1042 = vperm.xlu0 %1567, %v573_v29  }
  0x5e   : > { %942 = vperm.xlu1 %1565, %v573_v29  }
  0x5f   : > { %1568 = vset.pattern.permute.xlu0 %v1610_v3 }
  0x60   : > { %593 = vperm.xlu0 %1568, %v559_v11  }
  0x62   : > { %1566 = vset.pattern.permute.xlu1 %v1612_v20 }
  0x63   : > { %986 = vperm.xlu1 %1566, %v559_v11   ;;  %v1220_v11 = vld [vmem:[%s2280_s5 + $0x38] sm:$0xff] }
  0x64   : > { %603 = vperm.xlu0 %1568, %v561_v21  }
  0x67   : > { %994 = vperm.xlu1 %1566, %v561_v21  }
  0x68   : > { %613 = vperm.xlu0 %1568, %v563_v22   ;;  %v1221_v22 = vld [vmem:[%s2280_s5 + $0x40] sm:$0xff] }
  0x6b   : > { %998 = vperm.xlu1 %1566, %v562_v13  }
  0x6c   : > { %623 = vperm.xlu0 %1568, %v565_v23   ;;  %v1093_v23 = vld [vmem:[%s2279_s4 + $0x40] sm:$0xff] }
  0x6f   : > { %1006 = vperm.xlu1 %1566, %v564_v14  }
  0x70   : > { %633 = vperm.xlu0 %1568, %v567_v24  }
  0x73   : > { %1014 = vperm.xlu1 %1566, %v566_v15  }
  0x74   : > { %643 = vperm.xlu0 %1568, %v569_v25  }
  0x77   : > { %1022 = vperm.xlu1 %1566, %v568_v16   ;;  %v1864_v16 = vrot.slane %v1844_v1, %v951_v4 }
  0x78   : > { %653 = vperm.xlu0 %1568, %v571_v26  }
  0x7b   : > { %1030 = vperm.xlu1 %1566, %v570_v17  }
  0x7c   : > { %663 = vperm.xlu0 %1568, %v573_v29  }
  0x7f   : > { %1038 = vperm.xlu1 %1566, %v572_v18  }
  0x80   : > { %1103 = vperm.xlu0 %1568, %v1085_v30  }
  0x83   : > { %1046 = vperm.xlu1 %1566, %v574_v19  }
  0x84   : > { %1118 = vperm.xlu0 %1568, %v1088_v31  }
  0x87   : > { %1569 = vset.pattern.permute.xlu1 %v1610_v3 }
  0x88   : > { %1128 = vperm.xlu0 %1568, %v1090_v32   ;;  %1108 = vperm.xlu1 %1569, %v1086_v33   ;;  %v1222_v33 = vld [vmem:[%s2280_s5 + $0x48] sm:$0xff] }
  0x8c   : > { %1236 = vperm.xlu0 %1568, %v1214_v34   ;;  %1113 = vperm.xlu1 %1569, %v1087_v35   ;;  %v1094_v34 = vld [vmem:[%s2279_s4 + $0x48] sm:$0xff] }
  0x90   : > { %v429_v39 = vpop.permute.xlu1 %428  ;;  %v401_v40 = vpop.permute.xlu0 %400  ;;  %1246 = vperm.xlu0 %1568, %v1216_v36   ;;  %1123 = vperm.xlu1 %1569, %v1089_v37  }
  0x91   : > { %v418_v42 = vmul.f32 %v401_v40, %v390_v38 }
  0x93   : > { %v1812_v46 = vadd.f32 %v429_v39, %v418_v42 }
  0x94   : > { %v434_v47 = vpop.permute.xlu1 %433  ;;  %v406_v48 = vpop.permute.xlu0 %405  ;;  %1251 = vperm.xlu0 %1568, %v1217_v43   ;;  %1231 = vperm.xlu1 %1569, %v1213_v44  }
  0x95   : > { %v1818_v50 = vmul.f32 0.70710677, %v1812_v46  ;;  %v419_v51 = vmul.f32 %v406_v48, %v391_v45  ;;  %v1223_v45 = vld [vmem:[%s2280_s5 + $0x50] sm:$0xff] }
  0x97   : > { %v458_v54 = vand.u32 2147483647, %v1818_v50  ;;  %v1830_v55 = vadd.f32 %v434_v47, %v419_v51  ;;  %v1095_v47 = vld [vmem:[%s2279_s4 + $0x50] sm:$0xff]  ;;  %vm538_vm1 = vcmp.ge.f32.partialorder %v1818_v50, 0.0 }
  0x98   : > { %v416_v56 = vpop.permute.xlu1 %415  ;;  %v411_v58 = vpop.permute.xlu0 %410  ;;  %1256 = vperm.xlu0 %1568, %v1218_v52   ;;  %1241 = vperm.xlu1 %1569, %v1215_v53  }
  0x99   : > { %v462_v61 = vmul.f32 0.3275911, %v458_v54  ;;  %v1836_v62 = vmul.f32 0.70710677, %v1830_v55  ;;  %v421_v5 = vmul.f32 %v416_v56, %v393_v57  ;;  %v420_v6 = vmul.f32 %v411_v58, %v392_v59 }
  0x9a   : > { %v514_v26 = vsub.f32 0.0, %v458_v54 }
  0x9b   : > { %v466_v2 = vadd.f32 1.0, %v462_v61  ;;  %v459_v3 = vand.u32 2147483647, %v1836_v62  ;;  %vm539_vm2 = vcmp.ge.f32.partialorder %v1836_v62, 0.0 }
  0x9c   : > { %v444_v7 = vpop.permute.xlu1 %443  ;;  %v439_v8 = vpop.permute.xlu0 %438  ;;  %1261 = vperm.xlu0 %1568, %v1219_v63   ;;  %1133 = vperm.xlu1 %1569, %v1091_v0   ;;  %v518_v38 = vmul.f32 %v514_v26, %v458_v54  ;;  %v1224_v0 = vld [vmem:[%s2280_s5 + $0x58] sm:$0xff] }
  0x9d   : > { %1570 = vrcp.f32 %v466_v2  ;;  %v463_v9 = vmul.f32 0.3275911, %v459_v3  ;;  %v1859_v13 = vadd.f32 %v444_v7, %v421_v5  ;;  %v1861_v14 = vadd.f32 %v439_v8, %v420_v6  ;;  %v1096_v2 = vld [vmem:[%s2279_s4 + $0x58] sm:$0xff] }
  0x9e   : > { %v515_v39 = vsub.f32 0.0, %v459_v3  ;;  %v522_v53 = vmul.f32 1.442695, %v518_v38 }
  0x9f   : > { %v467_v15 = vadd.f32 1.0, %v463_v9  ;;  %v1867_v17 = vmul.f32 0.70710677, %v1859_v13  ;;  %v1870_v18 = vmul.f32 0.70710677, %v1861_v14 }
  0xa0   : > { %v599_v19 = vpop.permute.xlu1 %598  ;;  %1266 = vperm.xlu0 %1568, %v1220_v11   ;;  %1138 = vperm.xlu1 %1569, %v1092_v12   ;;  %v519_v54 = vmul.f32 %v515_v39, %v459_v3 }
  0xa1   : > { %1572 = vrcp.f32 %v467_v15  ;;  %v1873_v20 = vmul.f32 %v1851_v10, %v599_v19  ;;  %v887_v21 = vpop.permute.xlu0 %886  ;;  %v461_v24 = vand.u32 2147483647, %v1867_v17  ;;  %v1883_v25 = vand.u32 2147483647, %v1870_v18 }
  0xa2   : > { %v1886_v27 = vmul.f32 %v1864_v16, %v887_v21  ;;  %v524_v6 = vmul.f32 1.442695, %v519_v54  ;;  %v1225_v21 = vld [vmem:[%s2280_s5 + $0x60] sm:$0xff]  ;;  %vm541_vm3 = vcmp.ge.f32.partialorder %v1867_v17, 0.0  ;;  %vm540_vm4 = vcmp.ge.f32.partialorder %v1870_v18, 0.0 }
  0xa3   : > { %v465_v28 = vmul.f32 0.3275911, %v461_v24  ;;  %v464_v29 = vmul.f32 0.3275911, %v1883_v25  ;;  %v517_v59 = vsub.f32 0.0, %v461_v24  ;;  %v516_v7 = vsub.f32 0.0, %v1883_v25 }
  0xa4   : > { %v609_v30 = vpop.permute.xlu1 %608  ;;  %1271 = vperm.xlu0 %1568, %v1221_v22   ;;  %1143 = vperm.xlu1 %1569, %v1093_v23   ;;  %v1097_v22 = vld [vmem:[%s2279_s4 + $0x60] sm:$0xff]  ;;  %v452_v17 = vmul.f32 0.5, %v1861_v14 }
  0xa5   : > { %v1890_v31 = vmul.f32 %v1851_v10, %v609_v30  ;;  %v899_v32 = vpop.permute.xlu0 %898  ;;  %v469_v35 = vadd.f32 1.0, %v465_v28  ;;  %v468_v36 = vadd.f32 1.0, %v464_v29  ;;  %v521_v12 = vmul.f32 %v517_v59, %v461_v24 }
  0xa6   : > { %v1901_v40 = vmul.f32 %v1864_v16, %v899_v32  ;;  %v520_v32 = vmul.f32 %v516_v7, %v1883_v25  ;;  %v1098_v25 = vld [vmem:[%s2279_s4 + $0x68] sm:$0xff] }
  0xa7   : > { %v1898_v37 = vpop.eup %1570  ;;  %1574 = vrcp.f32 %v469_v35  ;;  %v528_v39 = vmul.f32 1.442695, %v521_v12 }
  0xa8   : > { %v478_v41 = vmul.f32 1.0614054, %v1898_v37  ;;  %v619_v42 = vpop.permute.xlu1 %618  ;;  %1276 = vperm.xlu0 %1568, %v1222_v33   ;;  %1148 = vperm.xlu1 %1569, %v1094_v34   ;;  %1576 = vrcp.f32 %v468_v36 }
  0xa9   : > { %v1905_v43 = vmul.f32 %v1851_v10, %v619_v42  ;;  %v907_v44 = vpop.permute.xlu0 %906  ;;  %1578 = vpow2.f32 %v522_v53 }
  0xaa   : > { %v482_v48 = vadd.f32 -1.4531521, %v478_v41  ;;  %v1914_v51 = vmul.f32 %v1864_v16, %v907_v44  ;;  %1580 = vpow2.f32 %v524_v6  ;;  %v1226_v44 = vld [vmem:[%s2280_s5 + $0x68] sm:$0xff]  ;;  %v1228_v6 = vld [vmem:[%s2280_s5 + $0x78] sm:$0xff] }
  0xab   : > { %v1916_v52 = vpop.eup %1572  ;;  %1582 = vpow2.f32 %v528_v39 }
  0xac   : > { %v486_v56 = vmul.f32 %v1898_v37, %v482_v48  ;;  %v479_v57 = vmul.f32 1.0614054, %v1916_v52  ;;  %v629_v58 = vpop.permute.xlu1 %628  ;;  %1281 = vperm.xlu0 %1568, %v1223_v45   ;;  %1153 = vperm.xlu1 %1569, %v1095_v47  }
  0xad   : > { %v1921_v61 = vmul.f32 %v1851_v10, %v629_v58  ;;  %v915_v63 = vpop.permute.xlu0 %914 }
  0xae   : > { %v490_v3 = vadd.f32 1.4214138, %v486_v56  ;;  %v483_v4 = vadd.f32 -1.4531521, %v479_v57  ;;  %v1930_v5 = vmul.f32 %v1864_v16, %v915_v63  ;;  %v526_v56 = vmul.f32 1.442695, %v520_v32 }
  0xb0   : > { %2288 = vst [vmem:[#allocation4_spill] sm:$0xff] %v1930_v5  ;;  %v494_v8 = vmul.f32 %v1898_v37, %v490_v3  ;;  %v487_v9 = vmul.f32 %v1916_v52, %v483_v4  ;;  %v639_v11 = vpop.permute.xlu1 %638  ;;  %1286 = vperm.xlu0 %1568, %v1224_v0   ;;  %1158 = vperm.xlu1 %1569, %v1096_v2   ;;  %1584 = vpow2.f32 %v526_v56  ;;  %v1227_v56 = vld [vmem:[%s2280_s5 + $0x70] sm:$0xff] }
  0xb1   : > { %v1936_v15 = vmul.f32 %v1851_v10, %v639_v11  ;;  %v923_v19 = vpop.permute.xlu0 %922  ;;  %v1944_v23 = vpop.eup %1574 }
  0xb2   : > { %v498_v26 = vadd.f32 -0.28449672, %v494_v8  ;;  %v491_v28 = vadd.f32 1.4214138, %v487_v9  ;;  %v1947_v29 = vmul.f32 %v1864_v16, %v923_v19  ;;  %v1949_v24 = vpop.eup %1576  ;;  %v481_v30 = vmul.f32 1.0614054, %v1944_v23 }
  0xb3   : > { %v480_v35 = vmul.f32 1.0614054, %v1949_v24  ;;  %v1579_v0 = vpop.eup %1578  ;;  %v1051_v19 = vsub.s32 2, %v1815_v49 }
  0xb4   : > { %v502_v33 = vmul.f32 %v1898_v37, %v498_v26  ;;  %v495_v34 = vmul.f32 %v1916_v52, %v491_v28  ;;  %v649_v36 = vpop.permute.xlu1 %648  ;;  %1291 = vperm.xlu0 %1568, %v1225_v21   ;;  %1163 = vperm.xlu1 %1569, %v1097_v22   ;;  %v485_v38 = vadd.f32 -1.4531521, %v481_v30  ;;  %v1581_v30 = vpop.eup %1580 }
  0xb5   : > { %v1957_v41 = vmul.f32 %v1851_v10, %v649_v36  ;;  %v931_v42 = vpop.permute.xlu0 %930  ;;  %v484_v48 = vadd.f32 -1.4531521, %v480_v35  ;;  %v1100_v35 = vld [vmem:[%s2279_s4 + $0x78] sm:$0xff] }
  0xb6   : > { %v506_v45 = vadd.f32 0.2548296, %v502_v33  ;;  %v499_v47 = vadd.f32 -0.28449672, %v495_v34  ;;  %v1966_v53 = vmul.f32 %v1864_v16, %v931_v42  ;;  %v489_v54 = vmul.f32 %v1944_v23, %v485_v38 }
  0xb7   : > { %v488_v59 = vmul.f32 %v1949_v24, %v484_v48 }
  0xb8   : > { %v510_v57 = vmul.f32 %v1898_v37, %v506_v45  ;;  %v503_v58 = vmul.f32 %v1916_v52, %v499_v47  ;;  %v659_v63 = vpop.permute.xlu1 %658  ;;  %1296 = vperm.xlu0 %1568, %v1226_v44   ;;  %1168 = vperm.xlu1 %1569, %v1098_v25   ;;  %v493_v2 = vadd.f32 1.4214138, %v489_v54  ;;  %v1099_v37 = vld [vmem:[%s2279_s4 + $0x70] sm:$0xff]  ;;  %v2000_v44 = vrot.slane %v1844_v1, %v1051_v19 }
  0xb9   : > { %v1973_v3 = vmul.f32 %v1851_v10, %v659_v63  ;;  %v939_v4 = vpop.permute.xlu0 %938  ;;  %v492_v9 = vadd.f32 1.4214138, %v488_v59  ;;  %v1583_v63 = vpop.eup %1582 }
  0xba   : > { %v530_v7 = vmul.f32 %v1579_v0, %v510_v57  ;;  %v507_v8 = vadd.f32 0.2548296, %v503_v58  ;;  %v1982_v11 = vmul.f32 %v1864_v16, %v939_v4  ;;  %v497_v12 = vmul.f32 %v1944_v23, %v493_v2 }
  0xbb   : > { %v496_v26 = vmul.f32 %v1949_v24, %v492_v9 }
  0xbc   : > { %v534_v21 = vsub.f32 1.0, %v530_v7  ;;  %v511_v22 = vmul.f32 %v1916_v52, %v507_v8  ;;  %v669_v28 = vpop.permute.xlu1 %668  ;;  %1306 = vperm.xlu0 %1568, %v1228_v6   ;;  %1173 = vperm.xlu1 %1569, %v1099_v37   ;;  %v501_v32 = vadd.f32 -0.28449672, %v497_v12  ;;  %v1585_v37 = vpop.eup %1584  ;;  %v450_v7 = vmul.f32 0.5, %v1812_v46 }
  0xbd   : > { %v1989_v33 = vmul.f32 %v1851_v10, %v669_v28  ;;  %v947_v34 = vpop.permute.xlu0 %946  ;;  %v500_v39 = vadd.f32 -0.28449672, %v496_v26  ;;  %v451_v8 = vmul.f32 0.5, %v1830_v55 }
  0xbe   : > { %v542_v36 = vsub.f32 0.0, %v534_v21  ;;  %v531_v38 = vmul.f32 %v1581_v30, %v511_v22  ;;  %v1995_v52 = vmul.f32 %v1864_v16, %v947_v34  ;;  %v505_v42 = vmul.f32 %v1944_v23, %v501_v32 }
  0xbf   : > { %v504_v47 = vmul.f32 %v1949_v24, %v500_v39 }
  0xc0   : > { %2289 = vst [vmem:[#allocation5_spill] sm:$0xff] %v1995_v52  ;;  %v546_v25 = vsel %vm538_vm1, %v534_v21, %v542_v36  ;;  %v535_v45 = vsub.f32 1.0, %v531_v38  ;;  %1178 = vperm.xlu1 %1569, %v1100_v35   ;;  %v509_v48 = vadd.f32 0.2548296, %v505_v42  ;;  %v1346_v21 = vld [vmem:[#allocation2] sm:$0x1] }
  0xc1   : > { %v891_v54 = vpop.permute.xlu1 %890  ;;  %v508_v58 = vadd.f32 0.2548296, %v504_v47  ;;  %v550_v1 = vadd.f32 1.0, %v546_v25  ;;  %v453_v25 = vmul.f32 0.5, %v1859_v13 }
  0xc2   : > { %v543_v57 = vsub.f32 0.0, %v535_v45  ;;  %v991_v59 = vpop.permute.xlu0 %990  ;;  %v2007_v50 = vmul.f32 %v1864_v16, %v891_v54  ;;  %v513_v0 = vmul.f32 %v1944_v23, %v509_v48 }
  0xc3   : > { %v2012_v2 = vmul.f32 %v2000_v44, %v991_v59  ;;  %v512_v6 = vmul.f32 %v1949_v24, %v508_v58  ;;  %v554_v26 = vmul.f32 %v550_v1, %v450_v7  ;;  %v585_v7 = vld [vmem:[%s2277_s2 + $0x50] sm:$0xff] }
  0xc4   : > { %v547_v4 = vsel %vm539_vm2, %v535_v45, %v543_v57  ;;  %1301 = vperm.xlu1 %1569, %v1227_v56   ;;  %v533_v12 = vmul.f32 %v1583_v63, %v513_v0 }
  0xc5   : > { %v551_v9 = vadd.f32 1.0, %v547_v4  ;;  %v895_v19 = vpop.permute.xlu1 %894  ;;  %v532_v22 = vmul.f32 %v1585_v37, %v512_v6  ;;  %v576_v4 = vld [vmem:[%s2277_s2 + $0x8] sm:$0xff]  ;;  %v577_v37 = vld [vmem:[%s2277_s2 + $0x10] sm:$0xff] }
  0xc6   : > { %v1003_v62 = vpop.permute.xlu0 %1002  ;;  %v2018_v23 = vmul.f32 %v1864_v16, %v895_v19  ;;  %v537_v30 = vsub.f32 1.0, %v533_v12  ;;  %v584_v6 = vld [vmem:[%s2277_s2 + $0x48] sm:$0xff] }
  0xc7   : > { %v555_v28 = vmul.f32 %v551_v9, %v451_v8  ;;  %v2021_v24 = vmul.f32 %v2000_v44, %v1003_v62  ;;  %v536_v32 = vsub.f32 1.0, %v532_v22  ;;  %v586_v22 = vld [vmem:[%s2277_s2 + $0x58] sm:$0xff]  ;;  %v579_v62 = vld [vmem:[%s2277_s2 + $0x20] sm:$0xff] }
  0xc8   : > { %1349 = vperm.xlu1 %1569, %v1346_v21   ;;  %v545_v46 = vsub.f32 0.0, %v537_v30  ;;  %v578_v21 = vld [vmem:[%s2277_s2 + $0x18] sm:$0xff] }
  0xc9   : > { %v1523_v34 = vpack.c.bf16 %v555_v28, %v554_v26  ;;  %v903_v55 = vpop.permute.xlu1 %902  ;;  %v544_v35 = vsub.f32 0.0, %v536_v32  ;;  %v587_v26 = vld [vmem:[%s2277_s2 + $0x60] sm:$0xff] }
  0xca   : > { %v1011_v36 = vpop.permute.xlu0 %1010  ;;  %v2025_v38 = vmul.f32 %v1864_v16, %v903_v55  ;;  %v549_v39 = vsel %vm541_vm3, %v537_v30, %v545_v46  ;;  %v588_v55 = vld [vmem:[%s2277_s2 + $0x68] sm:$0xff] }
  0xcb   : > { %1524 = vmatprep.subr.bf16.mxu0 %v1523_v34  ;;  %1531 = vmatprep.subr.bf16.mxu1 %v1523_v34  ;;  %v2029_v42 = vmul.f32 %v2000_v44, %v1011_v36  ;;  %v553_v45 = vadd.f32 1.0, %v549_v39  ;;  %v548_v47 = vsel %vm540_vm4, %v536_v32, %v544_v35  ;;  %v581_v35 = vld [vmem:[%s2277_s2 + $0x30] sm:$0xff] }
  0xcc   : > { %1526 = vmatpush3.bf16.msra.mxu0 %v1523_v34  ;;  %1533 = vmatpush3.bf16.msra.mxu1 %v1523_v34  ;;  %v552_v48 = vadd.f32 1.0, %v548_v47  ;;  %v580_v34 = vld [vmem:[%s2277_s2 + $0x28] sm:$0xff]  ;;  %v589_v36 = vld [vmem:[%s2277_s2 + $0x70] sm:$0xff]  ;;  %v590_v47 = vld [vmem:[%s2277_s2 + $0x78] sm:$0xff] }
  0xcd   : > { %2290 = vst [vmem:[#allocation6_spill] sm:$0xff] %v2029_v42  ;;  %v911_v54 = vpop.permute.xlu1 %910  ;;  %v557_v56 = vmul.f32 %v553_v45, %v453_v25  ;;  %v582_v45 = vld [vmem:[%s2277_s2 + $0x38] sm:$0xff] }
  0xce   : > { %v1019_v57 = vpop.permute.xlu0 %1018  ;;  %v2034_v58 = vmul.f32 %v1864_v16, %v911_v54  ;;  %v556_v18 = vmul.f32 %v552_v48, %v452_v17 }
  0xcf   : > { %v2037_v59 = vmul.f32 %v2000_v44, %v1019_v57 }
  0xd0   : > { %2291 = vst [vmem:[#allocation7_spill] sm:$0xff] %v2034_v58  ;;  %v1527_v63 = vpack.c.bf16 %v557_v56, %v556_v18 }
  0xd1   : > { %v919_v1 = vpop.permute.xlu1 %918 }
  0xd2   : > { %v1027_v13 = vpop.permute.xlu0 %1026  ;;  %v2040_v0 = vmul.f32 %v1864_v16, %v919_v1  ;;  %1528 = vmatprep.subr.bf16.mxu0 %v1527_v63  ;;  %1532 = vmatprep.subr.bf16.mxu1 %v1527_v63 }
  0xd3   : > { %v2043_v14 = vmul.f32 %v2000_v44, %v1027_v13  ;;  %1530 = vmatpush3.bf16.msra.mxu0 %v1527_v63  ;;  %1534 = vmatpush3.bf16.msra.mxu1 %v1527_v63 }
  0xd5   : > { %v927_v8 = vpop.permute.xlu1 %926 }
  0xd6   : > { %v1035_v9 = vpop.permute.xlu0 %1034  ;;  %v2058_v12 = vmul.f32 %v1864_v16, %v927_v8  ;;  %1500 = vmatmul.mubr.msk.f32.vlgmr.msra.gmra.mrb[0].mxu0 %vm691_vm0, %v576_v4  ;;  %1512 = vmatmul.mubr.msk.f32.vlgmr.msra.gmra.mrb[0].mxu1 %vm691_vm0, %v584_v6 }
  0xd7   : > { %v2063_v19 = vmul.f32 %v2000_v44, %v1035_v9  ;;  %1502 = vmatprep.mubr.msk.f32.mxu0 %vm691_vm0, %v577_v37  ;;  %1514 = vmatprep.mubr.msk.f32.mxu1 %vm691_vm0, %v585_v7 }
  0xd9   : > { %2292 = vst [vmem:[#allocation8_spill] sm:$0xff] %v2063_v19  ;;  %v935_v28 = vpop.permute.xlu1 %934 }
  0xda   : > { %v1043_v30 = vpop.permute.xlu0 %1042  ;;  %v2080_v32 = vmul.f32 %v1864_v16, %v935_v28  ;;  %1503 = vmatmul.mubr.msk.f32.gmra.mrb[2].mxu0 %vm691_vm0, %v578_v21  ;;  %1515 = vmatmul.mubr.msk.f32.gmra.mrb[2].mxu1 %vm691_vm0, %v586_v22 }
  0xdb   : > { %v2085_v46 = vmul.f32 %v2000_v44, %v1043_v30  ;;  %1505 = vmatprep.mubr.msk.f32.mxu0 %vm691_vm0, %v579_v62  ;;  %1517 = vmatprep.mubr.msk.f32.mxu1 %vm691_vm0, %v587_v26 }
  0xdd   : > { %2293 = vst [vmem:[#allocation9_spill] sm:$0xff] %v2085_v46  ;;  %v943_v39 = vpop.permute.xlu1 %942 }
  0xde   : > { %v2102_v25 = vmul.f32 %v1864_v16, %v943_v39  ;;  %1506 = vmatmul.mubr.msk.f32.gmra.mrb[4].mxu0 %vm691_vm0, %v580_v34  ;;  %1518 = vmatmul.mubr.msk.f32.gmra.mrb[4].mxu1 %vm691_vm0, %v588_v55 }
  0xdf   : > { %1508 = vmatprep.mubr.msk.f32.mxu0 %vm691_vm0, %v581_v35  ;;  %1520 = vmatprep.mubr.msk.f32.mxu1 %vm691_vm0, %v589_v36  ;;  %v594_v48 = vpop.permute.xlu0 %593 }
  0xe0   : > { %2294 = vst [vmem:[#allocation10_spill] sm:$0xff] %v2102_v25  ;;  %v675_v19 = vmul.f32 %v1851_v10, %v594_v48 }
  0xe2   : > { %1509 = vmatmul.mubr.msk.f32.gmra.mrb[6].mxu0 %vm691_vm0, %v582_v45  ;;  %1521 = vmatmul.mubr.msk.f32.gmra.mrb[6].mxu1 %vm691_vm0, %v590_v47  ;;  %v987_v16 = vpop.permute.xlu1 %986 }
  0xe3   : > { %v604_v56 = vpop.permute.xlu0 %603 }
  0xe6   : > { %v2116_v17 = vpop.permute.xlu1 %994 }
  0xe7   : > { %v2120_v18 = vpop.permute.xlu0 %613 }
  0xea   : > { %v999_v54 = vpop.permute.xlu1 %998 }
  0xeb   : > { %v2124_v1 = vpop.permute.xlu0 %623 }
  0xee   : > { %v2118_v57 = vpop.permute.xlu1 %1006 }
  0xef   : > { %v634_v4 = vpop.permute.xlu0 %633 }
  0xf2   : > { %v2122_v63 = vpop.permute.xlu1 %1014 }
  0xf3   : > { %v644_v37 = vpop.permute.xlu0 %643 }
  0xf6   : > { %v1023_v13 = vpop.permute.xlu1 %1022 }
  0xf7   : > { %v2128_v8 = vpop.permute.xlu0 %653 }
  0xfa   : > { %v1031_v6 = vpop.permute.xlu1 %1030 }
  0xfb   : > { %v2132_v21 = vpop.permute.xlu0 %663 }
  0xfe   : > { %v2126_v7 = vpop.permute.xlu1 %1038 }
  0xff   : > { %v1104_v62 = vpop.permute.xlu0 %1103 }
 0x102   : > { %v2130_v9 = vpop.permute.xlu1 %1046 }
 0x103   : > { %2295 = vst [vmem:[#allocation11_spill] sm:$0xff] %v2130_v9  ;;  %v2136_v28 = vpop.permute.xlu0 %1118 }
 0x107   : > { %v1109_v22 = vpop.permute.xlu1 %1108  ;;  %v2140_v34 = vpop.permute.xlu0 %1128 }
 0x108   : > { %2297 = vst [vmem:[#allocation13_spill] sm:$0xff] %v2140_v34 }
 0x10b   : > { %v2134_v26 = vpop.permute.xlu1 %1113  ;;  %v2144_v35 = vpop.permute.xlu0 %1236 }
 0x10f   : > { %v2138_v30 = vpop.permute.xlu1 %1123  ;;  %v2148_v39 = vpop.permute.xlu0 %1246 }
 0x110   : > { %2296 = vst [vmem:[#allocation12_spill] sm:$0xff] %v2138_v30  ;;  %v683_v30 = vmul.f32 %v1851_v10, %v634_v4 }
 0x113   : > { %v2142_v55 = vpop.permute.xlu1 %1231  ;;  %v2152_v47 = vpop.permute.xlu0 %1251 }
 0x114   : > { %2299 = vst [vmem:[#allocation15_spill] sm:$0xff] %v2152_v47 }
 0x117   : > { %v2146_v36 = vpop.permute.xlu1 %1241  ;;  %v2156_v49 = vpop.permute.xlu0 %1256 }
 0x118   : > { %2301 = vst [vmem:[#allocation17_spill] sm:$0xff] %v2156_v49 }
 0x11b   : > { %v2150_v45 = vpop.permute.xlu1 %1133  ;;  %v2160_v25 = vpop.permute.xlu0 %1261 }
 0x11c   : > { %2298 = vst [vmem:[#allocation14_spill] sm:$0xff] %v2150_v45  ;;  %2303 = vst [vmem:[#allocation19_spill] sm:$0xff] %v2160_v25 }
 0x11f   : > { %v2154_v60 = vpop.permute.xlu1 %1138  ;;  %v2164_v58 = vpop.permute.xlu0 %1266 }
 0x120   : > { %2300 = vst [vmem:[#allocation16_spill] sm:$0xff] %v2154_v60  ;;  %2305 = vst [vmem:[#allocation21_spill] sm:$0xff] %v2164_v58  ;;  %v1062_v58 = vmul.f32 %v2000_v44, %v1023_v13 }
 0x123   : > { %v2158_v46 = vpop.permute.xlu1 %1143 }
 0x124   : > { %2302 = vst [vmem:[#allocation18_spill] sm:$0xff] %v2158_v46  ;;  %v1053_v46 = vmul.f32 %v2000_v44, %v987_v16 }
 0x127   : > { %v2162_v42 = vpop.permute.xlu1 %1148 }
 0x128   : > { %2304 = vst [vmem:[#allocation20_spill] sm:$0xff] %v2162_v42  ;;  %v677_v42 = vmul.f32 %v1851_v10, %v604_v56 }
 0x12b   : > { %v2173_v9 = vpop.permute.xlu1 %1153 }
 0x1a9   : > { %v1501_v52 = vpop.f32.mrb[0].mxu0  ;;  %v1513_v45 = vpop.f32.mrb[0].mxu1 }
 0x1aa   : > { %v812_v47 = vadd.f32 %v1501_v52, %v1873_v20  ;;  %v852_v60 = vadd.f32 %v1513_v45, %v1936_v15  ;;  %v806_v5 = vpop.f32.mrb[1].mxu0  ;;  %v846_v49 = vpop.f32.mrb[1].mxu1  ;;  %v685_v20 = vmul.f32 %v1851_v10, %v644_v37  ;;  %v1056_v15 = vmul.f32 %v2000_v44, %v999_v54 }
 0x1ab   : > { %v807_v34 = vadd.f32 %v806_v5, %v675_v19  ;;  %v847_v25 = vadd.f32 %v846_v49, %v683_v30 }
 0x1ac   : > { %v970_v48 = vadd.f32 %v2007_v50, %v812_v47  ;;  %v978_v4 = vadd.f32 %v1947_v29, %v852_v60 }
 0x1ad   : > { %v969_v52 = vadd.f32 %v1886_v27, %v807_v34  ;;  %v977_v16 = vadd.f32 %v2040_v0, %v847_v25  ;;  %v1504_v5 = vpop.f32.mrb[2].mxu0  ;;  %v1516_v49 = vpop.f32.mrb[2].mxu1  ;;  %v1064_v0 = vmul.f32 %v2000_v44, %v1031_v6 }
 0x1ae   : > { %v1070_v19 = vadd.f32 %v2012_v2, %v970_v48  ;;  %v2182_v56 = vadd.f32 %v1062_v58, %v978_v4  ;;  %v822_v13 = vadd.f32 %v1504_v5, %v1890_v31  ;;  %v862_v50 = vadd.f32 %v1516_v49, %v1957_v41  ;;  %v816_v30 = vpop.f32.mrb[3].mxu0  ;;  %v856_v60 = vpop.f32.mrb[3].mxu1 }
 0x1af   : > { %v1069_v29 = vadd.f32 %v1053_v46, %v969_v52  ;;  %v2187_v37 = vadd.f32 %v2037_v59, %v977_v16  ;;  %v817_v54 = vadd.f32 %v816_v30, %v677_v42  ;;  %v857_v27 = vadd.f32 %v856_v60, %v685_v20  ;;  %v2190_v25 = vpop.permute.xlu0 %1271 }
 0x1b0   : > { %v1182_v34 = vadd.f32 %v1109_v22, %v1070_v19  ;;  %v972_v2 = vadd.f32 %v1901_v40, %v822_v13  ;;  %v980_v58 = vadd.f32 %v1966_v53, %v862_v50  ;;  %v1055_v31 = vmul.f32 %v2000_v44, %v2116_v17 }
 0x1b1   : > { %v1181_v41 = vadd.f32 %v1104_v62, %v1069_v29  ;;  %v971_v46 = vadd.f32 %v2018_v23, %v817_v54  ;;  %v979_v59 = vadd.f32 %v2058_v12, %v857_v27  ;;  %v1507_v45 = vpop.f32.mrb[4].mxu0  ;;  %v1519_v42 = vpop.f32.mrb[4].mxu1  ;;  %v679_v17 = vmul.f32 %v1851_v10, %v2120_v18 }
 0x1b2   : > { %v1198_v47 = vmax.f32 %v1182_v34, 0.0  ;;  %v1072_v48 = vadd.f32 %v1056_v15, %v972_v2  ;;  %v2198_v6 = vadd.f32 %v1064_v0, %v980_v58  ;;  %v826_v4 = vpop.f32.mrb[5].mxu0  ;;  %v866_v22 = vpop.f32.mrb[5].mxu1  ;;  %v681_v15 = vmul.f32 %v1851_v10, %v2124_v1 }
 0x1b3   : > { %v1197_v20 = vmax.f32 %v1181_v41, 0.0  ;;  %v1071_v40 = vadd.f32 %v1055_v31, %v971_v46  ;;  %v2201_v53 = vadd.f32 %v2043_v14, %v979_v59  ;;  %v2205_v62 = vpop.permute.xlu1 %1158  ;;  %v1058_v52 = vmul.f32 %v2000_v44, %v2118_v57  ;;  %v2309_v59 = vld [vmem:[#allocation5_spill] sm:$0xff] }
 0x1b4   : > { %v1310_v23 = vmul.f32 %v2144_v35, %v1198_v47  ;;  %v1184_v12 = vadd.f32 %v2136_v28, %v1072_v48  ;;  %v1060_v18 = vmul.f32 %v2000_v44, %v2122_v63  ;;  %v832_v35 = vadd.f32 %v1507_v45, %v1905_v43  ;;  %v1277_v63 = vpop.permute.xlu0 %1276 }
 0x1b5   : > { %v1309_v16 = vmul.f32 %v2142_v55, %v1197_v20  ;;  %v1183_v14 = vadd.f32 %v2134_v26, %v1071_v40  ;;  %v1510_v5 = vpop.f32.mrb[6].mxu0  ;;  %v1522_v49 = vpop.f32.mrb[6].mxu1  ;;  %v872_v28 = vadd.f32 %v1519_v42, %v1973_v3  ;;  %v687_v1 = vmul.f32 %v1851_v10, %v2128_v8  ;;  %v2310_v42 = vld [vmem:[#allocation12_spill] sm:$0xff] }
 0x1b6   : > { %v1200_v19 = vmax.f32 %v1184_v12, 0.0  ;;  %v836_v13 = vpop.f32.mrb[7].mxu0  ;;  %v876_v50 = vpop.f32.mrb[7].mxu1  ;;  %v827_v55 = vadd.f32 %v826_v4, %v679_v17  ;;  %v689_v26 = vmul.f32 %v1851_v10, %v2132_v21  ;;  %v1066_v60 = vmul.f32 %v2000_v44, %v2126_v7  ;;  %v2312_v4 = vld [vmem:[#allocation7_spill] sm:$0xff] }
 0x1b7   : > { %v1325_v57 = vadd.f32 %v1310_v23, %v1309_v16  ;;  %v1199_v30 = vmax.f32 %v1183_v14, 0.0  ;;  %v974_v29 = vadd.f32 %v1914_v51, %v832_v35  ;;  %v982_v43 = vadd.f32 %v1982_v11, %v872_v28  ;;  %v2306_v11 = vld [vmem:[#allocation11_spill] sm:$0xff]  ;;  %v1164_v31 = vpop.permute.xlu1 %1163  ;;  %v2315_v16 = vld [vmem:[#allocation18_spill] sm:$0xff] }
 0x1b8   : > { %v1312_v3 = vmul.f32 %v2148_v39, %v1200_v19  ;;  %v973_v8 = vadd.f32 %v2025_v38, %v827_v55  ;;  %v867_v27 = vadd.f32 %v866_v22, %v687_v1  ;;  %v842_v2 = vadd.f32 %v1510_v5, %v1921_v61  ;;  %v2308_v38 = vld [vmem:[#allocation4_spill] sm:$0xff]  ;;  %v1282_v22 = vpop.permute.xlu0 %1281  ;;  %v2316_v5 = vld [vmem:[#allocation15_spill] sm:$0xff]  ;;  %v2317_v19 = vld [vmem:[#allocation14_spill] sm:$0xff] }
 0x1b9   : > { %v1311_v54 = vmul.f32 %v2146_v36, %v1199_v30  ;;  %v1074_v0 = vadd.f32 %v1058_v52, %v974_v29  ;;  %v1082_v34 = vadd.f32 %v1066_v60, %v982_v43  ;;  %v882_v10 = vadd.f32 %v1522_v49, %v1989_v33  ;;  %v2307_v36 = vld [vmem:[#allocation13_spill] sm:$0xff]  ;;  %v2311_v33 = vld [vmem:[#allocation8_spill] sm:$0xff]  ;;  %v2318_v28 = vld [vmem:[#allocation10_spill] sm:$0xff] }
 0x1ba   : > { %v1073_v7 = vadd.f32 %v2021_v24, %v973_v8  ;;  %v981_v51 = vadd.f32 %v2080_v32, %v867_v27  ;;  %v837_v58 = vadd.f32 %v836_v13, %v681_v15  ;;  %v1068_v39 = vmul.f32 %v2000_v44, %v2306_v11  ;;  %v2313_v44 = vld [vmem:[#allocation6_spill] sm:$0xff]  ;;  %v2314_v15 = vld [vmem:[#allocation16_spill] sm:$0xff]  ;;  %v2320_v30 = vld [vmem:[#allocation17_spill] sm:$0xff] }
 0x1bb   : > { %v1326_v21 = vadd.f32 %v1325_v57, %v1311_v54  ;;  %v1186_v41 = vadd.f32 %v2307_v36, %v1074_v0  ;;  %v976_v46 = vadd.f32 %v2308_v38, %v842_v2  ;;  %v984_v45 = vadd.f32 %v2309_v59, %v882_v10  ;;  %v1169_v1 = vpop.permute.xlu1 %1168  ;;  %v2319_v57 = vld [vmem:[#allocation20_spill] sm:$0xff]  ;;  %v2322_v8 = vld [vmem:[#allocation19_spill] sm:$0xff] }
 0x1bc   : > { %v1185_v61 = vadd.f32 %v2310_v42, %v1073_v7  ;;  %v1081_v48 = vadd.f32 %v2311_v33, %v981_v51  ;;  %v975_v24 = vadd.f32 %v2312_v4, %v837_v58  ;;  %v877_v12 = vadd.f32 %v876_v50, %v689_v26  ;;  %v2321_v26 = vld [vmem:[#allocation9_spill] sm:$0xff] }
 0x1bd   : > { %v1327_v47 = vadd.f32 %v1326_v21, %v1312_v3  ;;  %v1202_v32 = vmax.f32 %v1186_v41, 0.0  ;;  %v1076_v20 = vadd.f32 %v1060_v18, %v976_v46  ;;  %v1084_v40 = vadd.f32 %v1068_v39, %v984_v45  ;;  %v1287_v3 = vpop.permute.xlu0 %1286 }
 0x1be   : > { %v1201_v17 = vmax.f32 %v1185_v61, 0.0  ;;  %v1075_v23 = vadd.f32 %v2313_v44, %v975_v24  ;;  %v1189_v14 = vadd.f32 %v2315_v16, %v2187_v37  ;;  %v983_v13 = vadd.f32 %v2318_v28, %v877_v12 }
 0x1bf   : > { %v1188_v52 = vadd.f32 %v2314_v15, %v1076_v20  ;;  %v1190_v18 = vadd.f32 %v2319_v57, %v2182_v56  ;;  %v1314_v55 = vmul.f32 %v2320_v30, %v1202_v32  ;;  %v1191_v37 = vadd.f32 %v2173_v9, %v2201_v53  ;;  %v2323_v56 = vld [vmem:[#allocation21_spill] sm:$0xff]  ;;  %v1174_v51 = vpop.permute.xlu1 %1173 }
 0x1c0   : > { %v1313_v49 = vmul.f32 %v2316_v5, %v1201_v17  ;;  %v1187_v35 = vadd.f32 %v2317_v19, %v1075_v23  ;;  %v1083_v43 = vadd.f32 %v2321_v26, %v983_v13  ;;  %v1205_v54 = vmax.f32 %v1189_v14, 0.0  ;;  %v2324_v19 = vld [vmem:[#allocation3_spill] sm:$0xff] }
 0x1c1   : > { %v1204_v29 = vmax.f32 %v1188_v52, 0.0  ;;  %v1206_v2 = vmax.f32 %v1190_v18, 0.0  ;;  %v1192_v10 = vadd.f32 %v2205_v62, %v2198_v6  ;;  %v1207_v11 = vmax.f32 %v1191_v37, 0.0  ;;  %v1292_v41 = vpop.permute.xlu0 %1291 }
 0x1c2   : > { %v1328_v60 = vadd.f32 %v1327_v47, %v1313_v49  ;;  %v1203_v50 = vmax.f32 %v1187_v35, 0.0  ;;  %v1317_v58 = vmul.f32 %v2190_v25, %v1205_v54  ;;  %v1193_v39 = vadd.f32 %v1164_v31, %v1081_v48 }
 0x1c3   : > { %v1316_v21 = vmul.f32 %v2323_v56, %v1204_v29  ;;  %v1318_v38 = vmul.f32 %v1277_v63, %v1206_v2  ;;  %v1208_v46 = vmax.f32 %v1192_v10, 0.0  ;;  %v1194_v9 = vadd.f32 %v1169_v1, %v1082_v34  ;;  %v1179_v47 = vpop.permute.xlu1 %1178 }
 0x1c4   : > { %v1315_v27 = vmul.f32 %v2322_v8, %v1203_v50  ;;  %v1329_v0 = vadd.f32 %v1328_v60, %v1314_v55  ;;  %v1319_v59 = vmul.f32 %v1282_v22, %v1207_v11  ;;  %v1209_v45 = vmax.f32 %v1193_v39, 0.0 }
 0x1c5   : > { %v1195_v61 = vadd.f32 %v1174_v51, %v1083_v43  ;;  %v1320_v6 = vmul.f32 %v1287_v3, %v1208_v46  ;;  %v1210_v62 = vmax.f32 %v1194_v9, 0.0  ;;  %v1196_v33 = vadd.f32 %v1179_v47, %v1084_v40  ;;  %v1297_v24 = vpop.permute.xlu0 %1296 }
 0x1c6   : > { %v1330_v7 = vadd.f32 %v1329_v0, %v1315_v27  ;;  %v1321_v32 = vmul.f32 %v1292_v41, %v1209_v45  ;;  %v2325_v35 = vsub.s32 0, %v2324_v19 }
 0x1c7   : > { %v1211_v25 = vmax.f32 %v1195_v61, 0.0  ;;  %v1322_v31 = vmul.f32 %v1297_v24, %v1210_v62  ;;  %v1212_v48 = vmax.f32 %v1196_v33, 0.0  ;;  %v1302_v63 = vpop.permute.xlu1 %1301 }
 0x1c8   : > { %v1331_v36 = vadd.f32 %v1330_v7, %v1316_v21 }
 0x1c9   : > { %v1323_v34 = vmul.f32 %v1302_v63, %v1211_v25  ;;  %v1307_v22 = vpop.permute.xlu0 %1306 }
 0x1ca   : > { %v1332_v53 = vadd.f32 %v1331_v36, %v1317_v58  ;;  %v1324_v23 = vmul.f32 %v1307_v22, %v1212_v48 }
 0x1cb   : > { %v1350_v5 = vpop.permute.xlu1 %1349 }
 0x1cc   : > { %v1333_v42 = vadd.f32 %v1332_v53, %v1318_v38  ;;  %v1355_v28 = vrot.slane %v1350_v5, %v2325_v35 }
 0x1ce   : > { %v1334_v4 = vadd.f32 %v1333_v42, %v1319_v59 }
 0x1d0   : > { %v1335_v20 = vadd.f32 %v1334_v4, %v1320_v6 }
 0x1d2   : > { %v1336_v17 = vadd.f32 %v1335_v20, %v1321_v32 }
 0x1d4   : > { %v1337_v44 = vadd.f32 %v1336_v17, %v1322_v31 }
 0x1d6   : > { %v1338_v12 = vadd.f32 %v1337_v44, %v1323_v34 }
 0x1d8   : > { %v1339_v15 = vadd.f32 %v1338_v12, %v1324_v23 }
 0x1da   : > { %v1340_v52 = vrot.slane %v1339_v15, 4 }
 0x1dc   : > { %v1341_v16 = vadd.f32 %v1340_v52, %v1339_v15 }
 0x1de   : > { %v1342_v14 = vrot.slane %v1341_v16, 2 }
 0x1e0   : > { %v1343_v40 = vadd.f32 %v1342_v14, %v1341_v16 }
 0x1e2   : > { %v1344_v49 = vrot.slane %v1343_v40, 1 }
 0x1e4   : > { %v1345_v13 = vadd.f32 %v1344_v49, %v1343_v40 }
 0x1e6   : > { %v1356_v1 = vadd.f32 %v1355_v28, %v1345_v13 }
 0x1e8   : > { %1357 = vst [vmem:[%s389_s24] sm:$0x1] %v1356_v1 }
 0x1e9 PF: > { %s21_s13 = sadd.s32 1, %s1608_s13   ;;  %s2326_s11 = smov %s1604_s12 }
 0x1ea   : > { %p18_p5 = scmp.ge.s32.totalorder %s21_s13, 4   ;;  %s2327_s12 = smov %s2329_s6 }
 0x1ec   :  { %20 = sbr.rel (!%p18_p5) target bundleno = 3 (0x3), region = 89 }

</bundles_post_ra>
